<compile_context>
chip_gen: v6e
topology: v6e:2x2x1
jax: 0.10.0
libtpu: 0.0.40
codegen_flags: <defaults>
</compile_context>

<pallas_src>
import math

import jax
import jax.numpy as jnp
from jax.experimental import pallas as pl
from jax.experimental.pallas import tpu as pltpu


_SQRT_2_OVER_PI = math.sqrt(2.0 / math.pi)


def _round_up(n, m):
    return ((n + m - 1) // m) * m


def _gelu_tanh(h):
    # torch.nn.GELU(approximate='tanh'); tanh lowers to the EUP slot.
    return 0.5 * h * (1.0 + jnp.tanh(_SQRT_2_OVER_PI * (h + 0.044715 * h * h * h)))


# ----------------------------------------------------------------------------
# Pallas kernel: fused MLP block  (fc1 -> GELU -> fc2), masks pre-folded
# ----------------------------------------------------------------------------
def dsd_mlp_kernel(x_ref, w1_ref, b1_ref, w2_ref, b2_ref, o_ref, h_ref):
    # x: [tm, D] bf16, w1: [D, H] bf16 (resident), b1: [1, H] f32
    h = jnp.dot(x_ref[...], w1_ref[...],
                preferred_element_type=jnp.float32) + b1_ref[...]
    # GELU in f32 (works on v5e, which has no bf16 VPU/EUP); keep the
    # [tm, H] intermediate in explicit VMEM scratch to avoid vreg spills.
    h_ref[...] = _gelu_tanh(h)

    # fc2: cast to bf16 at the matmul boundary, accumulate in f32.
    o = jnp.dot(h_ref[...].astype(jnp.bfloat16), w2_ref[...],
                preferred_element_type=jnp.float32) + b2_ref[...]
    o_ref[...] = o.astype(o_ref.dtype)


def dsd_mlp(x2d, w1, b1, w2, b2, *, tm=256):
    """x2d: [R, D] bf16 tokens.  w1: [D, H] bf16, w2: [H, D] bf16 (masks already
    folded in, already transposed).  b1: [1, H] f32, b2: [1, D] f32.
    tm: row tile; 256 matches the v6e/v7x 256x256 MXU, use 128 on v5e."""
    R, D = x2d.shape
    H = w1.shape[1]

    # Row tile: multiple of 16 (bf16 sublane packing), never bigger than R.
    tm = min(tm, _round_up(R, 16))
    R_pad = _round_up(R, tm)
    if R_pad != R:
        x2d = jnp.pad(x2d, ((0, R_pad - R), (0, 0)))

    resident = lambda shape: pl.BlockSpec(shape, lambda i: (0, 0))

    out = pl.pallas_call(
        dsd_mlp_kernel,
        out_shape=jax.ShapeDtypeStruct((R_pad, D), jnp.float32),
        grid_spec=pltpu.PrefetchScalarGridSpec(
            num_scalar_prefetch=0,
            grid=(R_pad // tm,),
            in_specs=[
                pl.BlockSpec((tm, D), lambda i: (i, 0)),   # x (pipelined)
                resident((D, H)),                          # w1 (VMEM-resident)
                resident((1, H)),                          # b1
                resident((H, D)),                          # w2
                resident((1, D)),                          # b2
            ],
            out_specs=pl.BlockSpec((tm, D), lambda i: (i, 0)),
            scratch_shapes=[pltpu.VMEM((tm, H), jnp.float32)],
        ),
        compiler_params=pltpu.CompilerParams(
            dimension_semantics=("parallel",),   # rows shard across TCs on v7x
            vmem_limit_bytes=64 * 1024 * 1024,
        ),
    )(x2d, w1, b1, w2, b2)

    return out[:R] if R_pad != R else out


# ----------------------------------------------------------------------------
# Synthetic wrapped model + DSDTraining parameter/mask setup
# ----------------------------------------------------------------------------
def init_params(key, d_model=128, mlp_ratio=4, n_classes=8):
    """Deterministic params.  The first 4 params (cls tok, pos emb, embed W/b)
    mirror the `range(4, len-1)` skip in DSDTraining.__init__; the tracked
    layers are mlp.fc1 / mlp.fc2; the last param (head bias) is excluded."""
    h = d_model * mlp_ratio
    ks = jax.random.split(key, 8)
    s = 0.02
    return {
        "cls_token": s * jax.random.normal(ks[0], (1, 1, d_model), jnp.float32),
        "pos_embed": s * jax.random.normal(ks[1], (1, 1, d_model), jnp.float32),
        "embed_w":   s * jax.random.normal(ks[2], (d_model, d_model), jnp.float32),
        "embed_b":   jnp.zeros((d_model,), jnp.float32),
        "mlp_fc1_w": s * jax.random.normal(ks[3], (h, d_model), jnp.float32),  # [out, in]
        "mlp_fc1_b": s * jax.random.normal(ks[4], (h,), jnp.float32),
        "mlp_fc2_w": s * jax.random.normal(ks[5], (d_model, h), jnp.float32),  # [out, in]
        "mlp_fc2_b": s * jax.random.normal(ks[6], (d_model,), jnp.float32),
        "head_w":    s * jax.random.normal(ks[7], (n_classes, d_model), jnp.float32),
        "head_b":    jnp.zeros((n_classes,), jnp.float32),
    }


def reset_masks(params):
    """DSDTraining.reset_masks(): all-ones boolean masks per (w, b) fc pair."""
    return [
        (jnp.ones_like(params["mlp_fc1_w"], dtype=bool),
         jnp.ones_like(params["mlp_fc1_b"], dtype=bool)),
        (jnp.ones_like(params["mlp_fc2_w"], dtype=bool),
         jnp.ones_like(params["mlp_fc2_b"], dtype=bool)),
    ]


def fold_masks(params, masks):
    """Fold DSD masks into the fc weights/biases once (whenever masks change).
    Also pre-transposes to [in, out] and casts the MXU operands to bf16."""
    (m1, mb1), (m2, mb2) = masks
    w1 = jnp.where(m1, params["mlp_fc1_w"], 0.0).T.astype(jnp.bfloat16)      # [D, H]
    b1 = jnp.where(mb1, params["mlp_fc1_b"], 0.0).reshape(1, -1).astype(jnp.float32)
    w2 = jnp.where(m2, params["mlp_fc2_w"], 0.0).T.astype(jnp.bfloat16)      # [H, D]
    b2 = jnp.where(mb2, params["mlp_fc2_b"], 0.0).reshape(1, -1).astype(jnp.float32)
    return w1, b1, w2, b2


def dsd_forward(params, folded, x):
    """DSDTraining.forward(x) == self.model(x), with pre-folded masked fc params."""
    B, N, D = x.shape

    # glue: embed projection (plain JAX) -- not a DSD-tracked layer
    h0 = x @ params["embed_w"].T + params["embed_b"]                   # [B, N, D]

    # hot path: masked MLP block in Pallas (token-major, bf16 MXU path)
    w1, b1, w2, b2 = folded
    y2d = dsd_mlp(h0.reshape(B * N, D).astype(jnp.bfloat16), w1, b1, w2, b2)
    y = y2d.reshape(B, N, D)

    # glue: classifier head on mean-pooled tokens (plain JAX)
    pooled = y.mean(axis=1)                                            # [B, D]
    return pooled @ params["head_w"].T + params["head_b"]              # [B, n_classes]


def dsd_forward_ref(params, masks, x):
    """Pure-JAX reference with the same bf16 casts / f32 accumulation."""
    B, N, D = x.shape
    h0 = x @ params["embed_w"].T + params["embed_b"]
    w1, b1, w2, b2 = fold_masks(params, masks)
    xb = h0.reshape(B * N, D).astype(jnp.bfloat16)
    h = jnp.dot(xb, w1, preferred_element_type=jnp.float32) + b1
    h = _gelu_tanh(h)
    y = jnp.dot(h.astype(jnp.bfloat16), w2, preferred_element_type=jnp.float32) + b2
    y = y.reshape(B, N, D)
    pooled = y.mean(axis=1)
    return pooled @ params["head_w"].T + params["head_b"]


if __name__ == "__main__":
    key = jax.random.PRNGKey(0)
    kx, kp = jax.random.split(key)

    # Lane-dense demo shapes: D and H are multiples of 128; R = B*N = 512
    # gives a 2-step row grid with tm=256 (pipelined x/out tiles).
    B, N, D = 2, 256, 128
    x = jax.random.normal(kx, (B, N, D), jnp.float32)

    params = init_params(kp, d_model=D, mlp_ratio=4, n_classes=8)
    masks = reset_masks(params)          # DSDTraining starts with all-ones masks
    folded = fold_masks(params, masks)   # fold masks into fc params (done once)

    out = jax.block_until_ready(dsd_forward(params, folded, x))
    ref = jax.block_until_ready(dsd_forward_ref(params, masks, x))

    assert out.shape == (B, 8)
    assert jnp.allclose(out, ref, atol=1e-2, rtol=1e-2), "mismatch vs reference"

    # TODO(synk): update_masks() uses torch.quantile to refresh the masks; it
    # mutates training state outside forward() and is not implemented as a
    # kernel (it would just re-run fold_masks with the new masks).
    print("KERNEL_OK")
</pallas_src>

<mosaic_0001>
module attributes {stable_mosaic.version = 11 : i64} {
  func.func @dsd_mlp_kernel(%arg0: i32, %arg1: memref<256x128xbf16, #tpu.memory_space<vmem>>, %arg2: memref<128x512xbf16, #tpu.memory_space<vmem>>, %arg3: memref<1x512xf32, #tpu.memory_space<vmem>>, %arg4: memref<512x128xbf16, #tpu.memory_space<vmem>>, %arg5: memref<1x128xf32, #tpu.memory_space<vmem>>, %arg6: memref<256x128xf32, #tpu.memory_space<vmem>>, %arg7: memref<256x512xf32, #tpu.memory_space<vmem>>) attributes {dimension_semantics = [#tpu.dimension_semantics<parallel>], iteration_bounds = array<i64: 2>, scalar_prefetch = 0 : i64, scratch_operands = 1 : i64, tpu.core_type = #tpu.core_type<tc>, window_params = [{transform_indices = @transform_0, window_bounds = array<i64: 256, 128>}, {pipeline_mode = #tpu.pipeline_mode<synchronous>, transform_indices = @transform_1, window_bounds = array<i64: 128, 512>}, {pipeline_mode = #tpu.pipeline_mode<synchronous>, transform_indices = @transform_2, window_bounds = array<i64: 1, 512>}, {pipeline_mode = #tpu.pipeline_mode<synchronous>, transform_indices = @transform_3, window_bounds = array<i64: 512, 128>}, {pipeline_mode = #tpu.pipeline_mode<synchronous>, transform_indices = @transform_4, window_bounds = array<i64: 1, 128>}, {transform_indices = @transform_5, window_bounds = array<i64: 256, 128>}]} {
    %c0 = arith.constant 0 : index
    %c0_0 = arith.constant 0 : index
    %0 = vector.load %arg1[%c0, %c0_0] : memref<256x128xbf16, #tpu.memory_space<vmem>>, vector<256x128xbf16>
    %c0_1 = arith.constant 0 : index
    %c0_2 = arith.constant 0 : index
    %1 = vector.load %arg2[%c0_1, %c0_2] : memref<128x512xbf16, #tpu.memory_space<vmem>>, vector<128x512xbf16>
    %cst = arith.constant dense<0.000000e+00> : vector<256x512xf32>
    %2 = tpu.matmul %0, %1, %cst {dimension_numbers = #tpu.dot_dimension_numbers<[1], [0], [0], [1], [0, 0, 1, 1], [], []>} : vector<256x128xbf16>, vector<128x512xbf16>, vector<256x512xf32> -> vector<256x512xf32>
    %c0_3 = arith.constant 0 : index
    %c0_4 = arith.constant 0 : index
    %3 = vector.load %arg3[%c0_3, %c0_4] : memref<1x512xf32, #tpu.memory_space<vmem>>, vector<1x512xf32>
    %4 = vector.broadcast %3 : vector<1x512xf32> to vector<256x512xf32>
    %5 = arith.addf %2, %4 : vector<256x512xf32>
    %cst_5 = arith.constant 5.000000e-01 : f32
    %6 = vector.broadcast %cst_5 : f32 to vector<256x512xf32>
    %7 = arith.mulf %6, %5 : vector<256x512xf32>
    %cst_6 = arith.constant 4.471500e-02 : f32
    %8 = vector.broadcast %cst_6 : f32 to vector<256x512xf32>
    %9 = arith.mulf %8, %5 : vector<256x512xf32>
    %10 = arith.mulf %9, %5 : vector<256x512xf32>
    %11 = arith.mulf %10, %5 : vector<256x512xf32>
    %12 = arith.addf %5, %11 : vector<256x512xf32>
    %cst_7 = arith.constant 0.797884583 : f32
    %13 = vector.broadcast %cst_7 : f32 to vector<256x512xf32>
    %14 = arith.mulf %13, %12 : vector<256x512xf32>
    %15 = math.tanh %14 : vector<256x512xf32>
    %cst_8 = arith.constant 1.000000e+00 : f32
    %16 = vector.broadcast %cst_8 : f32 to vector<256x512xf32>
    %17 = arith.addf %16, %15 : vector<256x512xf32>
    %18 = arith.mulf %7, %17 : vector<256x512xf32>
    %c0_9 = arith.constant 0 : index
    %c0_10 = arith.constant 0 : index
    %19 = vector.load %arg7[%c0_9, %c0_10] : memref<256x512xf32, #tpu.memory_space<vmem>>, vector<256x512xf32>
    tpu.vector_store %arg7[%c0_9, %c0_10], %18 {strides = array<i32>} : memref<256x512xf32, #tpu.memory_space<vmem>>, vector<256x512xf32>,
    %c0_11 = arith.constant 0 : index
    %c0_12 = arith.constant 0 : index
    %20 = vector.load %arg7[%c0_11, %c0_12] : memref<256x512xf32, #tpu.memory_space<vmem>>, vector<256x512xf32>
    %21 = arith.truncf %20 : vector<256x512xf32> to vector<256x512xbf16>
    %c0_13 = arith.constant 0 : index
    %c0_14 = arith.constant 0 : index
    %22 = vector.load %arg4[%c0_13, %c0_14] : memref<512x128xbf16, #tpu.memory_space<vmem>>, vector<512x128xbf16>
    %cst_15 = arith.constant dense<0.000000e+00> : vector<256x128xf32>
    %23 = tpu.matmul %21, %22, %cst_15 {dimension_numbers = #tpu.dot_dimension_numbers<[1], [0], [0], [1], [0, 0, 1, 1], [], []>} : vector<256x512xbf16>, vector<512x128xbf16>, vector<256x128xf32> -> vector<256x128xf32>
    %c0_16 = arith.constant 0 : index
    %c0_17 = arith.constant 0 : index
    %24 = vector.load %arg5[%c0_16, %c0_17] : memref<1x128xf32, #tpu.memory_space<vmem>>, vector<1x128xf32>
    %25 = vector.broadcast %24 : vector<1x128xf32> to vector<256x128xf32>
    %26 = arith.addf %23, %25 : vector<256x128xf32>
    %c0_18 = arith.constant 0 : index
    %c0_19 = arith.constant 0 : index
    %27 = vector.load %arg6[%c0_18, %c0_19] : memref<256x128xf32, #tpu.memory_space<vmem>>, vector<256x128xf32>
    tpu.vector_store %arg6[%c0_18, %c0_19], %26 {strides = array<i32>} : memref<256x128xf32, #tpu.memory_space<vmem>>, vector<256x128xf32>,
    return
  }
  func.func @transform_0(%arg0: i32) -> (i32, i32) {
    %c0_i32 = arith.constant 0 : i32
    %c0_i32_0 = arith.constant 0 : i32
    return %arg0, %c0_i32 : i32, i32
  }
  func.func @transform_1(%arg0: i32) -> (i32, i32) {
    %c0_i32 = arith.constant 0 : i32
    %c0_i32_0 = arith.constant 0 : i32
    %c0_i32_1 = arith.constant 0 : i32
    return %c0_i32, %c0_i32_0 : i32, i32
  }
  func.func @transform_2(%arg0: i32) -> (i32, i32) {
    %c0_i32 = arith.constant 0 : i32
    %c0_i32_0 = arith.constant 0 : i32
    %c0_i32_1 = arith.constant 0 : i32
    return %c0_i32, %c0_i32_0 : i32, i32
  }
  func.func @transform_3(%arg0: i32) -> (i32, i32) {
    %c0_i32 = arith.constant 0 : i32
    %c0_i32_0 = arith.constant 0 : i32
    %c0_i32_1 = arith.constant 0 : i32
    return %c0_i32, %c0_i32_0 : i32, i32
  }
  func.func @transform_4(%arg0: i32) -> (i32, i32) {
    %c0_i32 = arith.constant 0 : i32
    %c0_i32_0 = arith.constant 0 : i32
    %c0_i32_1 = arith.constant 0 : i32
    return %c0_i32, %c0_i32_0 : i32, i32
  }
  func.func @transform_5(%arg0: i32) -> (i32, i32) {
    %c0_i32 = arith.constant 0 : i32
    %c0_i32_0 = arith.constant 0 : i32
    return %arg0, %c0_i32 : i32, i32
  }
}

</mosaic_0001>

<bundles_post_ra>
// kernel: tpu_custom_call.1
= control target key start
LH: loop header
LB: loop body
LE: loop exit
PB: predicated region body
PF: predicated region fallthrough
CT: control target
= control target key end

     0   :  { %10 = vsyncpa [#allocation4], 0  ;;  %s6163_s0 = inlined_call_operand.hbm [shape: bf16[512,128], index: 0, kind: input, shape index: {}]   ;;  %s6164_s1 = inlined_call_operand.hbm [shape: bf16[128,512], index: 1, kind: input, shape index: {}]   ;;  %s6165_s2 = inlined_call_operand.hbm [shape: f32[1,512], index: 2, kind: input, shape index: {}]   ;;  %s6166_s3 = inlined_call_operand.hbm [shape: bf16[512,128], index: 3, kind: input, shape index: {}]   ;;  %s6167_s4 = inlined_call_operand.vmem [shape: f32[1,128], index: 4, kind: input, shape index: {}]   ;;  %s6168_s5 = inlined_call_operand.hbm [shape: f32[512,128], index: 5, kind: output, shape index: {}]  }
   0x1   :  { %12 = vsyncpa [#allocation4 + $0x1], 0 }
   0x2   :  { %13 = vsyncpa [#allocation7], 0 }
   0x3   :  { %14 = vsyncpa [#allocation10], 0 }
   0x4   :  { %15 = vsyncpa [#allocation5], 0 }
   0x5   :  { %17 = vsyncpa [#allocation5 + $0x1], 0  ;;  %s4206_s18 = smov 0   ;;  %s4208_s19 = smov 0  }
   0x6   :  { %s4210_s20 = smov 0   ;;  %s4212_s21 = smov 0  }
   0x7 LB: > { %s4227_s22 = sadd.s32 4294967295, %s4162_s21   ;;  %s3221_s23 = sadd.s32 4294967294, %s4162_s21   ;;  %s4162_s21 = sphi %s4212_s21, %s6639_s21   ;;  %s4158_s20 = sphi %s4210_s20, %s6638_s20   ;;  %s4154_s19 = sphi %s4208_s19, %s6637_s19   ;;  %s4150_s18 = sphi %s4206_s18, %s6636_s18  }
   0x8   : > { %p43_p0 = scmp.ne.s32.totalorder %s4154_s19, %s4150_s18  ;;  %p6169_p1 = scmp.eq.s32.totalorder %s4227_s22, 0 }
   0x9   : > { %p157_p3 = scmp.eq.s32.totalorder %s3221_s23, 1  ;;  %p3222_p5 = scmp.ge.s32.totalorder %s4162_s21, 1 }
   0xa   : > { %p4236_p4 = por %p6169_p1, %p43_p0  ;;  %p164_p7 = scmp.lt.s32.totalorder %s4162_s21, 3 }
   0xb   : > { %p4241_p6 = por %p157_p3, %p43_p0  ;;  %s4164_s27 = smov [#allocation6]  }
   0xc   : > { %s6302_s24 = scalar_select %p4236_p4, 1, 0 }
   0xd   : > { %s6303_s25 = scalar_select %p4241_p6, 1, 0 }
   0xe   : > { %p4246_p8 = pnand %p3222_p5, %p164_p7  ;;  %s176_s28 = sshll.u32 %s4164_s27, 4  ;;  %s177_s28 = int_to_ptr.vmem [resolvable:$true] %s176_s28 }
   0xf   : > { %s4165_s30 = smov [#allocation8]   ;;  %s4166_s7 = smov [#allocation9]  }
  0x10   : > { %s6304_s26 = scalar_select %p4246_p8, 1, 0 }
  0x11   : > { %p3564_p9 = pneg %p4246_p8  ;;  %s190_s6 = sshll.u32 %s4165_s30, 4  ;;  %s191_s6 = int_to_ptr.vmem [resolvable:$true] %s190_s6 }
  0x12   : > { %s200_s8 = sshll.u32 %s4166_s7, 4  ;;  %s3995_s9 = scalar_lea.vmem %s177_s28, 4096  ;;  %s201_s8 = int_to_ptr.vmem [resolvable:$true] %s200_s8 }
  0x13   : > { %p4255_p11 = pnand %p3564_p9, %p6169_p1  ;;  %p3996_p13 = scmp.ne.s32.totalorder %s177_s28, %s3995_s9 }
  0x14   : > { %p4003_p5 = scmp.lt.s32.totalorder %s177_s28, %s177_s28  ;;  %p4004_p7 = scmp.lt.s32.totalorder %s3995_s9, %s3995_s9 }
  0x15   : > { %p3986_p12 = pneg %p4255_p11 }
  0x16   : > { %p4005_p9 = por %p4004_p7, %p4003_p5 }
  0x17   : > { %p3998_p0 = pnand %p3996_p13, %p3986_p12 }
  0x19   : > { %p3999_p3 = pneg %p3998_p0 }
  0x1b   : > { %p4006_p10 = pnand %p4005_p9, %p3999_p3 }
  0x1d   : > { %4009 = shalt.err (!%p4006_p10)
}
  0x1e   : > { %s4167_s10 = smov 256   ;;  %s4168_s11 = smov 16  }
  0x1f   : > { %3567 = dma.hbm_to_vmem [thread:$0]  (!%p4255_p11), %s6164_s1, 4096, %s177_s28, [#allocation7], %s4167_s10, %s4167_s10, %s4168_s11  }
  0x20   : > { %s4021_s14 = scalar_lea.vmem %s191_s6, 64  ;;  %p4029_p2 = scmp.lt.s32.totalorder %s191_s6, %s191_s6 }
  0x21   : > { %p4022_p1 = scmp.ne.s32.totalorder %s191_s6, %s4021_s14  ;;  %p4030_p6 = scmp.lt.s32.totalorder %s4021_s14, %s4021_s14 }
  0x23   : > { %p4024_p13 = pnand %p4022_p1, %p3986_p12  ;;  %p4031_p5 = por %p4030_p6, %p4029_p2 }
  0x25   : > { %p4025_p0 = pneg %p4024_p13 }
  0x27   : > { %p4032_p3 = pnand %p4031_p5, %p4025_p0 }
  0x29   : > { %4035 = shalt.err (!%p4032_p3)
}
  0x2a   : > { %3570 = dma.hbm_to_vmem [thread:$0]  (!%p4255_p11), %s6165_s2, 64, %s191_s6, [#allocation7]  }
  0x2b   : > { %s4047_s17 = scalar_lea.vmem %s201_s8, 4096  ;;  %p4055_p9 = scmp.lt.s32.totalorder %s201_s8, %s201_s8 }
  0x2c   : > { %p4048_p10 = scmp.ne.s32.totalorder %s201_s8, %s4047_s17  ;;  %p4056_p13 = scmp.lt.s32.totalorder %s4047_s17, %s4047_s17 }
  0x2e   : > { %p4050_p7 = pnand %p4048_p10, %p3986_p12  ;;  %p4057_p4 = por %p4056_p13, %p4055_p9 }
  0x30   : > { %p4051_p1 = pneg %p4050_p7 }
  0x32   : > { %p4058_p2 = pnand %p4057_p4, %p4051_p1 }
  0x34   : > { %4061 = shalt.err (!%p4058_p2)
}
  0x35   : > { %s6171_s23 = smov 64   ;;  %s4170_s27 = smov 4  }
  0x36   : > { %3573 = dma.hbm_to_vmem [thread:$0]  (!%p4255_p11), %s6166_s3, 4096, %s201_s8, [#allocation10], %s6171_s23, %s6171_s23, %s4170_s27  }
  0x37   : > { %s4289_s6 = sadd.s32 1, %s4162_s21   ;;  %s30_s9 = sadd.s32 1, %s4158_s20 }
  0x38   : > { %s27_s7 = ssub.s32 %s4162_s21, %s4289_s6  ;;  %p37_p6 = scmp.ne.s32.totalorder %s4158_s20, %s4154_s19 }
  0x39   : > { %p28_p4 = scmp.eq.s32.totalorder %s27_s7, 0  ;;  %p38_p12 = scmp.eq.s32.totalorder %s4162_s21, 0 }
  0x3a   : > { %p3585_p0 = scmp.lt.s32.totalorder %s4162_s21, 2  ;;  %p6306_p3 = scmp.eq.s32.totalorder %s4227_s22, 1 }
  0x3b   : > { %s4299_s10 = scalar_select %p28_p4, %s4158_s20, %s30_s9  }
  0x3c   : > { %p39_p5 = por %p38_p12, %p37_p6  ;;  %p4303_p10 = por %p6306_p3, %p37_p6 }
  0x3d   : > { %s217_s11 = sand.u32 1, %s4158_s20   ;;  %s3322_s12 = sshll.u32 %s4162_s21, 11 }
  0x3e   : > { %s6307_s29 = scalar_select %p4303_p10, 1, 0 }
  0x3f   : > { %s3227_s8 = sshll.u32 %s217_s11, 7  ;;  %s4312_s15 = scalar_lea.hbm %s6163_s0, %s3322_s12 }
  0x40   : > { %s221_s16 = scalar_lea.vmem [#allocation3], %s3227_s8  ;;  %p4314_p11 = pnand %p3585_p0, %p39_p5 }
  0x41   : > { %s228_s17 = sshll.u32 %s221_s16, 4  ;;  %s4320_s30 = scalar_lea.sflag [#allocation4], %s217_s11  ;;  %s4318_s17 = int_to_ptr.vmem [resolvable:$true] %s228_s17 }
  0x42   : > { %s4062_s7 = scalar_lea.hbm %s4312_s15, 2048  ;;  %p4064_p1 = pneg %p4314_p11 }
  0x43   : > { %p4063_p7 = scmp.ne.s32.totalorder %s4312_s15, %s4062_s7  ;;  %s4067_s8 = scalar_lea.hbm %s6163_s0, 4096 }
  0x44   : > { %p4068_p2 = scmp.lt.s32.totalorder %s4312_s15, %s6163_s0  ;;  %p4069_p4 = scmp.lt.s32.totalorder %s4067_s8, %s4062_s7 }
  0x45   : > { %p4065_p9 = pnand %p4064_p1, %p4063_p7 }
  0x46   : > { %p4070_p6 = por %p4069_p4, %p4068_p2 }
  0x47   : > { %p4066_p13 = pneg %p4065_p9 }
  0x49   : > { %p4071_p12 = pnand %p4070_p6, %p4066_p13 }
  0x4b   : > { %4074 = shalt.err (!%p4071_p12)
}
  0x4c   : > { %s4075_s11 = scalar_lea.vmem %s4318_s17, 2048  ;;  %s4171_s16 = smov [#allocation3]  }
  0x4d   : > { %p4076_p0 = scmp.ne.s32.totalorder %s4318_s17, %s4075_s11  ;;  %s4080_s23 = sshll.u32 %s4171_s16, 4  ;;  %s4081_s23 = int_to_ptr.vmem [resolvable:$false] %s4080_s23 }
  0x4e   : > { %s4082_s9 = scalar_lea.vmem %s4081_s23, 4096  ;;  %p4083_p7 = scmp.lt.s32.totalorder %s4318_s17, %s4081_s23 }
  0x4f   : > { %p4078_p5 = pnand %p4076_p0, %p4064_p1  ;;  %p4084_p9 = scmp.lt.s32.totalorder %s4082_s9, %s4075_s11 }
  0x51   : > { %p4079_p3 = pneg %p4078_p5  ;;  %p4085_p10 = por %p4084_p9, %p4083_p7 }
  0x53   : > { %p4086_p8 = pnand %p4085_p10, %p4079_p3 }
  0x55   : > { %4089 = shalt.err (!%p4086_p8)
}
  0x56   : > { %s6309_s7 = smov 64   ;;  %p6310_p1 = scmp.ne.s32.totalorder %s6304_s26, 0 }
  0x57   : > { %3577 = dma.hbm_to_vmem [thread:$0]  (!%p4314_p11), %s4312_s15, 2048, %s4318_s17, %s4320_s30, %s6309_s7, %s6309_s7, %s4170_s27  }
  0x58   : > { %240 = sbr.rel (%p6310_p1) target bundleno = 897 (0x381), region = 40 }
  0x5d   : > { %s4347_s12 = sand.u32 1, %s4154_s19   ;;  %p6311_p8 = scmp.ne.s32.totalorder %s6302_s24, 0 }
  0x5e   : > { %s3231_s23 = sshll.u32 %s4347_s12, 7  ;;  %s243_s8 = scalar_lea.sflag [#allocation4], %s4347_s12 }
  0x5f   : > { %s4351_s13 = scalar_lea.vmem [#allocation3], %s3231_s23 }
  0x60   : > { %4133 = dma.done.wait (%p6311_p8), %s243_s8, 2048  }
  0x61   : > { %4135 = vsyncadd (%p6311_p8), %s243_s8, 4294965248  ;;  %p6312_p10 = scmp.eq.s32.totalorder %s4227_s22, 0 }
  0x63   : > { %4137 = dma.done.wait (%p6312_p10), [#allocation7], 4160   ;;  %p6313_p11 = pmov %p6312_p10 }
  0x64   : > { %p6314_p13 = pmov %p6312_p10 }
  0x65   : > { %4139 = vsyncadd (%p6313_p11), [#allocation7], 4294963136 }
  0x66   : > { %4141 = dma.done.wait (%p6314_p13), [#allocation10], 4096   ;;  %p6315_p2 = pmov %p6312_p10 }
  0x67   : > { %v4172_v0 = vmov 0   ;;  %v3632_v1 = vld [vmem:[#allocation6 + $0xe4] ss:$16 sps:$4 sm:$0xff]   ;;  %v3634_v2 = vld [vmem:[#allocation6 + $0xec] ss:$16 sps:$4 sm:$0xff]   ;;  %s3235_s27 = sshll.u32 %s4347_s12, 8 }
  0x68   : > { %4143 = vsyncadd (%p6315_p2), [#allocation10], 4294963200  ;;  %662 = vmatprep.mubr.bf16.mxu0 %v4172_v0  ;;  %855 = vmatprep.mubr.bf16.mxu1 %v4172_v0  ;;  %v3636_v3 = vld [vmem:[#allocation6 + $0xe0] ss:$16 sps:$4 sm:$0xff]   ;;  %v3637_v4 = vld [vmem:[#allocation6 + $0xe8] ss:$16 sps:$4 sm:$0xff]  }
  0x69   : > { %630 = vmatprep.subr.bf16.mxu0 %v3632_v1  ;;  %823 = vmatprep.subr.bf16.mxu1 %v3634_v2  ;;  %v3638_v5 = vld [vmem:[#allocation6 + $0xc4] ss:$16 sps:$4 sm:$0xff]   ;;  %v3640_v6 = vld [vmem:[#allocation6 + $0xcc] ss:$16 sps:$4 sm:$0xff]   ;;  %v3642_v7 = vld [vmem:[#allocation6 + $0xc0] ss:$16 sps:$4 sm:$0xff]  }
  0x6a   : > { %631 = vmatpush1.bf16.msra.mxu0 %v3636_v3  ;;  %824 = vmatpush1.bf16.msra.mxu1 %v3637_v4  ;;  %v3643_v8 = vld [vmem:[#allocation6 + $0xc8] ss:$16 sps:$4 sm:$0xff]   ;;  %v3644_v9 = vld [vmem:[#allocation6 + $0xa4] ss:$16 sps:$4 sm:$0xff]   ;;  %v3646_v10 = vld [vmem:[#allocation6 + $0xac] ss:$16 sps:$4 sm:$0xff]  }
  0x6b   : > { %632 = vmatprep.subr.bf16.mxu0 %v3638_v5  ;;  %825 = vmatprep.subr.bf16.mxu1 %v3640_v6  ;;  %v3648_v11 = vld [vmem:[#allocation6 + $0xa0] ss:$16 sps:$4 sm:$0xff]   ;;  %v3649_v12 = vld [vmem:[#allocation6 + $0xa8] ss:$16 sps:$4 sm:$0xff]   ;;  %v3650_v13 = vld [vmem:[#allocation6 + $0x84] ss:$16 sps:$4 sm:$0xff]  }
  0x6c   : > { %v3652_v14 = vld [vmem:[#allocation6 + $0x8c] ss:$16 sps:$4 sm:$0xff]   ;;  %v3654_v15 = vld [vmem:[#allocation6 + $0x80] ss:$16 sps:$4 sm:$0xff]   ;;  %v3655_v16 = vld [vmem:[#allocation6 + $0x88] ss:$16 sps:$4 sm:$0xff]  }
  0x6d   : > { %v3656_v17 = vld [vmem:[#allocation6 + $0x64] ss:$16 sps:$4 sm:$0xff]   ;;  %v3658_v18 = vld [vmem:[#allocation6 + $0x6c] ss:$16 sps:$4 sm:$0xff]   ;;  %v3660_v19 = vld [vmem:[#allocation6 + $0x60] ss:$16 sps:$4 sm:$0xff]  }
  0x6e   : > { %633 = vmatpush1.bf16.msra.mxu0 %v3642_v7  ;;  %826 = vmatpush1.bf16.msra.mxu1 %v3643_v8  ;;  %v3661_v20 = vld [vmem:[#allocation6 + $0x68] ss:$16 sps:$4 sm:$0xff]   ;;  %v3662_v21 = vld [vmem:[#allocation6 + $0x44] ss:$16 sps:$4 sm:$0xff]   ;;  %v3664_v22 = vld [vmem:[#allocation6 + $0x4c] ss:$16 sps:$4 sm:$0xff]  }
  0x6f   : > { %634 = vmatprep.subr.bf16.mxu0 %v3644_v9  ;;  %827 = vmatprep.subr.bf16.mxu1 %v3646_v10  ;;  %v3666_v23 = vld [vmem:[#allocation6 + $0x40] ss:$16 sps:$4 sm:$0xff]   ;;  %v3667_v24 = vld [vmem:[#allocation6 + $0x48] ss:$16 sps:$4 sm:$0xff]   ;;  %v3668_v25 = vld [vmem:[#allocation6 + $0x24] ss:$16 sps:$4 sm:$0xff]  }
  0x70   : > { %v3670_v26 = vld [vmem:[#allocation6 + $0x2c] ss:$16 sps:$4 sm:$0xff]   ;;  %v3672_v27 = vld [vmem:[#allocation6 + $0x20] ss:$16 sps:$4 sm:$0xff]   ;;  %v3673_v28 = vld [vmem:[#allocation6 + $0x28] ss:$16 sps:$4 sm:$0xff]  }
  0x71   : > { %v3674_v29 = vld [vmem:[#allocation6 + $0x4] ss:$16 sps:$4 sm:$0xff]   ;;  %v3676_v30 = vld [vmem:[#allocation6 + $0xc] ss:$16 sps:$4 sm:$0xff]   ;;  %v3678_v31 = vld [vmem:[#allocation6] ss:$16 sps:$4 sm:$0xff]  }
  0x72   : > { %635 = vmatpush1.bf16.msra.mxu0 %v3648_v11  ;;  %828 = vmatpush1.bf16.msra.mxu1 %v3649_v12  ;;  %v3679_v32 = vld [vmem:[#allocation6 + $0x8] ss:$16 sps:$4 sm:$0xff]   ;;  %v3680_v33 = vld [vmem:[%s4351_s13] sm:$0xff]   ;;  %v3682_v42 = vld [vmem:[%s4351_s13 + $0x10] sm:$0xff]   ;;  %s6025_s15 = scalar_lea.vmem [#allocation11], %s3235_s27  ;;  %s3323_s17 = sshll.u32 %s4227_s22, 12 }
  0x73   : > { %636 = vmatprep.subr.bf16.mxu0 %v3650_v13  ;;  %829 = vmatprep.subr.bf16.mxu1 %v3652_v14  ;;  %v3693_v34 = vld [vmem:[#allocation9 + $0x78] sm:$0xff]   ;;  %v3681_v35 = vld [vmem:[%s4351_s13 + $0x8] sm:$0xff]   ;;  %v3699_v39 = vld [vmem:[#allocation9 + $0x70] sm:$0xff]   ;;  %s3119_s28 = sshll.u32 %s6025_s15, 4  ;;  %s6117_s11 = scalar_lea.hbm %s6168_s5, %s3323_s17  ;;  %s6119_s28 = int_to_ptr.vmem [resolvable:$true] %s3119_s28 }
  0x74   : > { %v3695_v36 = vld [vmem:[#allocation9 + $0x38] sm:$0xff]   ;;  %v3701_v40 = vld [vmem:[#allocation9 + $0x30] sm:$0xff]   ;;  %v3704_v44 = vld [vmem:[#allocation9 + $0x68] sm:$0xff]   ;;  %s3106_s16 = scalar_lea.sflag [#allocation5], %s4347_s12  ;;  %s4090_s22 = scalar_lea.vmem %s6119_s28, 4096 }
  0x75   : > { %v3696_v37 = vld [vmem:[#allocation9 + $0xf8] sm:$0xff]   ;;  %v3702_v41 = vld [vmem:[#allocation9 + $0xf0] sm:$0xff]   ;;  %v3705_v45 = vld [vmem:[#allocation9 + $0x28] sm:$0xff]   ;;  %p4091_p4 = scmp.ne.s32.totalorder %s6119_s28, %s4090_s22  ;;  %p6633_p6 = scmp.ne.s32.totalorder %s6307_s29, 0 }
  0x76   : > { %637 = vmatpush1.bf16.msra.mxu0 %v3654_v15  ;;  %830 = vmatpush1.bf16.msra.mxu1 %v3655_v16  ;;  %v3697_v38 = vld [vmem:[#allocation9 + $0xb8] sm:$0xff]   ;;  %v3703_v43 = vld [vmem:[#allocation9 + $0xb0] sm:$0xff]   ;;  %v3706_v46 = vld [vmem:[#allocation9 + $0xe8] sm:$0xff]   ;;  %s4173_s9 = smov [#allocation11]  }
  0x77   : > { %638 = vmatprep.subr.bf16.mxu0 %v3656_v17  ;;  %831 = vmatprep.subr.bf16.mxu1 %v3658_v18  ;;  %v3707_v47 = vld [vmem:[#allocation9 + $0xa8] sm:$0xff]   ;;  %v3708_v48 = vld [vmem:[#allocation9 + $0x60] sm:$0xff]   ;;  %v3683_v51 = vld [vmem:[%s4351_s13 + $0x18] sm:$0xff]   ;;  %v354_v18 = vlaneseq  ;;  %p4092_p12 = pnand %p4091_p4, %p6633_p6  ;;  %s4094_s7 = sshll.u32 %s4173_s9, 4  ;;  %s4095_s7 = int_to_ptr.vmem [resolvable:$false] %s4094_s7 }
  0x78   : > { %v3709_v49 = vld [vmem:[#allocation9 + $0x20] sm:$0xff]   ;;  %v3712_v53 = vld [vmem:[#allocation9 + $0x58] sm:$0xff]   ;;  %v3716_v57 = vld [vmem:[#allocation9 + $0x50] sm:$0xff]   ;;  %s4096_s23 = scalar_lea.vmem %s4095_s7, 8192  ;;  %p4097_p5 = scmp.lt.s32.totalorder %s6119_s28, %s4095_s7 }
  0x79   : > { %v3710_v50 = vld [vmem:[#allocation9 + $0xe0] sm:$0xff]   ;;  %v3713_v54 = vld [vmem:[#allocation9 + $0x18] sm:$0xff]   ;;  %v3717_v58 = vld [vmem:[#allocation9 + $0x10] sm:$0xff]   ;;  %p4093_p0 = pneg %p4092_p12  ;;  %p4098_p3 = scmp.lt.s32.totalorder %s4096_s23, %s4090_s22 }
  0x7a   : > { %639 = vmatpush1.bf16.msra.mxu0 %v3660_v19  ;;  %832 = vmatpush1.bf16.msra.mxu1 %v3661_v20  ;;  %v3711_v52 = vld [vmem:[#allocation9 + $0xa0] sm:$0xff]   ;;  %v3714_v55 = vld [vmem:[#allocation9 + $0xd8] sm:$0xff]   ;;  %v3718_v59 = vld [vmem:[#allocation9 + $0xd0] sm:$0xff]   ;;  %v355_v19 = vshrl.u32 %v354_v18, 7 }
  0x7b   : > { %640 = vmatprep.subr.bf16.mxu0 %v3662_v21  ;;  %833 = vmatprep.subr.bf16.mxu1 %v3664_v22  ;;  %v3715_v56 = vld [vmem:[#allocation9 + $0x98] sm:$0xff]   ;;  %v3719_v61 = vld [vmem:[#allocation9 + $0x90] sm:$0xff]   ;;  %v3685_v62 = vld [vmem:[%s4351_s13 + $0x28] sm:$0xff]   ;;  %p4099_p7 = por %p4098_p3, %p4097_p5 }
  0x7c   : > { %v3684_v60 = vld [vmem:[%s4351_s13 + $0x20] sm:$0xff]   ;;  %v3686_v63 = vld [vmem:[%s4351_s13 + $0x30] sm:$0xff]   ;;  %v3687_v1 = vld [vmem:[%s4351_s13 + $0x38] sm:$0xff]   ;;  %v356_v20 = vsub.s32 0, %v355_v19  ;;  %v364_v21 = vsub.s32 2, %v355_v19 }
  0x7d   : > { %v3688_v2 = vld [vmem:[%s4351_s13 + $0x40] sm:$0xff]   ;;  %v3689_v3 = vld [vmem:[%s4351_s13 + $0x48] sm:$0xff]   ;;  %v3690_v4 = vld [vmem:[%s4351_s13 + $0x50] sm:$0xff]   ;;  %p4100_p9 = pnand %p4099_p7, %p4093_p0 }
  0x7e   : > { %641 = vmatpush1.bf16.msra.mxu0 %v3666_v23  ;;  %834 = vmatpush1.bf16.msra.mxu1 %v3667_v24  ;;  %v3720_v5 = vld [vmem:[#allocation9 + $0x48] sm:$0xff]   ;;  %v3691_v8 = vld [vmem:[%s4351_s13 + $0x58] sm:$0xff]   ;;  %v3692_v10 = vld [vmem:[%s4351_s13 + $0x60] sm:$0xff]   ;;  %v360_v23 = vsub.s32 1, %v355_v19  ;;  %v368_v24 = vsub.s32 3, %v355_v19 }
  0x7f   : > { %642 = vmatprep.subr.bf16.mxu0 %v3668_v25  ;;  %835 = vmatprep.subr.bf16.mxu1 %v3670_v26  ;;  %v3721_v6 = vld [vmem:[#allocation9 + $0x8] sm:$0xff]   ;;  %v3724_v11 = vld [vmem:[#allocation9 + $0x40] sm:$0xff]   ;;  %v3700_v17 = vld [vmem:[%s4351_s13 + $0x78] sm:$0xff]  }
  0x80   : > { %v3722_v7 = vld [vmem:[#allocation9 + $0xc8] sm:$0xff]   ;;  %v3725_v12 = vld [vmem:[#allocation9] sm:$0xff]   ;;  %v352_v22 = vld [vmem:[#allocation8] sm:$0xf] }
  0x81   : > { %v3723_v9 = vld [vmem:[#allocation9 + $0x88] sm:$0xff]   ;;  %v3726_v13 = vld [vmem:[#allocation9 + $0xc0] sm:$0xff]   ;;  %v4413_v25 = vrot.slane %v352_v22, %v356_v20  ;;  %v4415_v26 = vrot.slane %v352_v22, %v364_v21 }
  0x82   : > { %643 = vmatpush1.bf16.msra.mxu0 %v3672_v27  ;;  %836 = vmatpush1.bf16.msra.mxu1 %v3673_v28  ;;  %v3694_v14 = vld [vmem:[%s4351_s13 + $0x68] sm:$0xff]   ;;  %v3698_v16 = vld [vmem:[%s4351_s13 + $0x70] sm:$0xff]  }
  0x83   : > { %644 = vmatprep.subr.bf16.mxu0 %v3674_v29  ;;  %837 = vmatprep.subr.bf16.mxu1 %v3676_v30  ;;  %v3727_v15 = vld [vmem:[#allocation9 + $0x80] sm:$0xff]   ;;  %v4417_v29 = vrot.slane %v352_v22, %v360_v23  ;;  %v4419_v30 = vrot.slane %v352_v22, %v368_v24 }
  0x86   : > { %645 = vmatpush1.bf16.msra.mxu0 %v3678_v31  ;;  %838 = vmatpush1.bf16.msra.mxu1 %v3679_v32 }
  0x87   : > { %3324 = vmatprep.subr.bf16.mxu0 %v3693_v34  ;;  %3436 = vmatprep.subr.bf16.mxu1 %v3696_v37 }
  0x89   : > { %663 = vmatmul.mubr.bf16.vlgmr.msra.gmra.mxu0 %v3680_v33  ;;  %856 = vmatmul.mubr.bf16.vlgmr.msra.gmra.mxu1 %v3680_v33 }
  0x8a   : > { %672 = vmatprep.mubr.bf16.mxu0 %v4172_v0  ;;  %865 = vmatprep.mubr.bf16.mxu1 %v4172_v0 }
  0x8b   : > { %3325 = vmatpush3.bf16.msra.mxu0 %v3695_v36  ;;  %3437 = vmatpush3.bf16.msra.mxu1 %v3697_v38 }
  0x8c   : > { %3326 = vmatprep.subr.bf16.mxu0 %v3699_v39  ;;  %3438 = vmatprep.subr.bf16.mxu1 %v3702_v41 }
  0x8f   : > { %3327 = vmatpush3.bf16.msra.mxu0 %v3701_v40  ;;  %3439 = vmatpush3.bf16.msra.mxu1 %v3703_v43 }
  0x90   : > { %3328 = vmatprep.subr.bf16.mxu0 %v3704_v44  ;;  %3440 = vmatprep.subr.bf16.mxu1 %v3706_v46 }
  0x91   : > { %673 = vmatmul.mubr.bf16.gmra.mxu0 %v3681_v35  ;;  %866 = vmatmul.mubr.bf16.gmra.mxu1 %v3681_v35 }
  0x92   : > { %682 = vmatprep.mubr.bf16.mxu0 %v4172_v0  ;;  %875 = vmatprep.mubr.bf16.mxu1 %v4172_v0 }
  0x93   : > { %3329 = vmatpush3.bf16.msra.mxu0 %v3705_v45  ;;  %3441 = vmatpush3.bf16.msra.mxu1 %v3707_v47 }
  0x94   : > { %3330 = vmatprep.subr.bf16.mxu0 %v3708_v48  ;;  %3442 = vmatprep.subr.bf16.mxu1 %v3710_v50 }
  0x97   : > { %3331 = vmatpush3.bf16.msra.mxu0 %v3709_v49  ;;  %3443 = vmatpush3.bf16.msra.mxu1 %v3711_v52 }
  0x98   : > { %3332 = vmatprep.subr.bf16.mxu0 %v3712_v53  ;;  %3444 = vmatprep.subr.bf16.mxu1 %v3714_v55 }
  0x99   : > { %683 = vmatmul.mubr.bf16.gmra.mxu0 %v3682_v42  ;;  %876 = vmatmul.mubr.bf16.gmra.mxu1 %v3682_v42 }
  0x9a   : > { %692 = vmatprep.mubr.bf16.mxu0 %v4172_v0  ;;  %885 = vmatprep.mubr.bf16.mxu1 %v4172_v0 }
  0x9b   : > { %3333 = vmatpush3.bf16.msra.mxu0 %v3713_v54  ;;  %3445 = vmatpush3.bf16.msra.mxu1 %v3715_v56 }
  0x9c   : > { %3334 = vmatprep.subr.bf16.mxu0 %v3716_v57  ;;  %3446 = vmatprep.subr.bf16.mxu1 %v3718_v59 }
  0x9f   : > { %3335 = vmatpush3.bf16.msra.mxu0 %v3717_v58  ;;  %3447 = vmatpush3.bf16.msra.mxu1 %v3719_v61 }
  0xa0   : > { %3336 = vmatprep.subr.bf16.mxu0 %v3720_v5  ;;  %3448 = vmatprep.subr.bf16.mxu1 %v3722_v7 }
  0xa1   : > { %693 = vmatmul.mubr.bf16.gmra.mxu0 %v3683_v51  ;;  %886 = vmatmul.mubr.bf16.gmra.mxu1 %v3683_v51 }
  0xa2   : > { %702 = vmatprep.mubr.bf16.mxu0 %v4172_v0  ;;  %895 = vmatprep.mubr.bf16.mxu1 %v4172_v0 }
  0xa3   : > { %3337 = vmatpush3.bf16.msra.mxu0 %v3721_v6  ;;  %3449 = vmatpush3.bf16.msra.mxu1 %v3723_v9 }
  0xa4   : > { %3338 = vmatprep.subr.bf16.mxu0 %v3724_v11  ;;  %3450 = vmatprep.subr.bf16.mxu1 %v3726_v13 }
  0xa7   : > { %3339 = vmatpush3.bf16.msra.mxu0 %v3725_v12  ;;  %3451 = vmatpush3.bf16.msra.mxu1 %v3727_v15 }
  0xa9   : > { %703 = vmatmul.mubr.bf16.gmra.mxu0 %v3684_v60  ;;  %896 = vmatmul.mubr.bf16.gmra.mxu1 %v3684_v60 }
  0xaa   : > { %712 = vmatprep.mubr.bf16.mxu0 %v4172_v0  ;;  %905 = vmatprep.mubr.bf16.mxu1 %v4172_v0 }
  0xb1   : > { %713 = vmatmul.mubr.bf16.gmra.mxu0 %v3685_v62  ;;  %906 = vmatmul.mubr.bf16.gmra.mxu1 %v3685_v62 }
  0xb2   : > { %722 = vmatprep.mubr.bf16.mxu0 %v4172_v0  ;;  %915 = vmatprep.mubr.bf16.mxu1 %v4172_v0 }
  0xb9   : > { %723 = vmatmul.mubr.bf16.gmra.mxu0 %v3686_v63  ;;  %916 = vmatmul.mubr.bf16.gmra.mxu1 %v3686_v63 }
  0xba   : > { %732 = vmatprep.mubr.bf16.mxu0 %v4172_v0  ;;  %925 = vmatprep.mubr.bf16.mxu1 %v4172_v0 }
  0xc1   : > { %733 = vmatmul.mubr.bf16.gmra.mxu0 %v3687_v1  ;;  %926 = vmatmul.mubr.bf16.gmra.mxu1 %v3687_v1 }
  0xc2   : > { %742 = vmatprep.mubr.bf16.mxu0 %v4172_v0  ;;  %935 = vmatprep.mubr.bf16.mxu1 %v4172_v0 }
  0xc9   : > { %743 = vmatmul.mubr.bf16.gmra.mxu0 %v3688_v2  ;;  %936 = vmatmul.mubr.bf16.gmra.mxu1 %v3688_v2 }
  0xca   : > { %752 = vmatprep.mubr.bf16.mxu0 %v4172_v0  ;;  %945 = vmatprep.mubr.bf16.mxu1 %v4172_v0 }
  0xd1   : > { %753 = vmatmul.mubr.bf16.gmra.mxu0 %v3689_v3  ;;  %946 = vmatmul.mubr.bf16.gmra.mxu1 %v3689_v3 }
  0xd2   : > { %762 = vmatprep.mubr.bf16.mxu0 %v4172_v0  ;;  %955 = vmatprep.mubr.bf16.mxu1 %v4172_v0 }
  0xd9   : > { %763 = vmatmul.mubr.bf16.gmra.mxu0 %v3690_v4  ;;  %956 = vmatmul.mubr.bf16.gmra.mxu1 %v3690_v4 }
  0xda   : > { %772 = vmatprep.mubr.bf16.mxu0 %v4172_v0  ;;  %965 = vmatprep.mubr.bf16.mxu1 %v4172_v0 }
  0xe1   : > { %773 = vmatmul.mubr.bf16.gmra.mxu0 %v3691_v8  ;;  %966 = vmatmul.mubr.bf16.gmra.mxu1 %v3691_v8 }
  0xe2   : > { %782 = vmatprep.mubr.bf16.mxu0 %v4172_v0  ;;  %975 = vmatprep.mubr.bf16.mxu1 %v4172_v0 }
  0xe9   : > { %783 = vmatmul.mubr.bf16.gmra.mxu0 %v3692_v10  ;;  %976 = vmatmul.mubr.bf16.gmra.mxu1 %v3692_v10 }
  0xea   : > { %792 = vmatprep.mubr.bf16.mxu0 %v4172_v0  ;;  %985 = vmatprep.mubr.bf16.mxu1 %v4172_v0 }
  0xf1   : > { %793 = vmatmul.mubr.bf16.gmra.mxu0 %v3694_v14  ;;  %986 = vmatmul.mubr.bf16.gmra.mxu1 %v3694_v14 }
  0xf2   : > { %802 = vmatprep.mubr.bf16.mxu0 %v4172_v0  ;;  %995 = vmatprep.mubr.bf16.mxu1 %v4172_v0 }
  0xf9   : > { %803 = vmatmul.mubr.bf16.gmra.mxu0 %v3698_v16  ;;  %996 = vmatmul.mubr.bf16.gmra.mxu1 %v3698_v16 }
  0xfa   : > { %812 = vmatprep.mubr.bf16.mxu0 %v4172_v0  ;;  %1005 = vmatprep.mubr.bf16.mxu1 %v4172_v0 }
 0x101   : > { %813 = vmatmul.mubr.bf16.gmra.mxu0 %v3700_v17  ;;  %1006 = vmatmul.mubr.bf16.gmra.mxu1 %v3700_v17 }
 0x149   : > { %v664_v27 = vpop.f32.mrf.mxu0  ;;  %v857_v28 = vpop.f32.mrf.mxu1 }
 0x14a   : > { %v665_v0 = vadd.f32 %v664_v27, %v4413_v25  ;;  %v858_v31 = vadd.f32 %v857_v28, %v4415_v26 }
 0x14b   : > { %v666_v32 = vpop.f32.mrf.mxu0  ;;  %v859_v33 = vpop.f32.mrf.mxu1 }
 0x14c   : > { %v1144_v34 = vmul.f32 0.044715, %v665_v0  ;;  %v1146_v35 = vmul.f32 0.044715, %v858_v31  ;;  %v4424_v36 = vadd.f32 %v666_v32, %v4417_v29  ;;  %v4427_v37 = vadd.f32 %v859_v33, %v4419_v30 }
 0x14d   : > { %v668_v38 = vpop.f32.mrf.mxu0  ;;  %v861_v39 = vpop.f32.mrf.mxu1  ;;  %v4436_v62 = vmul.f32 0.5, %v665_v0  ;;  %v4438_v63 = vmul.f32 0.5, %v858_v31 }
 0x14e   : > { %v1272_v40 = vmul.f32 %v1144_v34, %v665_v0  ;;  %v1274_v41 = vmul.f32 %v1146_v35, %v858_v31  ;;  %v669_v42 = vadd.f32 %v668_v38, %v4413_v25  ;;  %v862_v43 = vadd.f32 %v861_v39, %v4415_v26 }
 0x14f   : > { %v670_v44 = vpop.f32.mrf.mxu0  ;;  %v863_v45 = vpop.f32.mrf.mxu1  ;;  %v1145_v49 = vmul.f32 0.044715, %v4424_v36  ;;  %v1147_v54 = vmul.f32 0.044715, %v4427_v37  ;;  %v4446_v8 = vmul.f32 0.5, %v4424_v36  ;;  %v4453_v14 = vmul.f32 0.5, %v4427_v37 }
 0x150   : > { %v1400_v46 = vmul.f32 %v1272_v40, %v665_v0  ;;  %v1402_v47 = vmul.f32 %v1274_v41, %v858_v31  ;;  %v1148_v48 = vmul.f32 0.044715, %v669_v42  ;;  %v1150_v50 = vmul.f32 0.044715, %v862_v43 }
 0x151   : > { %v674_v51 = vpop.f32.mrf.mxu0  ;;  %v867_v52 = vpop.f32.mrf.mxu1  ;;  %v4434_v57 = vadd.f32 %v670_v44, %v4417_v29  ;;  %v1273_v1 = vmul.f32 %v1145_v49, %v4424_v36  ;;  %v4442_v2 = vadd.f32 %v863_v45, %v4419_v30  ;;  %v1275_v6 = vmul.f32 %v1147_v54, %v4427_v37  ;;  %6316 = vst [vmem:[#allocation16_spill] sm:$0xff] %v4446_v8 }
 0x152   : > { %v1528_v53 = vadd.f32 %v1400_v46, %v665_v0  ;;  %v1276_v55 = vmul.f32 %v1148_v48, %v669_v42  ;;  %v1278_v56 = vmul.f32 %v1150_v50, %v862_v43  ;;  %v1530_v60 = vadd.f32 %v1402_v47, %v858_v31  ;;  %6318 = vst [vmem:[#allocation18_spill] sm:$0xff] %v4453_v14 }
 0x153   : > { %v676_v58 = vpop.f32.mrf.mxu0  ;;  %v869_v59 = vpop.f32.mrf.mxu1  ;;  %v1149_v10 = vmul.f32 0.044715, %v4434_v57  ;;  %v4450_v11 = vadd.f32 %v674_v51, %v4413_v25  ;;  %v4455_v16 = vmul.f32 0.5, %v669_v42  ;;  %v4458_v17 = vadd.f32 %v867_v52, %v4415_v26 }
 0x154   : > { %v1404_v61 = vmul.f32 %v1276_v55, %v669_v42  ;;  %v1656_v5 = vmul.f32 0.7978846, %v1528_v53  ;;  %v1406_v7 = vmul.f32 %v1278_v56, %v862_v43  ;;  %v1658_v15 = vmul.f32 0.7978846, %v1530_v60 }
 0x155   : > { %v678_v3 = vpop.f32.mrf.mxu0  ;;  %v871_v4 = vpop.f32.mrf.mxu1  ;;  %6317 = vst [vmem:[#allocation17_spill] sm:$0xff] %v4450_v11  ;;  %6319 = vst [vmem:[#allocation19_spill] sm:$0xff] %v4458_v17  ;;  %v4461_v18 = vadd.f32 %v676_v58, %v4417_v29  ;;  %v4464_v19 = vmul.f32 %v1273_v1, %v4424_v36  ;;  %v4466_v20 = vmul.f32 0.5, %v862_v43  ;;  %v1151_v21 = vmul.f32 0.044715, %v4442_v2 }
 0x156   : > { %v1532_v9 = vadd.f32 %v1404_v61, %v669_v42  ;;  %v4470_v22 = vadd.f32 %v869_v59, %v4419_v30  ;;  %3728 = vtanh.f32 %v1656_v5  ;;  %v4473_v27 = vmul.f32 %v1275_v6, %v4427_v37 }
 0x157   : > { %v680_v12 = vpop.f32.mrf.mxu0  ;;  %v873_v13 = vpop.f32.mrf.mxu1  ;;  %v1534_v28 = vadd.f32 %v1406_v7, %v862_v43  ;;  %v4476_v0 = vadd.f32 %v678_v3, %v4413_v25  ;;  %v1277_v32 = vmul.f32 %v1149_v10, %v4434_v57  ;;  %v1152_v33 = vmul.f32 0.044715, %v4450_v11 }
 0x158   : > { %6320 = vst [vmem:[#allocation20_spill] sm:$0xff] %v4470_v22  ;;  %v1660_v31 = vmul.f32 0.7978846, %v1532_v9  ;;  %v4481_v34 = vadd.f32 %v871_v4, %v4415_v26  ;;  %3730 = vtanh.f32 %v1658_v15  ;;  %v1154_v39 = vmul.f32 0.044715, %v4458_v17 }
 0x159   : > { %v684_v23 = vpop.f32.mrf.mxu0  ;;  %v877_v24 = vpop.f32.mrf.mxu1  ;;  %6321 = vst [vmem:[#allocation21_spill] sm:$0xff] %v4476_v0  ;;  %v1153_v40 = vmul.f32 0.044715, %v4461_v18  ;;  %v4486_v41 = vadd.f32 %v680_v12, %v4417_v29  ;;  %v1279_v42 = vmul.f32 %v1151_v21, %v4442_v2  ;;  %v1155_v43 = vmul.f32 0.044715, %v4470_v22 }
 0x15a   : > { %6322 = vst [vmem:[#allocation22_spill] sm:$0xff] %v4481_v34  ;;  %v4491_v44 = vadd.f32 %v873_v13, %v4419_v30  ;;  %v4494_v45 = vadd.f32 %v684_v23, %v4413_v25  ;;  %v1662_v48 = vmul.f32 0.7978846, %v1534_v28  ;;  %v1156_v49 = vmul.f32 0.044715, %v4476_v0 }
 0x15b   : > { %v686_v35 = vpop.f32.mrf.mxu0  ;;  %v879_v38 = vpop.f32.mrf.mxu1  ;;  %6323 = vst [vmem:[#allocation23_spill] sm:$0xff] %v4486_v41  ;;  %v4498_v50 = vadd.f32 %v877_v24, %v4415_v26  ;;  %3732 = vtanh.f32 %v1660_v31  ;;  %v4504_v52 = vmul.f32 %v1277_v32, %v4434_v57  ;;  %v1280_v53 = vmul.f32 %v1152_v33, %v4450_v11 }
 0x15c   : > { %6324 = vst [vmem:[#allocation24_spill] sm:$0xff] %v4491_v44  ;;  %6325 = vst [vmem:[#allocation25_spill] sm:$0xff] %v4494_v45  ;;  %v4501_v51 = vadd.f32 %v686_v35, %v4417_v29  ;;  %v1158_v54 = vmul.f32 0.044715, %v4481_v34  ;;  %v1282_v58 = vmul.f32 %v1154_v39, %v4458_v17  ;;  %v1281_v59 = vmul.f32 %v1153_v40, %v4461_v18 }
 0x15d   : > { %v688_v46 = vpop.f32.mrf.mxu0  ;;  %v881_v47 = vpop.f32.mrf.mxu1  ;;  %6326 = vst [vmem:[#allocation26_spill] sm:$0xff] %v4498_v50  ;;  %v1157_v60 = vmul.f32 0.044715, %v4486_v41  ;;  %v1159_v61 = vmul.f32 0.044715, %v4491_v44  ;;  %v1283_v1 = vmul.f32 %v1155_v43, %v4470_v22  ;;  %3734 = vtanh.f32 %v1662_v48 }
 0x15e   : > { %6327 = vst [vmem:[#allocation27_spill] sm:$0xff] %v4501_v51  ;;  %v1160_v3 = vmul.f32 0.044715, %v4494_v45  ;;  %v1162_v4 = vmul.f32 0.044715, %v4498_v50  ;;  %v4517_v9 = vmul.f32 %v1279_v42, %v4442_v2  ;;  %v1284_v10 = vmul.f32 %v1156_v49, %v4476_v0 }
 0x15f   : > { %v690_v55 = vpop.f32.mrf.mxu0  ;;  %v883_v56 = vpop.f32.mrf.mxu1  ;;  %v1161_v5 = vmul.f32 0.044715, %v4501_v51  ;;  %v4521_v12 = vadd.f32 %v879_v38, %v4419_v30  ;;  %v4524_v13 = vmul.f32 %v1280_v53, %v4450_v11  ;;  %v1286_v15 = vmul.f32 %v1158_v54, %v4481_v34 }
 0x160   : > { %v4528_v21 = vadd.f32 %v688_v46, %v4413_v25  ;;  %v4531_v23 = vadd.f32 %v881_v47, %v4415_v26  ;;  %v4534_v31 = vmul.f32 %v1282_v58, %v4458_v17  ;;  %v4537_v32 = vmul.f32 %v1281_v59, %v4461_v18 }
 0x161   : > { %v694_v6 = vpop.f32.mrf.mxu0  ;;  %v887_v7 = vpop.f32.mrf.mxu1  ;;  %6328 = vst [vmem:[#allocation28_spill] sm:$0xff] %v4524_v13  ;;  %v1285_v33 = vmul.f32 %v1157_v60, %v4486_v41  ;;  %v1287_v35 = vmul.f32 %v1159_v61, %v4491_v44  ;;  %v4542_v38 = vmul.f32 %v1283_v1, %v4470_v22  ;;  %v1288_v39 = vmul.f32 %v1160_v3, %v4494_v45 }
 0x162   : > { %6329 = vst [vmem:[#allocation29_spill] sm:$0xff] %v4534_v31  ;;  %v1290_v40 = vmul.f32 %v1162_v4, %v4498_v50  ;;  %v1289_v42 = vmul.f32 %v1161_v5, %v4501_v51  ;;  %v4548_v47 = vmul.f32 %v1284_v10, %v4476_v0  ;;  %v1163_v48 = vmul.f32 0.044715, %v4521_v12 }
 0x163   : > { %v696_v24 = vpop.f32.mrf.mxu0  ;;  %v889_v28 = vpop.f32.mrf.mxu1  ;;  %6330 = vst [vmem:[#allocation30_spill] sm:$0xff] %v4542_v38  ;;  %v4552_v49 = vadd.f32 %v690_v55, %v4417_v29  ;;  %v4555_v53 = vadd.f32 %v883_v56, %v4419_v30  ;;  %v4560_v58 = vmul.f32 %v1286_v15, %v4481_v34  ;;  %v1164_v59 = vmul.f32 0.044715, %v4528_v21 }
 0x164   : > { %6331 = vst [vmem:[#allocation31_spill] sm:$0xff] %v4548_v47  ;;  %v4557_v54 = vpop.eup %3728  ;;  %v1166_v60 = vmul.f32 0.044715, %v4531_v23  ;;  %v4565_v61 = vadd.f32 %v694_v6, %v4413_v25  ;;  %v4568_v55 = vmul.f32 %v1285_v33, %v4486_v41  ;;  %v4571_v56 = vmul.f32 %v1287_v35, %v4491_v44 }
 0x165   : > { %v698_v43 = vpop.f32.mrf.mxu0  ;;  %v891_v46 = vpop.f32.mrf.mxu1  ;;  %6332 = vst [vmem:[#allocation32_spill] sm:$0xff] %v4560_v58  ;;  %v4574_v4 = vadd.f32 %v887_v7, %v4415_v26  ;;  %v4577_v5 = vadd.f32 %v696_v24, %v4417_v29  ;;  %v4582_v15 = vmul.f32 %v1288_v39, %v4494_v45  ;;  %v4585_v6 = vmul.f32 %v1290_v40, %v4498_v50 }
 0x166   : > { %6333 = vst [vmem:[#allocation33_spill] sm:$0xff] %v4568_v55  ;;  %6334 = vst [vmem:[#allocation34_spill] sm:$0xff] %v4571_v56  ;;  %v4579_v10 = vpop.eup %3730  ;;  %v4588_v33 = vmul.f32 %v1289_v42, %v4501_v51  ;;  %v4591_v35 = vadd.f32 %v889_v28, %v4419_v30  ;;  %v1291_v34 = vmul.f32 %v1163_v48, %v4521_v12  ;;  %v1165_v24 = vmul.f32 0.044715, %v4552_v49 }
 0x167   : > { %v700_v1 = vpop.f32.mrf.mxu0  ;;  %v893_v3 = vpop.f32.mrf.mxu1  ;;  %6335 = vst [vmem:[#allocation35_spill] sm:$0xff] %v4574_v4  ;;  %6336 = vst [vmem:[#allocation36_spill] sm:$0xff] %v4582_v15  ;;  %v1167_v31 = vmul.f32 0.044715, %v4555_v53  ;;  %v4597_v39 = vadd.f32 %v698_v43, %v4413_v25  ;;  %v1292_v40 = vmul.f32 %v1164_v59, %v4528_v21  ;;  %v1168_v42 = vmul.f32 0.044715, %v4565_v61 }
 0x168   : > { %6337 = vst [vmem:[#allocation37_spill] sm:$0xff] %v4585_v6  ;;  %6338 = vst [vmem:[#allocation38_spill] sm:$0xff] %v4588_v33  ;;  %v1294_v6 = vmul.f32 %v1166_v60, %v4531_v23  ;;  %v4603_v28 = vadd.f32 %v891_v46, %v4415_v26  ;;  %v4605_v45 = vpop.eup %3732  ;;  %v1170_v48 = vmul.f32 0.044715, %v4574_v4  ;;  %v1169_v33 = vmul.f32 0.044715, %v4577_v5 }
 0x169   : > { %v704_v58 = vpop.f32.mrf.mxu0  ;;  %v897_v7 = vpop.f32.mrf.mxu1  ;;  %v1171_v43 = vmul.f32 0.044715, %v4591_v35  ;;  %v4611_v51 = vadd.f32 %v700_v1, %v4417_v29  ;;  %v1172_v59 = vmul.f32 0.044715, %v4597_v39  ;;  %v4616_v46 = vadd.f32 %v893_v3, %v4419_v30 }
 0x16a   : > { %6339 = vst [vmem:[#allocation39_spill] sm:$0xff] %v4603_v28  ;;  %v1174_v60 = vmul.f32 0.044715, %v4603_v28  ;;  %v4619_v17 = vadd.f32 %v704_v58, %v4413_v25  ;;  %v1293_v47 = vmul.f32 %v1165_v24, %v4552_v49  ;;  %v1295_v0 = vmul.f32 %v1167_v31, %v4555_v53  ;;  %v4627_v14 = vpop.eup %3734 }
 0x16b   : > { %v706_v50 = vpop.f32.mrf.mxu0  ;;  %v899_v15 = vpop.f32.mrf.mxu1  ;;  %v1173_v13 = vmul.f32 0.044715, %v4611_v51  ;;  %v4625_v11 = vadd.f32 %v897_v7, %v4415_v26  ;;  %v1296_v8 = vmul.f32 %v1168_v42, %v4565_v61  ;;  %v1175_v3 = vmul.f32 0.044715, %v4616_v46 }
 0x16c   : > { %6340 = vst [vmem:[#allocation40_spill] sm:$0xff] %v4619_v17  ;;  %v1176_v56 = vmul.f32 0.044715, %v4619_v17  ;;  %v4633_v58 = vadd.f32 %v706_v50, %v4417_v29  ;;  %v4636_v31 = vmul.f32 %v1291_v34, %v4521_v12  ;;  %v1298_v44 = vmul.f32 %v1170_v48, %v4574_v4 }
 0x16d   : > { %6341 = vst [vmem:[#allocation41_spill] sm:$0xff] %v4625_v11  ;;  %v708_v1 = vpop.f32.mrf.mxu0  ;;  %v901_v24 = vpop.f32.mrf.mxu1  ;;  %v1297_v7 = vmul.f32 %v1169_v33, %v4577_v5  ;;  %v1299_v38 = vmul.f32 %v1171_v43, %v4591_v35  ;;  %v4642_v22 = vmul.f32 %v1292_v40, %v4528_v21  ;;  %v1300_v42 = vmul.f32 %v1172_v59, %v4597_v39 }
 0x16e   : > { %6342 = vst [vmem:[#allocation42_spill] sm:$0xff] %v4633_v58  ;;  %v1302_v55 = vmul.f32 %v1174_v60, %v4603_v28  ;;  %v1178_v50 = vmul.f32 0.044715, %v4625_v11  ;;  %v4648_v41 = vmul.f32 %v1294_v6, %v4531_v23  ;;  %v4651_v34 = vmul.f32 %v1293_v47, %v4552_v49 }
 0x16f   : > { %6343 = vst [vmem:[#allocation43_spill] sm:$0xff] %v4642_v22  ;;  %v4654_v48 = vmul.f32 %v1295_v0, %v4555_v53  ;;  %v1301_v33 = vmul.f32 %v1173_v13, %v4611_v51  ;;  %v710_v43 = vpop.f32.mrf.mxu0  ;;  %v4658_v40 = vmul.f32 %v1296_v8, %v4565_v61  ;;  %v1303_v59 = vmul.f32 %v1175_v3, %v4616_v46  ;;  %v903_v6 = vpop.f32.mrf.mxu1 }
 0x170   : > { %6344 = vst [vmem:[#allocation44_spill] sm:$0xff] %v4648_v41  ;;  %v1304_v60 = vmul.f32 %v1176_v56, %v4619_v17  ;;  %v1177_v22 = vmul.f32 0.044715, %v4633_v58  ;;  %v4664_v41 = vmul.f32 %v1298_v44, %v4574_v4  ;;  %v4667_v47 = vmul.f32 %v1297_v7, %v4577_v5 }
 0x171   : > { %v4670_v0 = vmul.f32 %v1299_v38, %v4591_v35  ;;  %v4673_v13 = vadd.f32 %v899_v15, %v4419_v30  ;;  %v4676_v8 = vmul.f32 %v1300_v42, %v4597_v39  ;;  %v4679_v56 = vmul.f32 %v1302_v55, %v4603_v28 }
 0x172   : > { %6345 = vst [vmem:[#allocation45_spill] sm:$0xff] %v4664_v41  ;;  %v1306_v3 = vmul.f32 %v1178_v50, %v4625_v11  ;;  %v4683_v44 = vadd.f32 %v708_v1, %v4413_v25  ;;  %v4686_v7 = vmul.f32 %v1301_v33, %v4611_v51  ;;  %v4689_v38 = vadd.f32 %v901_v24, %v4415_v26  ;;  %v714_v41 = vpop.f32.mrf.mxu0  ;;  %v907_v24 = vpop.f32.mrf.mxu1 }
 0x173   : > { %6346 = vst [vmem:[#allocation46_spill] sm:$0xff] %v4673_v13  ;;  %6347 = vst [vmem:[#allocation47_spill] sm:$0xff] %v4679_v56  ;;  %v1529_v15 = vadd.f32 %v4464_v19, %v4424_v36  ;;  %v1533_v42 = vadd.f32 %v4504_v52, %v4434_v57  ;;  %v4696_v55 = vmul.f32 %v1303_v59, %v4616_v46  ;;  %v1179_v56 = vmul.f32 0.044715, %v4673_v13 }
 0x174   : > { %6348 = vst [vmem:[#allocation48_spill] sm:$0xff] %v4683_v44  ;;  %6349 = vst [vmem:[#allocation49_spill] sm:$0xff] %v4689_v38  ;;  %v4699_v50 = vmul.f32 %v1304_v60, %v4619_v17  ;;  %v1305_v1 = vmul.f32 %v1177_v22, %v4633_v58  ;;  %v4703_v33 = vadd.f32 %v710_v43, %v4417_v29  ;;  %v1180_v59 = vmul.f32 0.044715, %v4683_v44 }
 0x175   : > { %v4707_v36 = vadd.f32 %v903_v6, %v4419_v30  ;;  %v1657_v19 = vmul.f32 0.7978846, %v1529_v15  ;;  %v1661_v52 = vmul.f32 0.7978846, %v1533_v42  ;;  %v4710_v28 = vmul.f32 %v1306_v3, %v4625_v11  ;;  %v716_v15 = vpop.f32.mrf.mxu0  ;;  %v909_v11 = vpop.f32.mrf.mxu1 }
 0x176   : > { %6350 = vst [vmem:[#allocation50_spill] sm:$0xff] %v4699_v50  ;;  %v1531_v60 = vadd.f32 %v4473_v27, %v4427_v37  ;;  %v1535_v22 = vadd.f32 %v4517_v9, %v4442_v2  ;;  %v1182_v43 = vmul.f32 0.044715, %v4689_v38  ;;  %v4719_v50 = vadd.f32 %v714_v41, %v4413_v25 }
 0x177   : > { %6351 = vst [vmem:[#allocation51_spill] sm:$0xff] %v4707_v36  ;;  %6352 = vst [vmem:[#allocation52_spill] sm:$0xff] %v4710_v28  ;;  %3736 = vtanh.f32 %v1657_v19  ;;  %v4722_v6 = vadd.f32 %v907_v24, %v4415_v26  ;;  %v1181_v3 = vmul.f32 0.044715, %v4703_v33  ;;  %v4726_v37 = vmul.f32 %v1305_v1, %v4633_v58 }
 0x178   : > { %6353 = vst [vmem:[#allocation53_spill] sm:$0xff] %v4719_v50  ;;  %3738 = vtanh.f32 %v1661_v52  ;;  %v1659_v42 = vmul.f32 0.7978846, %v1531_v60  ;;  %v1663_v28 = vmul.f32 0.7978846, %v1535_v22  ;;  %v1307_v19 = vmul.f32 %v1179_v56, %v4673_v13 }
 0x179   : > { %6354 = vst [vmem:[#allocation54_spill] sm:$0xff] %v4722_v6  ;;  %6355 = vst [vmem:[#allocation55_spill] sm:$0xff] %v4726_v37  ;;  %v1183_v27 = vmul.f32 0.044715, %v4707_v36  ;;  %v1184_v9 = vmul.f32 0.044715, %v4719_v50  ;;  %v4734_v17 = vadd.f32 %v716_v15, %v4417_v29  ;;  %v1308_v52 = vmul.f32 %v1180_v59, %v4683_v44 }
 0x17a   : > { %v1186_v41 = vmul.f32 0.044715, %v4722_v6  ;;  %3740 = vtanh.f32 %v1659_v42  ;;  %v1916_v24 = vadd.f32 1.0, %v4605_v45  ;;  %v1310_v60 = vmul.f32 %v1182_v43, %v4689_v38  ;;  %v718_v42 = vpop.f32.mrf.mxu0  ;;  %v911_v45 = vpop.f32.mrf.mxu1 }
 0x17b   : > { %6356 = vst [vmem:[#allocation56_spill] sm:$0xff] %v4734_v17  ;;  %3742 = vtanh.f32 %v1663_v28  ;;  %v1918_v1 = vadd.f32 1.0, %v4627_v14  ;;  %v1309_v22 = vmul.f32 %v1181_v3, %v4703_v33  ;;  %v1021_v37 = vmul.f32 0.5, %v4434_v57 }
 0x17c   : > { %v1912_v58 = vadd.f32 1.0, %v4557_v54  ;;  %v1185_v56 = vmul.f32 0.044715, %v4734_v17  ;;  %v1311_v15 = vmul.f32 %v1183_v27, %v4707_v36  ;;  %v1312_v4 = vmul.f32 %v1184_v9, %v4719_v50 }
 0x17d   : > { %v1314_v59 = vmul.f32 %v1186_v41, %v4722_v6  ;;  %v1914_v28 = vadd.f32 1.0, %v4579_v10  ;;  %v4748_v14 = vmul.f32 %v1307_v19, %v4673_v13  ;;  %v1023_v43 = vmul.f32 0.5, %v4442_v2  ;;  %v720_v19 = vpop.f32.mrf.mxu0 }
 0x17e   : > { %v4752_v57 = vmul.f32 %v1916_v24, %v4455_v16  ;;  %v4755_v54 = vadd.f32 %v909_v11, %v4419_v30  ;;  %v4758_v3 = vmul.f32 %v1308_v52, %v4683_v44  ;;  %v4761_v27 = vmul.f32 %v1310_v60, %v4689_v38  ;;  %v913_v24 = vpop.f32.mrf.mxu1 }
 0x17f   : > { %6357 = vst [vmem:[#allocation57_spill] sm:$0xff] %v4748_v14  ;;  %v4764_v9 = vmul.f32 %v1918_v1, %v4466_v20  ;;  %v4767_v10 = vadd.f32 %v718_v42, %v4413_v25  ;;  %v4770_v2 = vmul.f32 %v1309_v22, %v4703_v33  ;;  %v4773_v16 = vmul.f32 %v1912_v58, %v4436_v62  ;;  %v6368_v42 = vld [vmem:[#allocation33_spill] sm:$0xff] }
 0x180   : > { %6358 = vst [vmem:[#allocation58_spill] sm:$0xff] %v4755_v54  ;;  %6359 = vst [vmem:[#allocation59_spill] sm:$0xff] %v4758_v3  ;;  %v1313_v11 = vmul.f32 %v1185_v56, %v4734_v17  ;;  %v4777_v41 = vadd.f32 %v911_v45, %v4415_v26  ;;  %v4780_v52 = vmul.f32 %v1311_v15, %v4707_v36  ;;  %v1187_v58 = vmul.f32 0.044715, %v4755_v54  ;;  %v6367_v56 = vld [vmem:[#allocation23_spill] sm:$0xff] }
 0x181   : > { %6360 = vst [vmem:[#allocation60_spill] sm:$0xff] %v4761_v27  ;;  %6361 = vst [vmem:[#allocation61_spill] sm:$0xff] %v4767_v10  ;;  %v4783_v20 = vmul.f32 %v1312_v4, %v4719_v50  ;;  %v4786_v60 = vmul.f32 %v1314_v59, %v4722_v6  ;;  %v4789_v1 = vmul.f32 %v1914_v28, %v4438_v63  ;;  %v1188_v15 = vmul.f32 0.044715, %v4767_v10  ;;  %v6370_v50 = vld [vmem:[#allocation20_spill] sm:$0xff] }
 0x182   : > { %6362 = vst [vmem:[#allocation62_spill] sm:$0xff] %v4770_v2  ;;  %6363 = vst [vmem:[#allocation63_spill] sm:$0xff] %v4777_v41  ;;  %v2424_v62 = vpack.c.bf16 %v4752_v57, %v4773_v16  ;;  %v1537_v22 = vadd.f32 %v4537_v32, %v4461_v18  ;;  %v1541_v45 = vadd.f32 %v6368_v42, %v6367_v56  ;;  %v1190_v32 = vmul.f32 0.044715, %v4777_v41  ;;  %v724_v42 = vpop.f32.mrf.mxu0  ;;  %v6377_v2 = vld [vmem:[#allocation18_spill] sm:$0xff] }
 0x183   : > { %6364 = vst [vmem:[#allocation64_spill] sm:$0xff] %v4780_v52  ;;  %6365 = vst [vmem:[#allocation65_spill] sm:$0xff] %v4783_v20  ;;  %v4802_v59 = vadd.f32 %v720_v19, %v4417_v29  ;;  %v4805_v63 = vadd.f32 %v913_v24, %v4419_v30  ;;  %v4808_v57 = vmul.f32 %v1313_v11, %v4734_v17  ;;  %v4812_v4 = vmul.f32 0.5, %v4461_v18  ;;  %v6371_v24 = vld [vmem:[#allocation30_spill] sm:$0xff]  ;;  %v6375_v52 = vld [vmem:[#allocation16_spill] sm:$0xff] }
 0x184   : > { %6366 = vst [vmem:[#allocation66_spill] sm:$0xff] %v4786_v60  ;;  %v3737_v28 = vpop.eup %3736  ;;  %v1665_v16 = vmul.f32 0.7978846, %v1537_v22  ;;  %v1669_v60 = vmul.f32 0.7978846, %v1541_v45  ;;  %v4815_v19 = vmul.f32 0.5, %v6367_v56  ;;  %v1539_v27 = vadd.f32 %v6371_v24, %v6370_v50  ;;  %v917_v45 = vpop.f32.mrf.mxu1 }
 0x185   : > { %6369 = vst [vmem:[#allocation23_spill] sm:$0xff] %v4808_v57  ;;  %v3739_v6 = vpop.eup %3738  ;;  %v1913_v20 = vadd.f32 1.0, %v3737_v28  ;;  %v1315_v11 = vmul.f32 %v1187_v58, %v4755_v54  ;;  %v6372_v57 = vld [vmem:[#allocation24_spill] sm:$0xff]  ;;  %v6373_v17 = vld [vmem:[#allocation34_spill] sm:$0xff]  ;;  %v1316_v28 = vmul.f32 %v1188_v15, %v4767_v10  ;;  %v4824_v44 = vadd.f32 %v724_v42, %v4413_v25  ;;  %v726_v13 = vpop.f32.mrf.mxu0 }
 0x186   : > { %v1917_v38 = vadd.f32 1.0, %v3739_v6  ;;  %3744 = vtanh.f32 %v1665_v16  ;;  %v1543_v22 = vadd.f32 %v6373_v17, %v6372_v57  ;;  %v1667_v18 = vmul.f32 0.7978846, %v1539_v27  ;;  %v919_v42 = vpop.f32.mrf.mxu1 }
 0x187   : > { %v3741_v3 = vpop.eup %3740  ;;  %3746 = vtanh.f32 %v1669_v60  ;;  %6374 = vst [vmem:[#allocation33_spill] sm:$0xff] %v4824_v44  ;;  %v2041_v36 = vmul.f32 %v1913_v20, %v6375_v52  ;;  %v1189_v16 = vmul.f32 0.044715, %v4802_v59  ;;  %v4829_v17 = vadd.f32 %v917_v45, %v4415_v26  ;;  %v6379_v20 = vld [vmem:[#allocation28_spill] sm:$0xff] }
 0x188   : > { %v3743_v56 = vpop.eup %3742  ;;  %v2045_v24 = vmul.f32 %v1917_v38, %v1021_v37  ;;  %v1915_v6 = vadd.f32 1.0, %v3741_v3  ;;  %v1671_v14 = vmul.f32 0.7978846, %v1543_v22  ;;  %3748 = vtanh.f32 %v1667_v18  ;;  %v6378_v3 = vld [vmem:[#allocation17_spill] sm:$0xff]  ;;  %v6383_v18 = vld [vmem:[#allocation31_spill] sm:$0xff] }
 0x189   : > { %v1919_v58 = vadd.f32 1.0, %v3743_v56  ;;  %6376 = vst [vmem:[#allocation20_spill] sm:$0xff] %v4829_v17  ;;  %v1318_v27 = vmul.f32 %v1190_v32, %v4777_v41  ;;  %v1191_v60 = vmul.f32 0.044715, %v4805_v63  ;;  %v4835_v37 = vmul.f32 0.5, %v6370_v50 }
 0x18a   : > { %v2425_v15 = vpack.c.bf16 %v2045_v24, %v2041_v36  ;;  %3750 = vtanh.f32 %v1671_v14  ;;  %v2043_v52 = vmul.f32 %v1915_v6, %v6377_v2  ;;  %v1536_v22 = vadd.f32 %v6379_v20, %v6378_v3  ;;  %v6382_v14 = vld [vmem:[#allocation21_spill] sm:$0xff]  ;;  %v6384_v24 = vld [vmem:[#allocation19_spill] sm:$0xff] }
 0x18b   : > { %v2047_v38 = vmul.f32 %v1919_v58, %v1023_v43  ;;  %v4840_v45 = vmul.f32 %v1315_v11, %v4755_v54  ;;  %v4843_v36 = vmul.f32 %v1316_v28, %v4767_v10  ;;  %v1192_v32 = vmul.f32 0.044715, %v4824_v44  ;;  %v6385_v6 = vld [vmem:[#allocation29_spill] sm:$0xff]  ;;  %v6386_v11 = vld [vmem:[#allocation22_spill] sm:$0xff] }
 0x18c   : > { %2783 = vmatprep.mubr.bf16.mxu0 %v2425_v15  ;;  %v1540_v56 = vadd.f32 %v6383_v18, %v6382_v14  ;;  %v1194_v50 = vmul.f32 0.044715, %v4829_v17  ;;  %v1664_v43 = vmul.f32 0.7978846, %v1536_v22  ;;  %v1538_v58 = vadd.f32 %v6385_v6, %v6384_v24  ;;  %v728_v15 = vpop.f32.mrf.mxu0  ;;  %v921_v18 = vpop.f32.mrf.mxu1 }
 0x18d   : > { %6380 = vst [vmem:[#allocation30_spill] sm:$0xff] %v4840_v45  ;;  %6381 = vst [vmem:[#allocation24_spill] sm:$0xff] %v4843_v36  ;;  %v2427_v2 = vpack.c.bf16 %v2047_v38, %v2043_v52  ;;  %2784 = vmatmul.mubr.bf16.vlgmr.msra.gmra.mxu0 %v2424_v62  ;;  %v6387_v45 = vld [vmem:[#allocation32_spill] sm:$0xff]  ;;  %v4854_v28 = vadd.f32 %v726_v13, %v4417_v29  ;;  %v4857_v36 = vadd.f32 %v919_v42, %v4419_v30 }
 0x18e   : > { %v1668_v20 = vmul.f32 0.7978846, %v1540_v56  ;;  %v1542_v54 = vadd.f32 %v6387_v45, %v6386_v11  ;;  %v1317_v62 = vmul.f32 %v1189_v16, %v4802_v59  ;;  %v1319_v52 = vmul.f32 %v1191_v60, %v4805_v63  ;;  %v730_v6 = vpop.f32.mrf.mxu0 }
 0x18f   : > { %2944 = vmatprep.mubr.bf16.mxu1 %v2427_v2  ;;  %3752 = vtanh.f32 %v1664_v43  ;;  %v1666_v38 = vmul.f32 0.7978846, %v1538_v58  ;;  %v6388_v22 = vpack.c.bf16 %v4764_v9, %v4789_v1  ;;  %v1320_v45 = vmul.f32 %v1192_v32, %v4824_v44 }
 0x190   : > { %3754 = vtanh.f32 %v1668_v20  ;;  %v1670_v13 = vmul.f32 0.7978846, %v1542_v54  ;;  %v4866_v56 = vadd.f32 %v728_v15, %v4413_v25  ;;  %v4869_v42 = vmul.f32 %v1318_v27, %v4777_v41 }
 0x191   : > { %2945 = vmatmul.mubr.bf16.vlgmr.msra.gmra.mxu1 %v6388_v22  ;;  %v1322_v16 = vmul.f32 %v1194_v50, %v4829_v17  ;;  %3756 = vtanh.f32 %v1666_v38  ;;  %v4873_v60 = vadd.f32 %v921_v18, %v4415_v26  ;;  %v1031_v2 = vmul.f32 0.5, %v6372_v57  ;;  %v923_v38 = vpop.f32.mrf.mxu1 }
 0x192   : > { %6389 = vst [vmem:[#allocation34_spill] sm:$0xff] %v4869_v42  ;;  %3758 = vtanh.f32 %v1670_v13  ;;  %v1193_v9 = vmul.f32 0.044715, %v4854_v28  ;;  %v1195_v1 = vmul.f32 0.044715, %v4857_v36  ;;  %v4879_v32 = vmul.f32 %v1317_v62, %v4802_v59 }
 0x193   : > { %v3745_v54 = vpop.eup %3744  ;;  %v4882_v27 = vmul.f32 %v1319_v52, %v4805_v63  ;;  %v4885_v50 = vmul.f32 0.5, %v6378_v3  ;;  %v4888_v43 = vmul.f32 0.5, %v6382_v14  ;;  %v4891_v15 = vmul.f32 %v1320_v45, %v4824_v44 }
 0x194   : > { %v3747_v57 = vpop.eup %3746  ;;  %v1921_v58 = vadd.f32 1.0, %v3745_v54  ;;  %v4894_v20 = vmul.f32 0.5, %v6384_v24  ;;  %v1196_v18 = vmul.f32 0.044715, %v4866_v56  ;;  %v4898_v52 = vmul.f32 %v1322_v16, %v4829_v17  ;;  %v6393_v54 = vld [vmem:[#allocation27_spill] sm:$0xff] }
 0x195   : > { %6390 = vst [vmem:[#allocation16_spill] sm:$0xff] %v4882_v27  ;;  %6391 = vst [vmem:[#allocation18_spill] sm:$0xff] %v4891_v15  ;;  %v1925_v62 = vadd.f32 1.0, %v3747_v57  ;;  %v4901_v3 = vmul.f32 0.5, %v6386_v11  ;;  %v1198_v14 = vmul.f32 0.044715, %v4873_v60  ;;  %v3749_v22 = vpop.eup %3748  ;;  %v1321_v13 = vmul.f32 %v1193_v9, %v4854_v28 }
 0x196   : > { %6392 = vst [vmem:[#allocation17_spill] sm:$0xff] %v4898_v52  ;;  %v1323_v45 = vmul.f32 %v1195_v1, %v4857_v36  ;;  %v4907_v24 = vadd.f32 %v730_v6, %v4417_v29  ;;  %v6394_v15 = vld [vmem:[#allocation38_spill] sm:$0xff]  ;;  %v2049_v16 = vmul.f32 %v1921_v58, %v4812_v4  ;;  %v1923_v52 = vadd.f32 1.0, %v3749_v22  ;;  %v927_v58 = vpop.f32.mrf.mxu1  ;;  %v6397_v22 = vld [vmem:[#allocation25_spill] sm:$0xff] }
 0x197   : > { %v1545_v57 = vadd.f32 %v6394_v15, %v6393_v54  ;;  %v3751_v44 = vpop.eup %3750  ;;  %v2053_v11 = vmul.f32 %v1925_v62, %v4815_v19  ;;  %v1549_v17 = vadd.f32 %v4651_v34, %v4552_v49  ;;  %v1324_v9 = vmul.f32 %v1196_v18, %v4866_v56 }
 0x198   : > { %v1927_v42 = vadd.f32 1.0, %v3751_v44  ;;  %v4917_v1 = vadd.f32 %v923_v38, %v4419_v30  ;;  %v2051_v10 = vmul.f32 %v1923_v52, %v4835_v37  ;;  %v1326_v15 = vmul.f32 %v1198_v14, %v4873_v60  ;;  %v734_v44 = vpop.f32.mrf.mxu0 }
 0x199   : > { %v1673_v6 = vmul.f32 0.7978846, %v1545_v57  ;;  %v2429_v41 = vpack.c.bf16 %v2053_v11, %v2049_v16  ;;  %v1677_v27 = vmul.f32 0.7978846, %v1549_v17  ;;  %v1547_v19 = vadd.f32 %v4636_v31, %v4521_v12  ;;  %v6400_v16 = vld [vmem:[#allocation43_spill] sm:$0xff] }
 0x19a   : > { %v2055_v4 = vmul.f32 %v1927_v42, %v1031_v2  ;;  %v1551_v34 = vadd.f32 %v4654_v48, %v4555_v53  ;;  %v4926_v18 = vmul.f32 %v1321_v13, %v4854_v28  ;;  %v1197_v62 = vmul.f32 0.044715, %v4907_v24  ;;  %v6398_v13 = vld [vmem:[#allocation36_spill] sm:$0xff] }
 0x19b   : > { %3760 = vtanh.f32 %v1673_v6  ;;  %2791 = vmatprep.mubr.bf16.mxu0 %v2429_v41  ;;  %v4930_v37 = vmul.f32 0.5, %v6393_v54  ;;  %v1199_v2 = vmul.f32 0.044715, %v4917_v1  ;;  %v1675_v31 = vmul.f32 0.7978846, %v1547_v19  ;;  %v736_v6 = vpop.f32.mrf.mxu0 }
 0x19c   : > { %3762 = vtanh.f32 %v1677_v27  ;;  %v3753_v17 = vpop.eup %3752  ;;  %v2431_v42 = vpack.c.bf16 %v2055_v4, %v2051_v10  ;;  %v1679_v52 = vmul.f32 0.7978846, %v1551_v34  ;;  %v4934_v38 = vadd.f32 %v734_v44, %v4413_v25 }
 0x19d   : > { %v3755_v14 = vpop.eup %3754  ;;  %v1920_v48 = vadd.f32 1.0, %v3753_v17  ;;  %v4937_v41 = vadd.f32 %v927_v58, %v4415_v26  ;;  %v1544_v57 = vadd.f32 %v6398_v13, %v6397_v22  ;;  %v4942_v10 = vmul.f32 %v1323_v45, %v4857_v36 }
 0x19e   : > { %6395 = vst [vmem:[#allocation28_spill] sm:$0xff] %v4934_v38  ;;  %v3757_v54 = vpop.eup %3756  ;;  %2952 = vmatprep.mubr.bf16.mxu1 %v2431_v42  ;;  %v1924_v27 = vadd.f32 1.0, %v3755_v14  ;;  %3764 = vtanh.f32 %v1675_v31  ;;  %v1548_v11 = vadd.f32 %v6400_v16, %v4528_v21  ;;  %v4947_v34 = vmul.f32 %v1324_v9, %v4866_v56  ;;  %v929_v14 = vpop.f32.mrf.mxu1 }
 0x19f   : > { %6396 = vst [vmem:[#allocation21_spill] sm:$0xff] %v4937_v41  ;;  %6399 = vst [vmem:[#allocation31_spill] sm:$0xff] %v4942_v10  ;;  %v3759_v4 = vpop.eup %3758  ;;  %v1922_v19 = vadd.f32 1.0, %v3757_v54  ;;  %v1325_v44 = vmul.f32 %v1197_v62, %v4907_v24  ;;  %3766 = vtanh.f32 %v1679_v52  ;;  %v2048_v58 = vmul.f32 %v1920_v48, %v4885_v50  ;;  %v738_v52 = vpop.f32.mrf.mxu0  ;;  %v6403_v48 = vld [vmem:[#allocation37_spill] sm:$0xff] }
 0x1a0   : > { %v2052_v17 = vmul.f32 %v1924_v27, %v4888_v43  ;;  %v1926_v42 = vadd.f32 1.0, %v3759_v4  ;;  %v1672_v45 = vmul.f32 0.7978846, %v1544_v57  ;;  %v1327_v31 = vmul.f32 %v1199_v2, %v4917_v1  ;;  %v6402_v43 = vld [vmem:[#allocation26_spill] sm:$0xff]  ;;  %v6404_v2 = vld [vmem:[#allocation44_spill] sm:$0xff] }
 0x1a1   : > { %v1200_v13 = vmul.f32 0.044715, %v4934_v38  ;;  %v1202_v16 = vmul.f32 0.044715, %v4937_v41  ;;  %v1676_v54 = vmul.f32 0.7978846, %v1548_v11  ;;  %v2050_v9 = vmul.f32 %v1922_v19, %v4894_v20  ;;  %v931_v19 = vpop.f32.mrf.mxu1 }
 0x1a2   : > { %v2428_v10 = vpack.c.bf16 %v2052_v17, %v2048_v58  ;;  %v2054_v62 = vmul.f32 %v1926_v42, %v4901_v3  ;;  %3768 = vtanh.f32 %v1672_v45  ;;  %v4958_v50 = vmul.f32 %v1326_v15, %v4873_v60 }
 0x1a3   : > { %3770 = vtanh.f32 %v1676_v54  ;;  %v1546_v57 = vadd.f32 %v6403_v48, %v6402_v43  ;;  %v1550_v27 = vadd.f32 %v6404_v2, %v4531_v23  ;;  %v4965_v11 = vmul.f32 %v1325_v44, %v4907_v24  ;;  %v933_v48 = vpop.f32.mrf.mxu1 }
 0x1a4   : > { %6401 = vst [vmem:[#allocation19_spill] sm:$0xff] %v4958_v50  ;;  %2792 = vmatmul.mubr.bf16.gmra.mxu0 %v2428_v10  ;;  %v2430_v4 = vpack.c.bf16 %v2054_v62, %v2050_v9  ;;  %v1037_v20 = vmul.f32 0.5, %v4552_v49  ;;  %v4969_v3 = vadd.f32 %v736_v6, %v4417_v29  ;;  %v4972_v15 = vmul.f32 %v1327_v31, %v4917_v1  ;;  %v740_v6 = vpop.f32.mrf.mxu0 }
 0x1a5   : > { %v1328_v58 = vmul.f32 %v1200_v13, %v4934_v38  ;;  %v1674_v17 = vmul.f32 0.7978846, %v1546_v57  ;;  %v1678_v42 = vmul.f32 0.7978846, %v1550_v27  ;;  %v1035_v10 = vmul.f32 0.5, %v4521_v12 }
 0x1a6   : > { %2953 = vmatmul.mubr.bf16.gmra.mxu1 %v2430_v4  ;;  %v1330_v45 = vmul.f32 %v1202_v16, %v4937_v41  ;;  %v4978_v44 = vadd.f32 %v929_v14, %v4419_v30  ;;  %v4981_v49 = vadd.f32 %v738_v52, %v4413_v25  ;;  %v1039_v31 = vmul.f32 0.5, %v4555_v53 }
 0x1a7   : > { %v1032_v9 = vmul.f32 0.5, %v6397_v22  ;;  %3772 = vtanh.f32 %v1674_v17  ;;  %v4986_v13 = vadd.f32 %v931_v19, %v4415_v26  ;;  %v1036_v16 = vmul.f32 0.5, %v4528_v21 }
 0x1a8   : > { %6405 = vst [vmem:[#allocation29_spill] sm:$0xff] %v4978_v44  ;;  %6406 = vst [vmem:[#allocation22_spill] sm:$0xff] %v4981_v49  ;;  %v3761_v54 = vpop.eup %3760  ;;  %3774 = vtanh.f32 %v1678_v42  ;;  %v1201_v14 = vmul.f32 0.044715, %v4969_v3  ;;  %v4991_v57 = vmul.f32 %v1328_v58, %v4934_v38  ;;  %v4994_v53 = vmul.f32 0.5, %v6402_v43 }
 0x1a9   : > { %6407 = vst [vmem:[#allocation32_spill] sm:$0xff] %v4986_v13  ;;  %v3763_v62 = vpop.eup %3762  ;;  %v1929_v12 = vadd.f32 1.0, %v3761_v54  ;;  %v4997_v22 = vadd.f32 %v740_v6, %v4417_v29  ;;  %v5000_v2 = vmul.f32 %v1330_v45, %v4937_v41  ;;  %v5003_v27 = vmul.f32 0.5, %v4531_v23 }
 0x1aa   : > { %v1933_v52 = vadd.f32 1.0, %v3763_v62  ;;  %6408 = vst [vmem:[#allocation27_spill] sm:$0xff] %v4991_v57  ;;  %v1203_v21 = vmul.f32 0.044715, %v4978_v44  ;;  %v1204_v4 = vmul.f32 0.044715, %v4981_v49  ;;  %v5010_v42 = vadd.f32 %v933_v48, %v4419_v30 }
 0x1ab   : > { %6409 = vst [vmem:[#allocation38_spill] sm:$0xff] %v5000_v2  ;;  %v3765_v19 = vpop.eup %3764  ;;  %v2057_v58 = vmul.f32 %v1929_v12, %v4930_v37  ;;  %v1206_v43 = vmul.f32 0.044715, %v4986_v13  ;;  %v1329_v45 = vmul.f32 %v1201_v14, %v4969_v3  ;;  %v1553_v23 = vadd.f32 %v4667_v47, %v4577_v5  ;;  %v744_v12 = vpop.f32.mrf.mxu0 }
 0x1ac   : > { %v2061_v17 = vmul.f32 %v1933_v52, %v1037_v20  ;;  %6410 = vst [vmem:[#allocation25_spill] sm:$0xff] %v5010_v42  ;;  %v3767_v6 = vpop.eup %3766  ;;  %v1931_v54 = vadd.f32 1.0, %v3765_v19  ;;  %v1557_v62 = vadd.f32 %v4686_v7, %v4611_v51  ;;  %v1205_v37 = vmul.f32 0.044715, %v4997_v22 }
 0x1ad   : > { %v1935_v41 = vadd.f32 1.0, %v3767_v6  ;;  %v5019_v20 = vmul.f32 0.5, %v4577_v5  ;;  %v1331_v48 = vmul.f32 %v1203_v21, %v4978_v44  ;;  %v1332_v52 = vmul.f32 %v1204_v4, %v4981_v49 }
 0x1ae   : > { %v2433_v2 = vpack.c.bf16 %v2061_v17, %v2057_v58  ;;  %v1681_v19 = vmul.f32 0.7978846, %v1553_v23  ;;  %v1685_v14 = vmul.f32 0.7978846, %v1557_v62  ;;  %v2059_v47 = vmul.f32 %v1931_v54, %v1035_v10  ;;  %v937_v17 = vpop.f32.mrf.mxu1 }
 0x1af   : > { %v3769_v57 = vpop.eup %3768  ;;  %v2063_v38 = vmul.f32 %v1935_v41, %v1039_v31  ;;  %v1555_v7 = vadd.f32 %v4670_v0, %v4591_v35  ;;  %v1559_v58 = vadd.f32 %v4696_v55, %v4616_v46  ;;  %v5028_v50 = vmul.f32 %v1329_v45, %v4969_v3  ;;  %v746_v41 = vpop.f32.mrf.mxu0 }
 0x1b0   : > { %2799 = vmatprep.mubr.bf16.mxu0 %v2433_v2  ;;  %v3771_v5 = vpop.eup %3770  ;;  %v1928_v6 = vadd.f32 1.0, %v3769_v57  ;;  %v1334_v21 = vmul.f32 %v1206_v43, %v4986_v13  ;;  %3776 = vtanh.f32 %v1681_v19  ;;  %v1333_v31 = vmul.f32 %v1205_v37, %v4997_v22 }
 0x1b1   : > { %v2435_v4 = vpack.c.bf16 %v2063_v38, %v2059_v47  ;;  %v1932_v23 = vadd.f32 1.0, %v3771_v5  ;;  %3778 = vtanh.f32 %v1685_v14  ;;  %v1683_v10 = vmul.f32 0.7978846, %v1555_v7  ;;  %v748_v7 = vpop.f32.mrf.mxu0  ;;  %v6416_v5 = vld [vmem:[#allocation35_spill] sm:$0xff] }
 0x1b2   : > { %v1687_v0 = vmul.f32 0.7978846, %v1559_v58  ;;  %v5033_v2 = vadd.f32 %v744_v12, %v4413_v25  ;;  %v5036_v55 = vadd.f32 %v937_v17, %v4415_v26  ;;  %v2056_v57 = vmul.f32 %v1928_v6, %v1032_v9  ;;  %v939_v12 = vpop.f32.mrf.mxu1  ;;  %v6417_v6 = vld [vmem:[#allocation45_spill] sm:$0xff] }
 0x1b3   : > { %2960 = vmatprep.mubr.bf16.mxu1 %v2435_v4  ;;  %v2060_v54 = vmul.f32 %v1932_v23, %v1036_v16  ;;  %3780 = vtanh.f32 %v1683_v10  ;;  %v1552_v38 = vadd.f32 %v4658_v40, %v4565_v61  ;;  %v5041_v45 = vmul.f32 %v1331_v48, %v4978_v44  ;;  %v6418_v10 = vld [vmem:[#allocation39_spill] sm:$0xff] }
 0x1b4   : > { %6411 = vst [vmem:[#allocation36_spill] sm:$0xff] %v5033_v2  ;;  %6412 = vst [vmem:[#allocation43_spill] sm:$0xff] %v5036_v55  ;;  %v3773_v43 = vpop.eup %3772  ;;  %v5044_v62 = vmul.f32 %v1332_v52, %v4981_v49  ;;  %3782 = vtanh.f32 %v1687_v0  ;;  %v1556_v37 = vadd.f32 %v4676_v8, %v4597_v39  ;;  %v1207_v16 = vmul.f32 0.044715, %v5010_v42  ;;  %v6419_v0 = vld [vmem:[#allocation47_spill] sm:$0xff]  ;;  %v6430_v49 = vld [vmem:[#allocation46_spill] sm:$0xff] }
 0x1b5   : > { %6413 = vst [vmem:[#allocation26_spill] sm:$0xff] %v5041_v45  ;;  %v3775_v19 = vpop.eup %3774  ;;  %v2432_v14 = vpack.c.bf16 %v2060_v54, %v2056_v57  ;;  %v1930_v9 = vadd.f32 1.0, %v3773_v43  ;;  %v1680_v47 = vmul.f32 0.7978846, %v1552_v38  ;;  %v5050_v58 = vmul.f32 %v1334_v21, %v4986_v13  ;;  %v941_v54 = vpop.f32.mrf.mxu1 }
 0x1b6   : > { %6414 = vst [vmem:[#allocation37_spill] sm:$0xff] %v5044_v62  ;;  %v1934_v40 = vadd.f32 1.0, %v3775_v19  ;;  %v1208_v48 = vmul.f32 0.044715, %v5033_v2  ;;  %v1684_v52 = vmul.f32 0.7978846, %v1556_v37  ;;  %v1554_v4 = vadd.f32 %v6417_v6, %v6416_v5  ;;  %v750_v19 = vpop.f32.mrf.mxu0 }
 0x1b7   : > { %6415 = vst [vmem:[#allocation44_spill] sm:$0xff] %v5050_v58  ;;  %2800 = vmatmul.mubr.bf16.gmra.mxu0 %v2432_v14  ;;  %v2058_v17 = vmul.f32 %v1930_v9, %v4994_v53  ;;  %v1210_v8 = vmul.f32 0.044715, %v5036_v55  ;;  %3784 = vtanh.f32 %v1680_v47  ;;  %v1558_v57 = vadd.f32 %v6419_v0, %v6418_v10 }
 0x1b8   : > { %v2062_v23 = vmul.f32 %v1934_v40, %v5003_v27  ;;  %3786 = vtanh.f32 %v1684_v52  ;;  %v5061_v21 = vadd.f32 %v746_v41, %v4417_v29  ;;  %v5064_v38 = vmul.f32 %v1333_v31, %v4997_v22 }
 0x1b9   : > { %v1335_v53 = vmul.f32 %v1207_v16, %v5010_v42  ;;  %v1045_v43 = vmul.f32 0.5, %v4611_v51  ;;  %v1682_v37 = vmul.f32 0.7978846, %v1554_v4  ;;  %v1686_v9 = vmul.f32 0.7978846, %v1558_v57 }
 0x1ba   : > { %v2434_v14 = vpack.c.bf16 %v2062_v23, %v2058_v17  ;;  %v5069_v27 = vadd.f32 %v939_v12, %v4419_v30  ;;  %v5072_v47 = vadd.f32 %v748_v7, %v4413_v25  ;;  %v1336_v41 = vmul.f32 %v1208_v48, %v5033_v2 }
 0x1bb   : > { %v1338_v40 = vmul.f32 %v1210_v8, %v5036_v55  ;;  %3788 = vtanh.f32 %v1682_v37  ;;  %v5077_v31 = vadd.f32 %v941_v54, %v4415_v26  ;;  %v1043_v51 = vmul.f32 0.5, %v4591_v35 }
 0x1bc   : > { %6420 = vst [vmem:[#allocation35_spill] sm:$0xff] %v5069_v27  ;;  %6421 = vst [vmem:[#allocation45_spill] sm:$0xff] %v5072_v47  ;;  %2961 = vmatmul.mubr.bf16.gmra.mxu1 %v2434_v14  ;;  %3790 = vtanh.f32 %v1686_v9  ;;  %v1209_v16 = vmul.f32 0.044715, %v5061_v21  ;;  %v5082_v12 = vadd.f32 %v750_v19, %v4417_v29  ;;  %v5085_v7 = vmul.f32 %v1335_v53, %v5010_v42  ;;  %v6433_v42 = vld [vmem:[#allocation64_spill] sm:$0xff] }
 0x1bd   : > { %6422 = vst [vmem:[#allocation39_spill] sm:$0xff] %v5077_v31  ;;  %v3777_v52 = vpop.eup %3776  ;;  %v1047_v48 = vmul.f32 0.5, %v4616_v46  ;;  %v1040_v17 = vmul.f32 0.5, %v4565_v61  ;;  %v1044_v8 = vmul.f32 0.5, %v4597_v39  ;;  %v5091_v35 = vmul.f32 0.5, %v6416_v5  ;;  %v943_v46 = vpop.f32.mrf.mxu1 }
 0x1be   : > { %6423 = vst [vmem:[#allocation47_spill] sm:$0xff] %v5085_v7  ;;  %v3779_v6 = vpop.eup %3778  ;;  %v1937_v4 = vadd.f32 1.0, %v3777_v52  ;;  %v1211_v23 = vmul.f32 0.044715, %v5069_v27  ;;  %v1212_v0 = vmul.f32 0.044715, %v5072_v47  ;;  %v5096_v54 = vmul.f32 %v1336_v41, %v5033_v2 }
 0x1bf   : > { %v1941_v57 = vadd.f32 1.0, %v3779_v6  ;;  %v5099_v53 = vmul.f32 %v1338_v40, %v5036_v55  ;;  %v1214_v61 = vmul.f32 0.044715, %v5077_v31  ;;  %v1046_v5 = vmul.f32 0.5, %v6418_v10  ;;  %v6426_v41 = vld [vmem:[#allocation42_spill] sm:$0xff]  ;;  %v6431_v7 = vld [vmem:[#allocation57_spill] sm:$0xff]  ;;  %v947_v45 = vpop.f32.mrf.mxu1 }
 0x1c0   : > { %6424 = vst [vmem:[#allocation67_spill] sm:$0xff] %v5096_v54  ;;  %v3781_v39 = vpop.eup %3780  ;;  %v2065_v37 = vmul.f32 %v1937_v4, %v5019_v20  ;;  %v1337_v19 = vmul.f32 %v1209_v16, %v5061_v21  ;;  %v1213_v14 = vmul.f32 0.044715, %v5082_v12  ;;  %v6427_v54 = vld [vmem:[#allocation55_spill] sm:$0xff]  ;;  %v6428_v40 = vld [vmem:[#allocation62_spill] sm:$0xff]  ;;  %v1339_v58 = vmul.f32 %v1211_v23, %v5069_v27  ;;  %v754_v16 = vpop.f32.mrf.mxu0 }
 0x1c1   : > { %6425 = vst [vmem:[#allocation68_spill] sm:$0xff] %v5099_v53  ;;  %v3783_v9 = vpop.eup %3782  ;;  %v2069_v52 = vmul.f32 %v1941_v57, %v1045_v43  ;;  %v1939_v6 = vadd.f32 1.0, %v3781_v39  ;;  %v1561_v2 = vadd.f32 %v6427_v54, %v6426_v41  ;;  %v1565_v53 = vadd.f32 %v6428_v40, %v4703_v33 }
 0x1c2   : > { %v1943_v55 = vadd.f32 1.0, %v3783_v9  ;;  %v1340_v20 = vmul.f32 %v1212_v0, %v5072_v47  ;;  %v5113_v10 = vadd.f32 %v943_v46, %v4419_v30  ;;  %v1342_v13 = vmul.f32 %v1214_v61, %v5077_v31  ;;  %v6432_v9 = vld [vmem:[#allocation51_spill] sm:$0xff] }
 0x1c3   : > { %v2437_v4 = vpack.c.bf16 %v2069_v52, %v2065_v37  ;;  %v1689_v43 = vmul.f32 0.7978846, %v1561_v2  ;;  %v1693_v57 = vmul.f32 0.7978846, %v1565_v53  ;;  %v2067_v62 = vmul.f32 %v1939_v6, %v1043_v51 }
 0x1c4   : > { %6429 = vst [vmem:[#allocation42_spill] sm:$0xff] %v5113_v10  ;;  %v3785_v39 = vpop.eup %3784  ;;  %v2071_v54 = vmul.f32 %v1943_v55, %v1047_v48  ;;  %v1563_v40 = vadd.f32 %v6431_v7, %v6430_v49  ;;  %v1567_v23 = vadd.f32 %v6433_v42, %v6432_v9  ;;  %v5121_v44 = vmul.f32 0.5, %v6426_v41  ;;  %v6436_v41 = vld [vmem:[#allocation40_spill] sm:$0xff] }
 0x1c5   : > { %v3787_v0 = vpop.eup %3786  ;;  %2807 = vmatprep.mubr.bf16.mxu0 %v2437_v4  ;;  %v1936_v46 = vadd.f32 1.0, %v3785_v39  ;;  %3792 = vtanh.f32 %v1689_v43  ;;  %v5124_v2 = vadd.f32 %v754_v16, %v4413_v25  ;;  %v5127_v7 = vmul.f32 %v1337_v19, %v5061_v21  ;;  %v6437_v16 = vld [vmem:[#allocation50_spill] sm:$0xff]  ;;  %v756_v4 = vpop.f32.mrf.mxu0 }
 0x1c6   : > { %v2439_v53 = vpack.c.bf16 %v2071_v54, %v2067_v62  ;;  %v1940_v51 = vadd.f32 1.0, %v3787_v0  ;;  %3794 = vtanh.f32 %v1693_v57  ;;  %v1691_v55 = vmul.f32 0.7978846, %v1563_v40 }
 0x1c7   : > { %6434 = vst [vmem:[#allocation55_spill] sm:$0xff] %v5124_v2  ;;  %v1215_v42 = vmul.f32 0.044715, %v5113_v10  ;;  %v1695_v48 = vmul.f32 0.7978846, %v1567_v23  ;;  %v5131_v61 = vadd.f32 %v947_v45, %v4415_v26  ;;  %v2064_v52 = vmul.f32 %v1936_v46, %v1040_v17  ;;  %v6438_v45 = vld [vmem:[#allocation48_spill] sm:$0xff]  ;;  %v949_v17 = vpop.f32.mrf.mxu1 }
 0x1c8   : > { %v3789_v37 = vpop.eup %3788  ;;  %2968 = vmatprep.mubr.bf16.mxu1 %v2439_v53  ;;  %v2068_v6 = vmul.f32 %v1940_v51, %v1044_v8  ;;  %3796 = vtanh.f32 %v1691_v55  ;;  %v1560_v62 = vadd.f32 %v6437_v16, %v6436_v41  ;;  %v1341_v19 = vmul.f32 %v1213_v14, %v5082_v12  ;;  %v6439_v23 = vld [vmem:[#allocation59_spill] sm:$0xff]  ;;  %v6443_v16 = vld [vmem:[#allocation41_spill] sm:$0xff] }
 0x1c9   : > { %6435 = vst [vmem:[#allocation62_spill] sm:$0xff] %v5131_v61  ;;  %v3791_v43 = vpop.eup %3790  ;;  %v1938_v57 = vadd.f32 1.0, %v3789_v37  ;;  %3798 = vtanh.f32 %v1695_v48  ;;  %v1216_v39 = vmul.f32 0.044715, %v5124_v2  ;;  %v1564_v0 = vadd.f32 %v6439_v23, %v6438_v45 }
 0x1ca   : > { %v2436_v54 = vpack.c.bf16 %v2068_v6, %v2064_v52  ;;  %v1942_v40 = vadd.f32 1.0, %v3791_v43  ;;  %v1688_v53 = vmul.f32 0.7978846, %v1560_v62  ;;  %v5140_v8 = vmul.f32 %v1339_v58, %v5069_v27  ;;  %v758_v52 = vpop.f32.mrf.mxu0  ;;  %v6444_v58 = vld [vmem:[#allocation52_spill] sm:$0xff]  ;;  %v6445_v43 = vld [vmem:[#allocation49_spill] sm:$0xff] }
 0x1cb   : > { %v5143_v46 = vmul.f32 %v1340_v20, %v5072_v47  ;;  %v1343_v51 = vmul.f32 %v1215_v42, %v5113_v10  ;;  %v1218_v14 = vmul.f32 0.044715, %v5131_v61  ;;  %v2066_v55 = vmul.f32 %v1938_v57, %v5091_v35  ;;  %v6446_v20 = vld [vmem:[#allocation60_spill] sm:$0xff] }
 0x1cc   : > { %6440 = vst [vmem:[#allocation46_spill] sm:$0xff] %v5140_v8  ;;  %2808 = vmatmul.mubr.bf16.gmra.mxu0 %v2436_v54  ;;  %v2070_v48 = vmul.f32 %v1942_v40, %v1046_v5  ;;  %v1692_v37 = vmul.f32 0.7978846, %v1564_v0  ;;  %3800 = vtanh.f32 %v1688_v53  ;;  %v5149_v6 = vmul.f32 %v1342_v13, %v5077_v31  ;;  %v951_v5 = vpop.f32.mrf.mxu1 }
 0x1cd   : > { %6441 = vst [vmem:[#allocation57_spill] sm:$0xff] %v5143_v46  ;;  %v1562_v62 = vadd.f32 %v6444_v58, %v6443_v16  ;;  %v1566_v23 = vadd.f32 %v6446_v20, %v6445_v43  ;;  %v5156_v42 = vadd.f32 %v756_v4, %v4417_v29  ;;  %v5159_v54 = vmul.f32 %v1341_v19, %v5082_v12 }
 0x1ce   : > { %6442 = vst [vmem:[#allocation51_spill] sm:$0xff] %v5149_v6  ;;  %v2438_v46 = vpack.c.bf16 %v2070_v48, %v2066_v55  ;;  %v1344_v35 = vmul.f32 %v1216_v39, %v5124_v2  ;;  %3802 = vtanh.f32 %v1692_v37  ;;  %v1346_v13 = vmul.f32 %v1218_v14, %v5131_v61  ;;  %v760_v39 = vpop.f32.mrf.mxu0  ;;  %v953_v37 = vpop.f32.mrf.mxu1 }
 0x1cf   : > { %6447 = vst [vmem:[#allocation64_spill] sm:$0xff] %v5156_v42  ;;  %v1690_v57 = vmul.f32 0.7978846, %v1562_v62  ;;  %v1694_v40 = vmul.f32 0.7978846, %v1566_v23  ;;  %v5164_v0 = vadd.f32 %v949_v17, %v4419_v30  ;;  %v5167_v53 = vmul.f32 %v1343_v51, %v5113_v10  ;;  %v6456_v10 = vld [vmem:[#allocation30_spill] sm:$0xff] }
 0x1d0   : > { %2969 = vmatmul.mubr.bf16.gmra.mxu1 %v2438_v46  ;;  %v1053_v4 = vmul.f32 0.5, %v4703_v33  ;;  %v1051_v19 = vmul.f32 0.5, %v6430_v49  ;;  %v5172_v55 = vadd.f32 %v758_v52, %v4413_v25  ;;  %v1055_v48 = vmul.f32 0.5, %v6432_v9 }
 0x1d1   : > { %6448 = vst [vmem:[#allocation40_spill] sm:$0xff] %v5167_v53  ;;  %3804 = vtanh.f32 %v1690_v57  ;;  %v1217_v14 = vmul.f32 0.044715, %v5156_v42  ;;  %v5177_v17 = vadd.f32 %v951_v5, %v4415_v26  ;;  %v5180_v51 = vmul.f32 %v1344_v35, %v5124_v2  ;;  %v6455_v53 = vld [vmem:[#allocation58_spill] sm:$0xff] }
 0x1d2   : > { %6449 = vst [vmem:[#allocation50_spill] sm:$0xff] %v5172_v55  ;;  %v3793_v46 = vpop.eup %3792  ;;  %v1048_v33 = vmul.f32 0.5, %v6436_v41  ;;  %v1052_v49 = vmul.f32 0.5, %v6438_v45  ;;  %3806 = vtanh.f32 %v1694_v40  ;;  %v5185_v9 = vmul.f32 %v1346_v13, %v5131_v61  ;;  %v6454_v61 = vld [vmem:[#allocation23_spill] sm:$0xff] }
 0x1d3   : > { %6450 = vst [vmem:[#allocation48_spill] sm:$0xff] %v5177_v17  ;;  %6451 = vst [vmem:[#allocation59_spill] sm:$0xff] %v5180_v51  ;;  %v3795_v52 = vpop.eup %3794  ;;  %v1945_v58 = vadd.f32 1.0, %v3793_v46  ;;  %v1219_v62 = vmul.f32 0.044715, %v5164_v0  ;;  %v5189_v20 = vadd.f32 %v760_v39, %v4417_v29  ;;  %v5192_v35 = vmul.f32 0.5, %v6443_v16 }
 0x1d4   : > { %6452 = vst [vmem:[#allocation41_spill] sm:$0xff] %v5185_v9  ;;  %v1949_v23 = vadd.f32 1.0, %v3795_v52  ;;  %v5195_v41 = vmul.f32 0.5, %v6445_v43  ;;  %v1220_v45 = vmul.f32 0.044715, %v5172_v55  ;;  %v1345_v13 = vmul.f32 %v1217_v14, %v5156_v42  ;;  %v6453_v16 = vld [vmem:[#allocation56_spill] sm:$0xff] }
 0x1d5   : > { %v3797_v5 = vpop.eup %3796  ;;  %v2073_v57 = vmul.f32 %v1945_v58, %v5121_v44  ;;  %v1222_v40 = vmul.f32 0.044715, %v5177_v17  ;;  %v5202_v46 = vadd.f32 %v953_v37, %v4419_v30  ;;  %v1569_v51 = vadd.f32 %v6454_v61, %v6453_v16  ;;  %v764_v58 = vpop.f32.mrf.mxu0 }
 0x1d6   : > { %v3799_v39 = vpop.eup %3798  ;;  %v2077_v52 = vmul.f32 %v1949_v23, %v1053_v4  ;;  %v1947_v9 = vadd.f32 1.0, %v3797_v5  ;;  %v1573_v43 = vadd.f32 %v4879_v32, %v4802_v59  ;;  %v1347_v6 = vmul.f32 %v1219_v62, %v5164_v0 }
 0x1d7   : > { %v1951_v2 = vadd.f32 1.0, %v3799_v39  ;;  %v1221_v44 = vmul.f32 0.044715, %v5189_v20  ;;  %v5211_v14 = vmul.f32 0.5, %v6453_v16  ;;  %v1348_v31 = vmul.f32 %v1220_v45, %v5172_v55  ;;  %v6457_v39 = vld [vmem:[#allocation16_spill] sm:$0xff]  ;;  %v957_v45 = vpop.f32.mrf.mxu1 }
 0x1d8   : > { %v2441_v37 = vpack.c.bf16 %v2077_v52, %v2073_v57  ;;  %v1697_v4 = vmul.f32 0.7978846, %v1569_v51  ;;  %v1701_v23 = vmul.f32 0.7978846, %v1573_v43  ;;  %v2075_v47 = vmul.f32 %v1947_v9, %v1051_v19 }
 0x1d9   : > { %v3801_v5 = vpop.eup %3800  ;;  %v2079_v61 = vmul.f32 %v1951_v2, %v1055_v48  ;;  %v1571_v32 = vadd.f32 %v6456_v10, %v6455_v53  ;;  %v1575_v62 = vadd.f32 %v6457_v39, %v4805_v63  ;;  %v5219_v16 = vmul.f32 %v1345_v13, %v5156_v42  ;;  %v766_v48 = vpop.f32.mrf.mxu0 }
 0x1da   : > { %2815 = vmatprep.mubr.bf16.mxu0 %v2441_v37  ;;  %v1944_v8 = vadd.f32 1.0, %v3801_v5  ;;  %v1350_v57 = vmul.f32 %v1222_v40, %v5177_v17  ;;  %3808 = vtanh.f32 %v1697_v4  ;;  %v1349_v10 = vmul.f32 %v1221_v44, %v5189_v20  ;;  %v6461_v40 = vld [vmem:[#allocation53_spill] sm:$0xff]  ;;  %v6464_v5 = vld [vmem:[#allocation24_spill] sm:$0xff] }
 0x1db   : > { %6458 = vst [vmem:[#allocation52_spill] sm:$0xff] %v5219_v16  ;;  %v3803_v51 = vpop.eup %3802  ;;  %v2443_v52 = vpack.c.bf16 %v2079_v61, %v2075_v47  ;;  %3810 = vtanh.f32 %v1701_v23  ;;  %v1699_v19 = vmul.f32 0.7978846, %v1571_v32  ;;  %v1703_v2 = vmul.f32 0.7978846, %v1575_v62  ;;  %v6462_v4 = vld [vmem:[#allocation65_spill] sm:$0xff]  ;;  %v768_v42 = vpop.f32.mrf.mxu0 }
 0x1dc   : > { %v1948_v9 = vadd.f32 1.0, %v3803_v51  ;;  %v1223_v43 = vmul.f32 0.044715, %v5202_v46  ;;  %v5225_v37 = vadd.f32 %v764_v58, %v4413_v25  ;;  %v5228_v13 = vadd.f32 %v957_v45, %v4415_v26  ;;  %v6463_v23 = vld [vmem:[#allocation61_spill] sm:$0xff]  ;;  %v959_v58 = vpop.f32.mrf.mxu1 }
 0x1dd   : > { %2976 = vmatprep.mubr.bf16.mxu1 %v2443_v52  ;;  %3812 = vtanh.f32 %v1699_v19  ;;  %v1568_v47 = vadd.f32 %v6462_v4, %v6461_v40  ;;  %v1572_v61 = vadd.f32 %v6464_v5, %v6463_v23  ;;  %v2072_v39 = vmul.f32 %v1944_v8, %v1048_v33 }
 0x1de   : > { %6459 = vst [vmem:[#allocation49_spill] sm:$0xff] %v5225_v37  ;;  %6460 = vst [vmem:[#allocation60_spill] sm:$0xff] %v5228_v13  ;;  %v3805_v32 = vpop.eup %3804  ;;  %v2076_v62 = vmul.f32 %v1948_v9, %v1052_v49  ;;  %v5235_v44 = vmul.f32 %v1347_v6, %v5164_v0  ;;  %3814 = vtanh.f32 %v1703_v2  ;;  %v5238_v19 = vmul.f32 %v1348_v31, %v5172_v55  ;;  %v6466_v49 = vld [vmem:[#allocation54_spill] sm:$0xff] }
 0x1df   : > { %v3807_v51 = vpop.eup %3806  ;;  %v1946_v52 = vadd.f32 1.0, %v3805_v32  ;;  %v1696_v45 = vmul.f32 0.7978846, %v1568_v47  ;;  %v1700_v16 = vmul.f32 0.7978846, %v1572_v61  ;;  %v1351_v5 = vmul.f32 %v1223_v43, %v5202_v46  ;;  %v6467_v2 = vld [vmem:[#allocation66_spill] sm:$0xff]  ;;  %v961_v43 = vpop.f32.mrf.mxu1 }
 0x1e0   : > { %6465 = vst [vmem:[#allocation56_spill] sm:$0xff] %v5238_v19  ;;  %v2440_v4 = vpack.c.bf16 %v2076_v62, %v2072_v39  ;;  %v1950_v27 = vadd.f32 1.0, %v3807_v51  ;;  %v1224_v8 = vmul.f32 0.044715, %v5225_v37  ;;  %v1226_v6 = vmul.f32 0.044715, %v5228_v13 }
 0x1e1   : > { %v2074_v33 = vmul.f32 %v1946_v52, %v5192_v35  ;;  %3816 = vtanh.f32 %v1696_v45  ;;  %v1570_v9 = vadd.f32 %v6467_v2, %v6466_v49  ;;  %v6468_v47 = vld [vmem:[#allocation63_spill] sm:$0xff]  ;;  %v6469_v61 = vld [vmem:[#allocation34_spill] sm:$0xff]  ;;  %v5250_v39 = vadd.f32 %v766_v48, %v4417_v29  ;;  %v770_v45 = vpop.f32.mrf.mxu0 }
 0x1e2   : > { %2816 = vmatmul.mubr.bf16.gmra.mxu0 %v2440_v4  ;;  %v2078_v31 = vmul.f32 %v1950_v27, %v5195_v41  ;;  %3818 = vtanh.f32 %v1700_v16  ;;  %v1574_v32 = vadd.f32 %v6469_v61, %v6468_v47  ;;  %v5253_v62 = vmul.f32 %v1350_v57, %v5177_v17  ;;  %v6476_v19 = vld [vmem:[#allocation31_spill] sm:$0xff] }
 0x1e3   : > { %v5256_v35 = vmul.f32 %v1349_v10, %v5189_v20  ;;  %v1061_v51 = vmul.f32 0.5, %v4802_v59  ;;  %v1698_v52 = vmul.f32 0.7978846, %v1570_v9  ;;  %v5260_v41 = vadd.f32 %v959_v58, %v4419_v30 }
 0x1e4   : > { %6470 = vst [vmem:[#allocation23_spill] sm:$0xff] %v5253_v62  ;;  %v2442_v4 = vpack.c.bf16 %v2078_v31, %v2074_v33  ;;  %v1702_v27 = vmul.f32 0.7978846, %v1574_v32  ;;  %v5263_v16 = vadd.f32 %v768_v42, %v4413_v25  ;;  %v1352_v48 = vmul.f32 %v1224_v8, %v5225_v37 }
 0x1e5   : > { %v1354_v57 = vmul.f32 %v1226_v6, %v5228_v13  ;;  %3820 = vtanh.f32 %v1698_v52  ;;  %v5268_v10 = vadd.f32 %v961_v43, %v4415_v26  ;;  %v5271_v59 = vmul.f32 %v1351_v5, %v5202_v46 }
 0x1e6   : > { %6471 = vst [vmem:[#allocation58_spill] sm:$0xff] %v5263_v16  ;;  %2977 = vmatmul.mubr.bf16.gmra.mxu1 %v2442_v4  ;;  %3822 = vtanh.f32 %v1702_v27  ;;  %v1225_v33 = vmul.f32 0.044715, %v5250_v39  ;;  %v5275_v58 = vadd.f32 %v770_v45, %v4417_v29  ;;  %v1059_v2 = vmul.f32 0.5, %v6455_v53 }
 0x1e7   : > { %6472 = vst [vmem:[#allocation30_spill] sm:$0xff] %v5268_v10  ;;  %v3809_v42 = vpop.eup %3808  ;;  %v1063_v8 = vmul.f32 0.5, %v4805_v63  ;;  %v1056_v6 = vmul.f32 0.5, %v6461_v40  ;;  %v1060_v9 = vmul.f32 0.5, %v6463_v23  ;;  %v5282_v5 = vmul.f32 0.5, %v6466_v49  ;;  %v963_v40 = vpop.f32.mrf.mxu1 }
 0x1e8   : > { %v3811_v31 = vpop.eup %3810  ;;  %v1953_v61 = vadd.f32 1.0, %v3809_v42  ;;  %v1227_v32 = vmul.f32 0.044715, %v5260_v41  ;;  %v1228_v43 = vmul.f32 0.044715, %v5263_v16  ;;  %v5287_v45 = vmul.f32 %v1352_v48, %v5225_v37 }
 0x1e9   : > { %v1957_v52 = vadd.f32 1.0, %v3811_v31  ;;  %v5290_v53 = vmul.f32 %v1354_v57, %v5228_v13  ;;  %v1230_v63 = vmul.f32 0.044715, %v5268_v10  ;;  %v1062_v49 = vmul.f32 0.5, %v6468_v47 }
 0x1ea   : > { %6473 = vst [vmem:[#allocation16_spill] sm:$0xff] %v5287_v45  ;;  %v3813_v23 = vpop.eup %3812  ;;  %v2081_v4 = vmul.f32 %v1953_v61, %v5211_v14  ;;  %v1353_v27 = vmul.f32 %v1225_v33, %v5250_v39  ;;  %v1229_v42 = vmul.f32 0.044715, %v5275_v58  ;;  %v1577_v48 = vadd.f32 %v4926_v18, %v4854_v28  ;;  %v774_v33 = vpop.f32.mrf.mxu0 }
 0x1eb   : > { %6474 = vst [vmem:[#allocation53_spill] sm:$0xff] %v5290_v53  ;;  %v3815_v62 = vpop.eup %3814  ;;  %v2085_v31 = vmul.f32 %v1957_v52, %v1061_v51  ;;  %v1955_v17 = vadd.f32 1.0, %v3813_v23  ;;  %v1581_v57 = vadd.f32 %v4965_v11, %v4907_v24  ;;  %v1355_v13 = vmul.f32 %v1227_v32, %v5260_v41  ;;  %v967_v32 = vpop.f32.mrf.mxu1 }
 0x1ec   : > { %v1959_v53 = vadd.f32 1.0, %v3815_v62  ;;  %v1356_v14 = vmul.f32 %v1228_v43, %v5263_v16  ;;  %v5304_v47 = vadd.f32 %v963_v40, %v4419_v30  ;;  %v1358_v45 = vmul.f32 %v1230_v63, %v5268_v10 }
 0x1ed   : > { %v2445_v61 = vpack.c.bf16 %v2085_v31, %v2081_v4  ;;  %v1705_v51 = vmul.f32 0.7978846, %v1577_v48  ;;  %v1709_v52 = vmul.f32 0.7978846, %v1581_v57  ;;  %v2083_v37 = vmul.f32 %v1955_v17, %v1059_v2  ;;  %v6479_v57 = vld [vmem:[#allocation33_spill] sm:$0xff] }
 0x1ee   : > { %6475 = vst [vmem:[#allocation65_spill] sm:$0xff] %v5304_v47  ;;  %v3817_v23 = vpop.eup %3816  ;;  %v2087_v18 = vmul.f32 %v1959_v53, %v1063_v8  ;;  %v1579_v11 = vadd.f32 %v6476_v19, %v4857_v36  ;;  %v1583_v62 = vadd.f32 %v4972_v15, %v4917_v1  ;;  %v5312_v55 = vmul.f32 0.5, %v4854_v28 }
 0x1ef   : > { %v3819_v43 = vpop.eup %3818  ;;  %2823 = vmatprep.mubr.bf16.mxu0 %v2445_v61  ;;  %v1952_v40 = vadd.f32 1.0, %v3817_v23  ;;  %3824 = vtanh.f32 %v1705_v51  ;;  %v5315_v63 = vadd.f32 %v774_v33, %v4413_v25  ;;  %v5318_v19 = vmul.f32 %v1353_v27, %v5250_v39  ;;  %v6480_v33 = vld [vmem:[#allocation18_spill] sm:$0xff]  ;;  %v776_v61 = vpop.f32.mrf.mxu0 }
 0x1f0   : > { %v2447_v4 = vpack.c.bf16 %v2087_v18, %v2083_v37  ;;  %v1956_v17 = vadd.f32 1.0, %v3819_v43  ;;  %3826 = vtanh.f32 %v1709_v52  ;;  %v1707_v2 = vmul.f32 0.7978846, %v1579_v11 }
 0x1f1   : > { %6477 = vst [vmem:[#allocation61_spill] sm:$0xff] %v5315_v63  ;;  %v1231_v15 = vmul.f32 0.044715, %v5304_v47  ;;  %v1711_v8 = vmul.f32 0.7978846, %v1583_v62  ;;  %v5322_v53 = vadd.f32 %v967_v32, %v4415_v26  ;;  %v2080_v28 = vmul.f32 %v1952_v40, %v1056_v6  ;;  %v969_v6 = vpop.f32.mrf.mxu1 }
 0x1f2   : > { %v3821_v31 = vpop.eup %3820  ;;  %2984 = vmatprep.mubr.bf16.mxu1 %v2447_v4  ;;  %v2084_v48 = vmul.f32 %v1956_v17, %v1060_v9  ;;  %3828 = vtanh.f32 %v1707_v2  ;;  %v1576_v37 = vadd.f32 %v6480_v33, %v6479_v57  ;;  %v1357_v27 = vmul.f32 %v1229_v42, %v5275_v58 }
 0x1f3   : > { %6478 = vst [vmem:[#allocation24_spill] sm:$0xff] %v5322_v53  ;;  %v3823_v51 = vpop.eup %3822  ;;  %v1954_v52 = vadd.f32 1.0, %v3821_v31  ;;  %3830 = vtanh.f32 %v1711_v8  ;;  %v1232_v23 = vmul.f32 0.044715, %v5315_v63  ;;  %v1580_v62 = vadd.f32 %v4947_v34, %v4866_v56  ;;  %v778_v8 = vpop.f32.mrf.mxu0  ;;  %v6484_v31 = vld [vmem:[#allocation20_spill] sm:$0xff] }
 0x1f4   : > { %v2444_v18 = vpack.c.bf16 %v2084_v48, %v2080_v28  ;;  %v1958_v11 = vadd.f32 1.0, %v3823_v51  ;;  %v1704_v32 = vmul.f32 0.7978846, %v1576_v37  ;;  %v5331_v9 = vmul.f32 %v1355_v13, %v5260_v41  ;;  %v6485_v13 = vld [vmem:[#allocation17_spill] sm:$0xff] }
 0x1f5   : > { %v5334_v43 = vmul.f32 %v1356_v14, %v5263_v16  ;;  %v1359_v40 = vmul.f32 %v1231_v15, %v5304_v47  ;;  %v1234_v42 = vmul.f32 0.044715, %v5322_v53  ;;  %v2082_v4 = vmul.f32 %v1954_v52, %v5282_v5  ;;  %v6486_v14 = vld [vmem:[#allocation19_spill] sm:$0xff] }
 0x1f6   : > { %6481 = vst [vmem:[#allocation54_spill] sm:$0xff] %v5331_v9  ;;  %2824 = vmatmul.mubr.bf16.gmra.mxu0 %v2444_v18  ;;  %v2086_v17 = vmul.f32 %v1958_v11, %v1062_v49  ;;  %v1708_v2 = vmul.f32 0.7978846, %v1580_v62  ;;  %3832 = vtanh.f32 %v1704_v32  ;;  %v5340_v34 = vmul.f32 %v1358_v45, %v5268_v10  ;;  %v971_v49 = vpop.f32.mrf.mxu1  ;;  %v6493_v10 = vld [vmem:[#allocation25_spill] sm:$0xff] }
 0x1f7   : > { %6482 = vst [vmem:[#allocation66_spill] sm:$0xff] %v5334_v43  ;;  %v1578_v28 = vadd.f32 %v6485_v13, %v6484_v31  ;;  %v1582_v48 = vadd.f32 %v6486_v14, %v4873_v60  ;;  %v5347_v15 = vadd.f32 %v776_v61, %v4417_v29  ;;  %v5350_v37 = vmul.f32 %v1357_v27, %v5275_v58 }
 0x1f8   : > { %6483 = vst [vmem:[#allocation63_spill] sm:$0xff] %v5340_v34  ;;  %v2446_v33 = vpack.c.bf16 %v2086_v17, %v2082_v4  ;;  %v1360_v5 = vmul.f32 %v1232_v23, %v5315_v63  ;;  %3834 = vtanh.f32 %v1708_v2  ;;  %v1362_v45 = vmul.f32 %v1234_v42, %v5322_v53  ;;  %v780_v23 = vpop.f32.mrf.mxu0  ;;  %v973_v17 = vpop.f32.mrf.mxu1  ;;  %v6492_v34 = vld [vmem:[#allocation26_spill] sm:$0xff] }
 0x1f9   : > { %v1706_v51 = vmul.f32 0.7978846, %v1578_v28  ;;  %v1710_v52 = vmul.f32 0.7978846, %v1582_v48  ;;  %v5355_v18 = vadd.f32 %v969_v6, %v4419_v30  ;;  %v5358_v11 = vmul.f32 %v1359_v40, %v5304_v47 }
 0x1fa   : > { %2985 = vmatmul.mubr.bf16.gmra.mxu1 %v2446_v33  ;;  %v1069_v61 = vmul.f32 0.5, %v4907_v24  ;;  %v1067_v27 = vmul.f32 0.5, %v4857_v36  ;;  %v5363_v62 = vadd.f32 %v778_v8, %v4413_v25  ;;  %v1071_v32 = vmul.f32 0.5, %v4917_v1 }
 0x1fb   : > { %6487 = vst [vmem:[#allocation34_spill] sm:$0xff] %v5358_v11  ;;  %3836 = vtanh.f32 %v1706_v51  ;;  %v1233_v42 = vmul.f32 0.044715, %v5347_v15  ;;  %v5368_v6 = vadd.f32 %v971_v49, %v4415_v26  ;;  %v5371_v40 = vmul.f32 %v1360_v5, %v5315_v63  ;;  %v6491_v63 = vld [vmem:[#allocation29_spill] sm:$0xff] }
 0x1fc   : > { %v3825_v4 = vpop.eup %3824  ;;  %v1064_v24 = vmul.f32 0.5, %v6479_v57  ;;  %v1068_v36 = vmul.f32 0.5, %v4866_v56  ;;  %3838 = vtanh.f32 %v1710_v52  ;;  %v5376_v1 = vmul.f32 %v1362_v45, %v5322_v53 }
 0x1fd   : > { %6488 = vst [vmem:[#allocation31_spill] sm:$0xff] %v5368_v6  ;;  %6489 = vst [vmem:[#allocation33_spill] sm:$0xff] %v5371_v40  ;;  %v3827_v2 = vpop.eup %3826  ;;  %v1961_v8 = vadd.f32 1.0, %v3825_v4  ;;  %v1235_v13 = vmul.f32 0.044715, %v5355_v18  ;;  %v5380_v28 = vadd.f32 %v780_v23, %v4417_v29  ;;  %v5383_v48 = vmul.f32 0.5, %v6484_v31 }
 0x1fe   : > { %6490 = vst [vmem:[#allocation18_spill] sm:$0xff] %v5376_v1  ;;  %v1965_v14 = vadd.f32 1.0, %v3827_v2  ;;  %v5386_v57 = vmul.f32 0.5, %v4873_v60  ;;  %v1236_v56 = vmul.f32 0.044715, %v5363_v62  ;;  %v1361_v49 = vmul.f32 %v1233_v42, %v5347_v15  ;;  %v784_v2 = vpop.f32.mrf.mxu0 }
 0x1ff   : > { %v3829_v33 = vpop.eup %3828  ;;  %v2089_v5 = vmul.f32 %v1961_v8, %v5312_v55  ;;  %v1238_v45 = vmul.f32 0.044715, %v5368_v6  ;;  %v5393_v51 = vadd.f32 %v973_v17, %v4419_v30  ;;  %v1585_v31 = vadd.f32 %v5028_v50, %v4969_v3  ;;  %v977_v17 = vpop.f32.mrf.mxu1 }
 0x200   : > { %v3831_v52 = vpop.eup %3830  ;;  %v2093_v23 = vmul.f32 %v1965_v14, %v1069_v61  ;;  %v1963_v4 = vadd.f32 1.0, %v3829_v33  ;;  %v1589_v60 = vadd.f32 %v5064_v38, %v4997_v22  ;;  %v5400_v55 = vmul.f32 %v1235_v13, %v5355_v18 }
 0x201   : > { %v1967_v1 = vadd.f32 1.0, %v3831_v52  ;;  %v1237_v42 = vmul.f32 0.044715, %v5380_v28  ;;  %v5404_v8 = vmul.f32 0.5, %v4969_v3  ;;  %v1713_v14 = vmul.f32 0.7978846, %v1585_v31 }
 0x202   : > { %v2449_v53 = vpack.c.bf16 %v2093_v23, %v2089_v5  ;;  %v2091_v61 = vmul.f32 %v1963_v4, %v1067_v27  ;;  %v1717_v33 = vmul.f32 0.7978846, %v1589_v60  ;;  %v1587_v38 = vadd.f32 %v6492_v34, %v6491_v63  ;;  %v6494_v52 = vld [vmem:[#allocation47_spill] sm:$0xff] }
 0x203   : > { %v3833_v40 = vpop.eup %3832  ;;  %v2095_v50 = vmul.f32 %v1967_v1, %v1071_v32  ;;  %v1591_v43 = vadd.f32 %v6494_v52, %v6493_v10  ;;  %v5411_v13 = vadd.f32 %v784_v2, %v4413_v25  ;;  %v1239_v3 = vmul.f32 0.044715, %v5393_v51  ;;  %v6498_v2 = vld [vmem:[#allocation27_spill] sm:$0xff]  ;;  %v6500_v52 = vld [vmem:[#allocation37_spill] sm:$0xff] }
 0x204   : > { %2831 = vmatprep.mubr.bf16.mxu0 %v2449_v53  ;;  %v1960_v16 = vadd.f32 1.0, %v3833_v40  ;;  %3840 = vtanh.f32 %v1713_v14  ;;  %v5415_v27 = vadd.f32 %v977_v17, %v4415_v26  ;;  %v1715_v32 = vmul.f32 0.7978846, %v1587_v38  ;;  %v6497_v40 = vld [vmem:[#allocation28_spill] sm:$0xff]  ;;  %v6499_v17 = vld [vmem:[#allocation22_spill] sm:$0xff] }
 0x205   : > { %6495 = vst [vmem:[#allocation20_spill] sm:$0xff] %v5411_v13  ;;  %v3835_v5 = vpop.eup %3834  ;;  %v2451_v23 = vpack.c.bf16 %v2095_v50, %v2091_v61  ;;  %3842 = vtanh.f32 %v1717_v33  ;;  %v1719_v1 = vmul.f32 0.7978846, %v1591_v43  ;;  %v1364_v4 = vmul.f32 %v1236_v56, %v5363_v62  ;;  %v786_v61 = vpop.f32.mrf.mxu0 }
 0x206   : > { %6496 = vst [vmem:[#allocation17_spill] sm:$0xff] %v5415_v27  ;;  %v1964_v34 = vadd.f32 1.0, %v3835_v5  ;;  %v1240_v31 = vmul.f32 0.044715, %v5411_v13  ;;  %v1242_v60 = vmul.f32 0.044715, %v5415_v27  ;;  %v2088_v53 = vmul.f32 %v1960_v16, %v1064_v24 }
 0x207   : > { %2992 = vmatprep.mubr.bf16.mxu1 %v2451_v23  ;;  %3844 = vtanh.f32 %v1715_v32  ;;  %v1584_v14 = vadd.f32 %v6498_v2, %v6497_v40  ;;  %v1588_v11 = vadd.f32 %v6500_v52, %v6499_v17  ;;  %v1366_v23 = vmul.f32 %v1238_v45, %v5368_v6  ;;  %v979_v32 = vpop.f32.mrf.mxu1 }
 0x208   : > { %v3837_v33 = vpop.eup %3836  ;;  %v2092_v50 = vmul.f32 %v1964_v34, %v1068_v36  ;;  %3846 = vtanh.f32 %v1719_v1  ;;  %v1368_v43 = vmul.f32 %v1240_v31, %v5411_v13  ;;  %v1370_v56 = vmul.f32 %v1242_v60, %v5415_v27  ;;  %v6501_v34 = vld [vmem:[#allocation21_spill] sm:$0xff]  ;;  %v6502_v31 = vld [vmem:[#allocation38_spill] sm:$0xff] }
 0x209   : > { %v3839_v38 = vpop.eup %3838  ;;  %v1962_v5 = vadd.f32 1.0, %v3837_v33  ;;  %v1712_v16 = vmul.f32 0.7978846, %v1584_v14  ;;  %v1716_v24 = vmul.f32 0.7978846, %v1588_v11  ;;  %v5428_v9 = vmul.f32 %v1361_v49, %v5347_v15  ;;  %v788_v33 = vpop.f32.mrf.mxu0  ;;  %v6503_v49 = vld [vmem:[#allocation32_spill] sm:$0xff] }
 0x20a   : > { %v2448_v47 = vpack.c.bf16 %v2092_v50, %v2088_v53  ;;  %v1966_v2 = vadd.f32 1.0, %v3839_v38  ;;  %v1365_v52 = vmul.f32 %v1237_v42, %v5380_v28  ;;  %v1367_v36 = vmul.f32 %v1239_v3, %v5393_v51  ;;  %v6504_v14 = vld [vmem:[#allocation44_spill] sm:$0xff]  ;;  %v981_v38 = vpop.f32.mrf.mxu1 }
 0x20b   : > { %v1496_v1 = vmul.f32 %v1368_v43, %v5411_v13  ;;  %3848 = vtanh.f32 %v1712_v16  ;;  %v1586_v60 = vadd.f32 %v6502_v31, %v6501_v34  ;;  %v2090_v11 = vmul.f32 %v1962_v5, %v5383_v48 }
 0x20c   : > { %2832 = vmatmul.mubr.bf16.gmra.mxu0 %v2448_v47  ;;  %v2094_v45 = vmul.f32 %v1966_v2, %v5386_v57  ;;  %v1498_v53 = vmul.f32 %v1370_v56, %v5415_v27  ;;  %3850 = vtanh.f32 %v1716_v24  ;;  %v1590_v42 = vadd.f32 %v6504_v14, %v6503_v49 }
 0x20d   : > { %v1714_v50 = vmul.f32 0.7978846, %v1586_v60  ;;  %v5441_v3 = vadd.f32 %v786_v61, %v4417_v29  ;;  %v5444_v43 = vadd.f32 %v979_v32, %v4419_v30  ;;  %v5448_v47 = vmul.f32 %v5400_v55, %v5355_v18 }
 0x20e   : > { %v2450_v16 = vpack.c.bf16 %v2094_v45, %v2090_v11  ;;  %v5451_v48 = vmul.f32 %v1364_v4, %v5363_v62  ;;  %v5454_v57 = vadd.f32 %v788_v33, %v4413_v25  ;;  %v5457_v56 = vmul.f32 %v1366_v23, %v5368_v6 }
 0x20f   : > { %6505 = vst [vmem:[#allocation19_spill] sm:$0xff] %v5441_v3  ;;  %6506 = vst [vmem:[#allocation29_spill] sm:$0xff] %v5444_v43  ;;  %v1624_v61 = vadd.f32 %v1496_v1, %v5411_v13  ;;  %v1718_v5 = vmul.f32 0.7978846, %v1590_v42  ;;  %3852 = vtanh.f32 %v1714_v50  ;;  %v5461_v24 = vmul.f32 %v1365_v52, %v5380_v28  ;;  %v790_v50 = vpop.f32.mrf.mxu0 }
 0x210   : > { %6507 = vst [vmem:[#allocation26_spill] sm:$0xff] %v5451_v48  ;;  %6508 = vst [vmem:[#allocation25_spill] sm:$0xff] %v5454_v57  ;;  %2993 = vmatmul.mubr.bf16.gmra.mxu1 %v2450_v16  ;;  %v1626_v55 = vadd.f32 %v1498_v53, %v5415_v27  ;;  %v1241_v32 = vmul.f32 0.044715, %v5441_v3  ;;  %v5466_v4 = vadd.f32 %v981_v38, %v4415_v26  ;;  %v1077_v23 = vmul.f32 0.5, %v4997_v22  ;;  %v6527_v48 = vld [vmem:[#allocation51_spill] sm:$0xff] }
 0x211   : > { %6509 = vst [vmem:[#allocation47_spill] sm:$0xff] %v5457_v56  ;;  %v3841_v2 = vpop.eup %3840  ;;  %v5469_v31 = vmul.f32 %v1367_v36, %v5393_v51  ;;  %v1075_v1 = vmul.f32 0.5, %v6491_v63  ;;  %v1243_v60 = vmul.f32 0.044715, %v5444_v43  ;;  %v1079_v11 = vmul.f32 0.5, %v6493_v10  ;;  %v983_v10 = vpop.f32.mrf.mxu1 }
 0x212   : > { %6510 = vst [vmem:[#allocation28_spill] sm:$0xff] %v5466_v4  ;;  %v3843_v33 = vpop.eup %3842  ;;  %v1969_v52 = vadd.f32 1.0, %v3841_v2  ;;  %3854 = vtanh.f32 %v1718_v5  ;;  %v1244_v45 = vmul.f32 0.044715, %v5454_v57  ;;  %v1752_v14 = vmul.f32 0.7978846, %v1624_v61 }
 0x213   : > { %v1973_v53 = vadd.f32 1.0, %v3843_v33  ;;  %v1072_v42 = vmul.f32 0.5, %v6497_v40  ;;  %v1246_v36 = vmul.f32 0.044715, %v5466_v4  ;;  %v1754_v22 = vmul.f32 0.7978846, %v1626_v55 }
 0x214   : > { %v3845_v38 = vpop.eup %3844  ;;  %v1076_v63 = vmul.f32 0.5, %v6499_v17  ;;  %v5480_v16 = vmul.f32 0.5, %v6501_v34  ;;  %v1369_v2 = vmul.f32 %v1241_v32, %v5441_v3  ;;  %v2097_v27 = vmul.f32 %v1969_v52, %v5404_v8 }
 0x215   : > { %v3847_v5 = vpop.eup %3846  ;;  %v2101_v33 = vmul.f32 %v1973_v53, %v1077_v23  ;;  %v1971_v61 = vadd.f32 1.0, %v3845_v38  ;;  %v1371_v40 = vmul.f32 %v1243_v60, %v5444_v43  ;;  %v1078_v56 = vmul.f32 0.5, %v6503_v49  ;;  %v987_v38 = vpop.f32.mrf.mxu1 }
 0x216   : > { %v1975_v13 = vadd.f32 1.0, %v3847_v5  ;;  %v1372_v55 = vmul.f32 %v1244_v45, %v5454_v57  ;;  %v5488_v17 = vadd.f32 %v790_v50, %v4417_v29  ;;  %3856 = vtanh.f32 %v1752_v14 }
 0x217   : > { %v2453_v34 = vpack.c.bf16 %v2101_v33, %v2097_v27  ;;  %v1374_v32 = vmul.f32 %v1246_v36, %v5466_v4  ;;  %v5492_v6 = vadd.f32 %v983_v10, %v4419_v30  ;;  %v2099_v23 = vmul.f32 %v1971_v61, %v1075_v1 }
 0x218   : > { %v3849_v8 = vpop.eup %3848  ;;  %v2103_v52 = vmul.f32 %v1975_v13, %v1079_v11  ;;  %3858 = vtanh.f32 %v1754_v22  ;;  %v5495_v60 = vmul.f32 %v1369_v2, %v5441_v3  ;;  %v5498_v53 = vmul.f32 %v1371_v40, %v5444_v43  ;;  %v794_v11 = vpop.f32.mrf.mxu0  ;;  %v6513_v40 = vld [vmem:[#allocation35_spill] sm:$0xff] }
 0x219   : > { %v3851_v49 = vpop.eup %3850  ;;  %2839 = vmatprep.mubr.bf16.mxu0 %v2453_v34  ;;  %v1968_v45 = vadd.f32 1.0, %v3849_v8  ;;  %v1593_v27 = vadd.f32 %v5127_v7, %v5061_v21  ;;  %v1597_v14 = vadd.f32 %v5159_v54, %v5082_v12  ;;  %v1500_v13 = vmul.f32 %v1372_v55, %v5454_v57  ;;  %v6514_v54 = vld [vmem:[#allocation46_spill] sm:$0xff]  ;;  %v6523_v43 = vld [vmem:[#allocation43_spill] sm:$0xff] }
 0x21a   : > { %6511 = vst [vmem:[#allocation27_spill] sm:$0xff] %v5495_v60  ;;  %6512 = vst [vmem:[#allocation22_spill] sm:$0xff] %v5498_v53  ;;  %v2455_v36 = vpack.c.bf16 %v2103_v52, %v2099_v23  ;;  %v1972_v50 = vadd.f32 1.0, %v3851_v49  ;;  %v1245_v1 = vmul.f32 0.044715, %v5488_v17  ;;  %v1502_v22 = vmul.f32 %v1374_v32, %v5466_v4  ;;  %v6515_v8 = vld [vmem:[#allocation42_spill] sm:$0xff] }
 0x21b   : > { %v1247_v2 = vmul.f32 0.044715, %v5492_v6  ;;  %v1721_v10 = vmul.f32 0.7978846, %v1593_v27  ;;  %v1725_v5 = vmul.f32 0.7978846, %v1597_v14  ;;  %v2096_v7 = vmul.f32 %v1968_v45, %v1072_v42 }
 0x21c   : > { %v3853_v33 = vpop.eup %3852  ;;  %3000 = vmatprep.mubr.bf16.mxu1 %v2455_v36  ;;  %v2100_v61 = vmul.f32 %v1972_v50, %v1076_v63  ;;  %v1595_v34 = vadd.f32 %v6514_v54, %v6513_v40  ;;  %v6516_v23 = vld [vmem:[#allocation40_spill] sm:$0xff]  ;;  %v5513_v49 = vadd.f32 %v794_v11, %v4413_v25  ;;  %v5516_v32 = vadd.f32 %v987_v38, %v4415_v26 }
 0x21d   : > { %v1599_v55 = vadd.f32 %v6516_v23, %v6515_v8  ;;  %v1970_v52 = vadd.f32 1.0, %v3853_v33  ;;  %3860 = vtanh.f32 %v1721_v10  ;;  %v1628_v63 = vadd.f32 %v1500_v13, %v5454_v57  ;;  %v796_v10 = vpop.f32.mrf.mxu0  ;;  %v6519_v38 = vld [vmem:[#allocation36_spill] sm:$0xff]  ;;  %v6522_v23 = vld [vmem:[#allocation57_spill] sm:$0xff] }
 0x21e   : > { %6517 = vst [vmem:[#allocation37_spill] sm:$0xff] %v5513_v49  ;;  %6518 = vst [vmem:[#allocation21_spill] sm:$0xff] %v5516_v32  ;;  %v2452_v27 = vpack.c.bf16 %v2100_v61, %v2096_v7  ;;  %3862 = vtanh.f32 %v1725_v5  ;;  %v1723_v14 = vmul.f32 0.7978846, %v1595_v34  ;;  %v1373_v45 = vmul.f32 %v1245_v1, %v5488_v17  ;;  %v6520_v7 = vld [vmem:[#allocation67_spill] sm:$0xff]  ;;  %v989_v61 = vpop.f32.mrf.mxu1  ;;  %v6521_v1 = vld [vmem:[#allocation45_spill] sm:$0xff] }
 0x21f   : > { %v1727_v36 = vmul.f32 0.7978846, %v1599_v55  ;;  %v3855_v42 = vpop.eup %3854  ;;  %v1248_v50 = vmul.f32 0.044715, %v5513_v49  ;;  %v1250_v33 = vmul.f32 0.044715, %v5516_v32  ;;  %v1375_v54 = vmul.f32 %v1247_v2, %v5492_v6 }
 0x220   : > { %2840 = vmatmul.mubr.bf16.gmra.mxu0 %v2452_v27  ;;  %v1974_v11 = vadd.f32 1.0, %v3855_v42  ;;  %3864 = vtanh.f32 %v1723_v14  ;;  %v1592_v5 = vadd.f32 %v6520_v7, %v6519_v38  ;;  %v1596_v55 = vadd.f32 %v6522_v23, %v6521_v1  ;;  %v6526_v23 = vld [vmem:[#allocation39_spill] sm:$0xff] }
 0x221   : > { %3866 = vtanh.f32 %v1727_v36  ;;  %v1376_v34 = vmul.f32 %v1248_v50, %v5513_v49  ;;  %v1378_v13 = vmul.f32 %v1250_v33, %v5516_v32  ;;  %v2098_v57 = vmul.f32 %v1970_v52, %v5480_v16  ;;  %v6524_v36 = vld [vmem:[#allocation68_spill] sm:$0xff]  ;;  %v798_v50 = vpop.f32.mrf.mxu0 }
 0x222   : > { %v2102_v53 = vmul.f32 %v1974_v11, %v1078_v56  ;;  %v1630_v27 = vadd.f32 %v1502_v22, %v5466_v4  ;;  %v1720_v42 = vmul.f32 0.7978846, %v1592_v5  ;;  %v1724_v7 = vmul.f32 0.7978846, %v1596_v55  ;;  %v991_v22 = vpop.f32.mrf.mxu1 }
 0x223   : > { %v1504_v2 = vmul.f32 %v1376_v34, %v5513_v49  ;;  %v1506_v14 = vmul.f32 %v1378_v13, %v5516_v32  ;;  %v1594_v60 = vadd.f32 %v6524_v36, %v6523_v43  ;;  %v5535_v3 = vpop.eup %3856  ;;  %v1598_v16 = vadd.f32 %v6527_v48, %v6526_v23 }
 0x224   : > { %6525 = vst [vmem:[#allocation38_spill] sm:$0xff] %v5535_v3  ;;  %v2454_v33 = vpack.c.bf16 %v2102_v53, %v2098_v57  ;;  %3868 = vtanh.f32 %v1720_v42  ;;  %v5540_v56 = vadd.f32 %v796_v10, %v4417_v29  ;;  %v1756_v11 = vmul.f32 0.7978846, %v1628_v63 }
 0x225   : > { %v5542_v52 = vpop.eup %3858  ;;  %v1632_v5 = vadd.f32 %v1504_v2, %v5513_v49  ;;  %3870 = vtanh.f32 %v1724_v7  ;;  %v1722_v34 = vmul.f32 0.7978846, %v1594_v60  ;;  %v1758_v13 = vmul.f32 0.7978846, %v1630_v27 }
 0x226   : > { %6528 = vst [vmem:[#allocation32_spill] sm:$0xff] %v5542_v52  ;;  %3001 = vmatmul.mubr.bf16.gmra.mxu1 %v2454_v33  ;;  %v1726_v55 = vmul.f32 0.7978846, %v1598_v16  ;;  %v5546_v57 = vadd.f32 %v989_v61, %v4419_v30  ;;  %v5549_v53 = vadd.f32 %v798_v50, %v4413_v25  ;;  %v1081_v48 = vmul.f32 0.5, %v5061_v21  ;;  %v6533_v52 = vld [vmem:[#allocation52_spill] sm:$0xff] }
 0x227   : > { %v1634_v10 = vadd.f32 %v1506_v14, %v5516_v32  ;;  %3872 = vtanh.f32 %v1722_v34  ;;  %v5554_v63 = vadd.f32 %v991_v22, %v4415_v26  ;;  %v5557_v42 = vmul.f32 %v1373_v45, %v5488_v17  ;;  %v800_v14 = vpop.f32.mrf.mxu0 }
 0x228   : > { %6529 = vst [vmem:[#allocation44_spill] sm:$0xff] %v5549_v53  ;;  %v1085_v60 = vmul.f32 0.5, %v5082_v12  ;;  %3874 = vtanh.f32 %v1726_v55  ;;  %v1249_v61 = vmul.f32 0.044715, %v5540_v56  ;;  %v5562_v27 = vmul.f32 %v1375_v54, %v5492_v6  ;;  %v993_v12 = vpop.f32.mrf.mxu1 }
 0x229   : > { %6530 = vst [vmem:[#allocation35_spill] sm:$0xff] %v5554_v63  ;;  %3876 = vtanh.f32 %v1756_v11  ;;  %v1760_v2 = vmul.f32 0.7978846, %v1632_v5  ;;  %v1251_v21 = vmul.f32 0.044715, %v5546_v57  ;;  %v1083_v36 = vmul.f32 0.5, %v6513_v40 }
 0x22a   : > { %v3861_v7 = vpop.eup %3860  ;;  %3878 = vtanh.f32 %v1758_v13  ;;  %v1087_v45 = vmul.f32 0.5, %v6515_v8  ;;  %v1252_v50 = vmul.f32 0.044715, %v5549_v53  ;;  %v1762_v22 = vmul.f32 0.7978846, %v1634_v10 }
 0x22b   : > { %v3863_v33 = vpop.eup %3862  ;;  %v1977_v16 = vadd.f32 1.0, %v3861_v7  ;;  %v1080_v11 = vmul.f32 0.5, %v6519_v38  ;;  %v1254_v54 = vmul.f32 0.044715, %v5554_v63  ;;  %v1084_v34 = vmul.f32 0.5, %v6521_v1 }
 0x22c   : > { %v1981_v5 = vadd.f32 1.0, %v3863_v33  ;;  %v1377_v55 = vmul.f32 %v1249_v61, %v5540_v56  ;;  %v5573_v13 = vadd.f32 %v800_v14, %v4417_v29  ;;  %3880 = vtanh.f32 %v1760_v2 }
 0x22d   : > { %v3865_v40 = vpop.eup %3864  ;;  %v1082_v8 = vmul.f32 0.5, %v6523_v43  ;;  %v1379_v32 = vmul.f32 %v1251_v21, %v5546_v57  ;;  %v5578_v10 = vadd.f32 %v993_v12, %v4419_v30  ;;  %v2105_v7 = vmul.f32 %v1977_v16, %v1081_v48  ;;  %v6532_v12 = vld [vmem:[#allocation64_spill] sm:$0xff] }
 0x22e   : > { %v3867_v38 = vpop.eup %3866  ;;  %v2109_v49 = vmul.f32 %v1981_v5, %v1085_v60  ;;  %v1979_v33 = vadd.f32 1.0, %v3865_v40  ;;  %v1380_v1 = vmul.f32 %v1252_v50, %v5549_v53  ;;  %3882 = vtanh.f32 %v1762_v22  ;;  %v804_v40 = vpop.f32.mrf.mxu0 }
 0x22f   : > { %6531 = vst [vmem:[#allocation46_spill] sm:$0xff] %v5578_v10  ;;  %v1983_v4 = vadd.f32 1.0, %v3867_v38  ;;  %v1086_v61 = vmul.f32 0.5, %v6526_v23  ;;  %v1382_v14 = vmul.f32 %v1254_v54, %v5554_v63  ;;  %v5584_v43 = vmul.f32 %v1377_v55, %v5540_v56 }
 0x230   : > { %v2457_v2 = vpack.c.bf16 %v2109_v49, %v2105_v7  ;;  %v1253_v21 = vmul.f32 0.044715, %v5573_v13  ;;  %v1601_v3 = vadd.f32 %v6533_v52, %v6532_v12  ;;  %v2107_v60 = vmul.f32 %v1979_v33, %v1083_v36 }
 0x231   : > { %v3869_v48 = vpop.eup %3868  ;;  %v2111_v16 = vmul.f32 %v1983_v4, %v1087_v45  ;;  %v1255_v50 = vmul.f32 0.044715, %v5578_v10  ;;  %v1605_v22 = vadd.f32 %v5256_v35, %v5189_v20  ;;  %v5593_v49 = vmul.f32 %v1379_v32, %v5546_v57  ;;  %v997_v45 = vpop.f32.mrf.mxu1 }
 0x232   : > { %v3871_v23 = vpop.eup %3870  ;;  %2847 = vmatprep.mubr.bf16.mxu0 %v2457_v2  ;;  %v1976_v54 = vadd.f32 1.0, %v3869_v48  ;;  %v1508_v5 = vmul.f32 %v1380_v1, %v5549_v53  ;;  %v1729_v55 = vmul.f32 0.7978846, %v1601_v3  ;;  %v1510_v36 = vmul.f32 %v1382_v14, %v5554_v63 }
 0x233   : > { %v2459_v38 = vpack.c.bf16 %v2111_v16, %v2107_v60  ;;  %v1980_v52 = vadd.f32 1.0, %v3871_v23  ;;  %v1733_v4 = vmul.f32 0.7978846, %v1605_v22  ;;  %v1603_v35 = vadd.f32 %v5235_v44, %v5164_v0  ;;  %v806_v44 = vpop.f32.mrf.mxu0 }
 0x234   : > { %v3873_v7 = vpop.eup %3872  ;;  %v2104_v33 = vmul.f32 %v1976_v54, %v1080_v11  ;;  %3884 = vtanh.f32 %v1729_v55  ;;  %v1607_v32 = vadd.f32 %v5271_v59, %v5202_v46  ;;  %v5602_v48 = vadd.f32 %v804_v40, %v4413_v25 }
 0x235   : > { %v3875_v2 = vpop.eup %3874  ;;  %3008 = vmatprep.mubr.bf16.mxu1 %v2459_v38  ;;  %v2108_v1 = vmul.f32 %v1980_v52, %v1084_v34  ;;  %v1978_v3 = vadd.f32 1.0, %v3873_v7  ;;  %3886 = vtanh.f32 %v1733_v4  ;;  %v1731_v16 = vmul.f32 0.7978846, %v1603_v35  ;;  %v6538_v7 = vld [vmem:[#allocation59_spill] sm:$0xff] }
 0x236   : > { %6534 = vst [vmem:[#allocation42_spill] sm:$0xff] %v5602_v48  ;;  %v5604_v14 = vpop.eup %3876  ;;  %v1982_v60 = vadd.f32 1.0, %v3875_v2  ;;  %v1735_v11 = vmul.f32 0.7978846, %v1607_v32  ;;  %v5607_v22 = vadd.f32 %v997_v45, %v4415_v26  ;;  %v1636_v54 = vadd.f32 %v1508_v5, %v5549_v53  ;;  %v6537_v45 = vld [vmem:[#allocation55_spill] sm:$0xff]  ;;  %v6540_v32 = vld [vmem:[#allocation56_spill] sm:$0xff]  ;;  %v999_v2 = vpop.f32.mrf.mxu1 }
 0x237   : > { %v5609_v23 = vpop.eup %3878  ;;  %v2456_v59 = vpack.c.bf16 %v2108_v1, %v2104_v33  ;;  %v5613_v34 = vmul.f32 0.5, %v6532_v12  ;;  %v1256_v55 = vmul.f32 0.044715, %v5602_v48  ;;  %v2106_v40 = vmul.f32 %v1978_v3, %v1082_v8  ;;  %v6539_v33 = vld [vmem:[#allocation50_spill] sm:$0xff] }
 0x238   : > { %6535 = vst [vmem:[#allocation40_spill] sm:$0xff] %v5607_v22  ;;  %6536 = vst [vmem:[#allocation36_spill] sm:$0xff] %v5609_v23  ;;  %v2110_v38 = vmul.f32 %v1982_v60, %v1086_v61  ;;  %3888 = vtanh.f32 %v1731_v16  ;;  %v1258_v52 = vmul.f32 0.044715, %v5607_v22  ;;  %v1600_v35 = vadd.f32 %v6538_v7, %v6537_v45  ;;  %v808_v60 = vpop.f32.mrf.mxu0  ;;  %v6543_v7 = vld [vmem:[#allocation41_spill] sm:$0xff] }
 0x239   : > { %2848 = vmatmul.mubr.bf16.gmra.mxu0 %v2456_v59  ;;  %3890 = vtanh.f32 %v1735_v11  ;;  %v1384_v4 = vmul.f32 %v1256_v55, %v5602_v48  ;;  %v1604_v5 = vadd.f32 %v6540_v32, %v6539_v33  ;;  %v5622_v12 = vpop.eup %3880  ;;  %v1638_v8 = vadd.f32 %v1510_v36, %v5554_v63  ;;  %v6542_v55 = vld [vmem:[#allocation62_spill] sm:$0xff] }
 0x23a   : > { %6541 = vst [vmem:[#allocation67_spill] sm:$0xff] %v5622_v12  ;;  %v2458_v1 = vpack.c.bf16 %v2110_v38, %v2106_v40  ;;  %v1381_v61 = vmul.f32 %v1253_v21, %v5573_v13  ;;  %v1386_v3 = vmul.f32 %v1258_v52, %v5607_v22  ;;  %v1728_v11 = vmul.f32 0.7978846, %v1600_v35  ;;  %v6545_v38 = vld [vmem:[#allocation48_spill] sm:$0xff]  ;;  %v6546_v21 = vld [vmem:[#allocation23_spill] sm:$0xff] }
 0x23b   : > { %v1512_v16 = vmul.f32 %v1384_v4, %v5602_v48  ;;  %v1732_v59 = vmul.f32 0.7978846, %v1604_v5  ;;  %v1602_v53 = vadd.f32 %v6543_v7, %v6542_v55  ;;  %v5630_v23 = vpop.eup %3882  ;;  %v1764_v32 = vmul.f32 0.7978846, %v1636_v54  ;;  %v1001_v5 = vpop.f32.mrf.mxu1 }
 0x23c   : > { %6544 = vst [vmem:[#allocation45_spill] sm:$0xff] %v5630_v23  ;;  %3009 = vmatmul.mubr.bf16.gmra.mxu1 %v2458_v1  ;;  %v1383_v40 = vmul.f32 %v1255_v50, %v5578_v10  ;;  %v1514_v36 = vmul.f32 %v1386_v3, %v5607_v22  ;;  %v1606_v63 = vadd.f32 %v6546_v21, %v6545_v38  ;;  %3892 = vtanh.f32 %v1728_v11 }
 0x23d   : > { %v1730_v52 = vmul.f32 0.7978846, %v1602_v53  ;;  %v5637_v4 = vadd.f32 %v806_v44, %v4417_v29  ;;  %v5640_v35 = vadd.f32 %v808_v60, %v4413_v25  ;;  %v5643_v7 = vmul.f32 %v1381_v61, %v5573_v13 }
 0x23e   : > { %v1093_v54 = vmul.f32 0.5, %v5189_v20  ;;  %3894 = vtanh.f32 %v1732_v59  ;;  %v1734_v50 = vmul.f32 0.7978846, %v1606_v63  ;;  %v1766_v1 = vmul.f32 0.7978846, %v1638_v8 }
 0x23f   : > { %6547 = vst [vmem:[#allocation57_spill] sm:$0xff] %v5637_v4  ;;  %6548 = vst [vmem:[#allocation43_spill] sm:$0xff] %v5640_v35  ;;  %v1640_v3 = vadd.f32 %v1512_v16, %v5602_v48  ;;  %3896 = vtanh.f32 %v1730_v52  ;;  %v1260_v53 = vmul.f32 0.044715, %v5640_v35  ;;  %v1642_v44 = vadd.f32 %v1514_v36, %v5607_v22  ;;  %v810_v52 = vpop.f32.mrf.mxu0 }
 0x240   : > { %3898 = vtanh.f32 %v1734_v50  ;;  %v5650_v60 = vadd.f32 %v999_v2, %v4419_v30  ;;  %v5653_v11 = vadd.f32 %v1001_v5, %v4415_v26  ;;  %v5656_v20 = vmul.f32 %v1383_v40, %v5578_v10 }
 0x241   : > { %v3885_v61 = vpop.eup %3884  ;;  %3900 = vtanh.f32 %v1764_v32  ;;  %v1091_v63 = vmul.f32 0.5, %v5164_v0  ;;  %v1257_v8 = vmul.f32 0.044715, %v5637_v4  ;;  %v1095_v36 = vmul.f32 0.5, %v5202_v46 }
 0x242   : > { %6549 = vst [vmem:[#allocation68_spill] sm:$0xff] %v5653_v11  ;;  %6550 = vst [vmem:[#allocation39_spill] sm:$0xff] %v5656_v20  ;;  %v3887_v16 = vpop.eup %3886  ;;  %v1985_v59 = vadd.f32 1.0, %v3885_v61  ;;  %v1388_v21 = vmul.f32 %v1260_v53, %v5640_v35  ;;  %v1262_v2 = vmul.f32 0.044715, %v5653_v11  ;;  %3902 = vtanh.f32 %v1766_v1  ;;  %v1003_v1 = vpop.f32.mrf.mxu1 }
 0x243   : > { %v1989_v5 = vadd.f32 1.0, %v3887_v16  ;;  %v1768_v50 = vmul.f32 0.7978846, %v1640_v3  ;;  %v1088_v32 = vmul.f32 0.5, %v6537_v45  ;;  %v1770_v40 = vmul.f32 0.7978846, %v1642_v44 }
 0x244   : > { %v1092_v22 = vmul.f32 0.5, %v6539_v33  ;;  %v1090_v0 = vmul.f32 0.5, %v6542_v55  ;;  %v1259_v48 = vmul.f32 0.044715, %v5650_v60  ;;  %v2113_v46 = vmul.f32 %v1985_v59, %v5613_v34 }
 0x245   : > { %v3889_v61 = vpop.eup %3888  ;;  %v2117_v23 = vmul.f32 %v1989_v5, %v1093_v54  ;;  %v1385_v53 = vmul.f32 %v1257_v8, %v5637_v4  ;;  %v5670_v12 = vadd.f32 %v810_v52, %v4417_v29  ;;  %v1516_v45 = vmul.f32 %v1388_v21, %v5640_v35 }
 0x246   : > { %v3891_v3 = vpop.eup %3890  ;;  %v1987_v16 = vadd.f32 1.0, %v3889_v61  ;;  %v1390_v33 = vmul.f32 %v1262_v2, %v5653_v11  ;;  %v1609_v55 = vadd.f32 %v5318_v19, %v5250_v39  ;;  %3904 = vtanh.f32 %v1768_v50 }
 0x247   : > { %v2461_v44 = vpack.c.bf16 %v2117_v23, %v2113_v46  ;;  %v1991_v20 = vadd.f32 1.0, %v3891_v3  ;;  %v1094_v34 = vmul.f32 0.5, %v6545_v38  ;;  %3906 = vtanh.f32 %v1770_v40  ;;  %v814_v23 = vpop.f32.mrf.mxu0  ;;  %v6553_v3 = vld [vmem:[#allocation65_spill] sm:$0xff] }
 0x248   : > { %v1387_v54 = vmul.f32 %v1259_v48, %v5650_v60  ;;  %v5679_v8 = vadd.f32 %v1003_v1, %v4419_v30  ;;  %v1613_v59 = vadd.f32 %v5350_v37, %v5275_v58  ;;  %v2115_v21 = vmul.f32 %v1987_v16, %v1091_v63  ;;  %v6552_v37 = vld [vmem:[#allocation54_spill] sm:$0xff] }
 0x249   : > { %2855 = vmatprep.mubr.bf16.mxu0 %v2461_v44  ;;  %v2119_v2 = vmul.f32 %v1991_v20, %v1095_v36  ;;  %v5684_v52 = vmul.f32 %v1385_v53, %v5637_v4  ;;  %v1737_v19 = vmul.f32 0.7978846, %v1609_v55  ;;  %v3893_v5 = vpop.eup %3892  ;;  %v1644_v38 = vadd.f32 %v1516_v45, %v5640_v35  ;;  %v6554_v16 = vld [vmem:[#allocation34_spill] sm:$0xff] }
 0x24a   : > { %v1518_v50 = vmul.f32 %v1390_v33, %v5653_v11  ;;  %v1261_v48 = vmul.f32 0.044715, %v5670_v12  ;;  %v1741_v40 = vmul.f32 0.7978846, %v1613_v59  ;;  %v1984_v1 = vadd.f32 1.0, %v3893_v5  ;;  %v1007_v33 = vpop.f32.mrf.mxu1 }
 0x24b   : > { %6551 = vst [vmem:[#allocation51_spill] sm:$0xff] %v5684_v52  ;;  %v3895_v61 = vpop.eup %3894  ;;  %v2463_v46 = vpack.c.bf16 %v2119_v2, %v2115_v21  ;;  %3908 = vtanh.f32 %v1737_v19  ;;  %v1611_v20 = vadd.f32 %v6552_v37, %v5260_v41  ;;  %v1263_v53 = vmul.f32 0.044715, %v5679_v8  ;;  %v816_v52 = vpop.f32.mrf.mxu0 }
 0x24c   : > { %v3897_v63 = vpop.eup %3896  ;;  %v1988_v36 = vadd.f32 1.0, %v3895_v61  ;;  %v1615_v55 = vadd.f32 %v6554_v16, %v6553_v3  ;;  %v5695_v45 = vadd.f32 %v814_v23, %v4413_v25  ;;  %v2112_v59 = vmul.f32 %v1984_v1, %v1088_v32 }
 0x24d   : > { %v3899_v44 = vpop.eup %3898  ;;  %3016 = vmatprep.mubr.bf16.mxu1 %v2463_v46  ;;  %v1986_v21 = vadd.f32 1.0, %v3897_v63  ;;  %3910 = vtanh.f32 %v1741_v40  ;;  %v1739_v2 = vmul.f32 0.7978846, %v1611_v20  ;;  %v1772_v16 = vmul.f32 0.7978846, %v1644_v38  ;;  %v6558_v20 = vld [vmem:[#allocation49_spill] sm:$0xff] }
 0x24e   : > { %6555 = vst [vmem:[#allocation64_spill] sm:$0xff] %v5695_v45  ;;  %v5697_v19 = vpop.eup %3900  ;;  %v2116_v5 = vmul.f32 %v1988_v36, %v1092_v22  ;;  %v1990_v37 = vadd.f32 1.0, %v3899_v44  ;;  %v1743_v61 = vmul.f32 0.7978846, %v1615_v55  ;;  %v1264_v35 = vmul.f32 0.044715, %v5695_v45 }
 0x24f   : > { %v2114_v4 = vmul.f32 %v1986_v21, %v1090_v0  ;;  %3912 = vtanh.f32 %v1739_v2  ;;  %v5701_v23 = vadd.f32 %v1007_v33, %v4415_v26  ;;  %v5703_v10 = vpop.eup %3902  ;;  %v5707_v22 = vmul.f32 %v1387_v54, %v5650_v60  ;;  %v6559_v63 = vld [vmem:[#allocation16_spill] sm:$0xff]  ;;  %v6560_v38 = vld [vmem:[#allocation58_spill] sm:$0xff]  ;;  %v1009_v33 = vpop.f32.mrf.mxu1 }
 0x250   : > { %v2460_v32 = vpack.c.bf16 %v2116_v5, %v2112_v59  ;;  %v2118_v46 = vmul.f32 %v1990_v37, %v1094_v34  ;;  %3914 = vtanh.f32 %v1743_v61  ;;  %v1392_v40 = vmul.f32 %v1264_v35, %v5695_v45  ;;  %v6561_v36 = vld [vmem:[#allocation66_spill] sm:$0xff]  ;;  %v818_v21 = vpop.f32.mrf.mxu0  ;;  %v6562_v37 = vld [vmem:[#allocation60_spill] sm:$0xff]  ;;  %v6563_v61 = vld [vmem:[#allocation53_spill] sm:$0xff] }
 0x251   : > { %6556 = vst [vmem:[#allocation52_spill] sm:$0xff] %v5701_v23  ;;  %6557 = vst [vmem:[#allocation55_spill] sm:$0xff] %v5707_v22  ;;  %v1266_v1 = vmul.f32 0.044715, %v5701_v23  ;;  %v1608_v0 = vadd.f32 %v6559_v63, %v6558_v20  ;;  %v1612_v55 = vadd.f32 %v6561_v36, %v6560_v38  ;;  %v1646_v59 = vadd.f32 %v1518_v50, %v5653_v11 }
 0x252   : > { %2856 = vmatmul.mubr.bf16.gmra.mxu0 %v2460_v32  ;;  %v2462_v44 = vpack.c.bf16 %v2118_v46, %v2114_v4  ;;  %v1389_v34 = vmul.f32 %v1261_v48, %v5670_v12  ;;  %v1097_v35 = vmul.f32 0.5, %v5250_v39  ;;  %v1610_v63 = vadd.f32 %v6563_v61, %v6562_v37  ;;  %v6565_v32 = vld [vmem:[#allocation30_spill] sm:$0xff]  ;;  %v6566_v48 = vld [vmem:[#allocation63_spill] sm:$0xff] }
 0x253   : > { %v1394_v54 = vmul.f32 %v1266_v1, %v5701_v23  ;;  %v1736_v2 = vmul.f32 0.7978846, %v1608_v0  ;;  %v1740_v5 = vmul.f32 0.7978846, %v1612_v55  ;;  %v5720_v22 = vpop.eup %3904  ;;  %3916 = vtanh.f32 %v1772_v16  ;;  %v1011_v55 = vpop.f32.mrf.mxu1 }
 0x254   : > { %6564 = vst [vmem:[#allocation59_spill] sm:$0xff] %v5720_v22  ;;  %3017 = vmatmul.mubr.bf16.gmra.mxu1 %v2462_v44  ;;  %v1391_v4 = vmul.f32 %v1263_v53, %v5679_v8  ;;  %v1520_v50 = vmul.f32 %v1392_v40, %v5695_v45  ;;  %v1614_v46 = vadd.f32 %v6566_v48, %v6565_v32  ;;  %v5726_v39 = vpop.eup %3906  ;;  %v1101_v1 = vmul.f32 0.5, %v5275_v58 }
 0x255   : > { %6567 = vst [vmem:[#allocation50_spill] sm:$0xff] %v5726_v39  ;;  %3918 = vtanh.f32 %v1736_v2  ;;  %v1738_v0 = vmul.f32 0.7978846, %v1610_v63  ;;  %v5730_v36 = vadd.f32 %v818_v21, %v4413_v25  ;;  %v1522_v44 = vmul.f32 %v1394_v54, %v5701_v23 }
 0x256   : > { %3920 = vtanh.f32 %v1740_v5  ;;  %v1742_v16 = vmul.f32 0.7978846, %v1614_v46  ;;  %v5734_v53 = vadd.f32 %v816_v52, %v4417_v29  ;;  %v1774_v40 = vmul.f32 0.7978846, %v1646_v59 }
 0x257   : > { %6568 = vst [vmem:[#allocation56_spill] sm:$0xff] %v5730_v36  ;;  %v5737_v61 = vmul.f32 %v1389_v34, %v5670_v12  ;;  %3922 = vtanh.f32 %v1738_v0  ;;  %v1268_v58 = vmul.f32 0.044715, %v5730_v36  ;;  %v5741_v63 = vmul.f32 %v1391_v4, %v5679_v8 }
 0x258   : > { %v3909_v2 = vpop.eup %3908  ;;  %v1099_v25 = vmul.f32 0.5, %v5260_v41  ;;  %v1648_v21 = vadd.f32 %v1520_v50, %v5695_v45  ;;  %v5746_v54 = vadd.f32 %v1011_v55, %v4415_v26  ;;  %v1103_v59 = vmul.f32 0.5, %v6553_v3  ;;  %v820_v3 = vpop.f32.mrf.mxu0 }
 0x259   : > { %v1993_v52 = vadd.f32 1.0, %v3909_v2  ;;  %3924 = vtanh.f32 %v1742_v16  ;;  %v5750_v34 = vadd.f32 %v1009_v33, %v4419_v30  ;;  %v1650_v48 = vadd.f32 %v1522_v44, %v5701_v23 }
 0x25a   : > { %6569 = vst [vmem:[#allocation62_spill] sm:$0xff] %v5746_v54  ;;  %v3911_v5 = vpop.eup %3910  ;;  %v1265_v4 = vmul.f32 0.044715, %v5734_v53  ;;  %v1396_v46 = vmul.f32 %v1268_v58, %v5730_v36  ;;  %v1270_v41 = vmul.f32 0.044715, %v5746_v54  ;;  %3926 = vtanh.f32 %v1774_v40 }
 0x25b   : > { %v1997_v50 = vadd.f32 1.0, %v3911_v5  ;;  %v1096_v26 = vmul.f32 0.5, %v6558_v20  ;;  %v1100_v0 = vmul.f32 0.5, %v6560_v38  ;;  %v1776_v16 = vmul.f32 0.7978846, %v1648_v21  ;;  %v5764_v5 = vpop.f32.mrf.mxu0 }
 0x25c   : > { %v3913_v55 = vpop.eup %3912  ;;  %v5759_v33 = vmul.f32 0.5, %v6562_v37  ;;  %v1524_v44 = vmul.f32 %v1396_v46, %v5730_v36  ;;  %v1398_v2 = vmul.f32 %v1270_v41, %v5746_v54  ;;  %v2121_v58 = vmul.f32 %v1993_v52, %v1097_v35  ;;  %v1013_v37 = vpop.f32.mrf.mxu1 }
 0x25d   : > { %v3915_v23 = vpop.eup %3914  ;;  %v2125_v45 = vmul.f32 %v1997_v50, %v1101_v1  ;;  %v1995_v39 = vadd.f32 1.0, %v3913_v55  ;;  %v1267_v40 = vmul.f32 0.044715, %v5750_v34  ;;  %v1778_v38 = vmul.f32 0.7978846, %v1650_v48 }
 0x25e   : > { %v1999_v20 = vadd.f32 1.0, %v3915_v23  ;;  %v1393_v11 = vmul.f32 %v1265_v4, %v5734_v53  ;;  %v1652_v21 = vadd.f32 %v1524_v44, %v5730_v36  ;;  %v1102_v46 = vmul.f32 0.5, %v6565_v32  ;;  %v5774_v48 = vpop.f32.mrf.mxu1  ;;  %v5782_v44 = vpop.f32.mrf.mxu0 }
 0x25f   : > { %v2465_v22 = vpack.c.bf16 %v2125_v45, %v2121_v58  ;;  %v1526_v41 = vmul.f32 %v1398_v2, %v5746_v54  ;;  %v1617_v35 = vadd.f32 %v5428_v9, %v5347_v15  ;;  %v2123_v1 = vmul.f32 %v1995_v39, %v1099_v25 }
 0x260   : > { %v2127_v52 = vmul.f32 %v1999_v20, %v1103_v59  ;;  %v1780_v50 = vmul.f32 0.7978846, %v1652_v21  ;;  %v1621_v23 = vadd.f32 %v5461_v24, %v5380_v28  ;;  %v5776_v4 = vpop.eup %3916  ;;  %3928 = vtanh.f32 %v1776_v16  ;;  %v5798_v21 = vpop.f32.mrf.mxu0 }
 0x261   : > { %2863 = vmatprep.mubr.bf16.mxu0 %v2465_v22  ;;  %v1395_v45 = vmul.f32 %v1267_v40, %v5750_v34  ;;  %v5780_v32 = vadd.f32 %v820_v3, %v4417_v29  ;;  %v1745_v55 = vmul.f32 0.7978846, %v1617_v35  ;;  %3930 = vtanh.f32 %v1778_v38  ;;  %v5795_v40 = vpop.f32.mrf.mxu1 }
 0x262   : > { %v3919_v9 = vpop.eup %3918  ;;  %v2467_v39 = vpack.c.bf16 %v2127_v52, %v2123_v1  ;;  %v5785_v25 = vmul.f32 %v1393_v11, %v5734_v53  ;;  %v1749_v24 = vmul.f32 0.7978846, %v1621_v23  ;;  %v5788_v22 = vadd.f32 %v1013_v37, %v4419_v30  ;;  %v6570_v52 = vld [vmem:[#allocation61_spill] sm:$0xff] }
 0x263   : > { %v3921_v59 = vpop.eup %3920  ;;  %v1992_v2 = vadd.f32 1.0, %v3919_v9  ;;  %3932 = vtanh.f32 %v1745_v55  ;;  %v1619_v29 = vadd.f32 %v5448_v47, %v5355_v18  ;;  %v1654_v58 = vadd.f32 %v1526_v41, %v5746_v54 }
 0x264   : > { %v3923_v3 = vpop.eup %3922  ;;  %3024 = vmatprep.mubr.bf16.mxu1 %v2467_v39  ;;  %v1996_v16 = vadd.f32 1.0, %v3921_v59  ;;  %3934 = vtanh.f32 %v1780_v50  ;;  %v1623_v11 = vadd.f32 %v5469_v31, %v5393_v51  ;;  %v1269_v38 = vmul.f32 0.044715, %v5780_v32  ;;  %v6571_v50 = vld [vmem:[#allocation33_spill] sm:$0xff]  ;;  %v6572_v31 = vld [vmem:[#allocation26_spill] sm:$0xff] }
 0x265   : > { %v1994_v20 = vadd.f32 1.0, %v3923_v3  ;;  %3936 = vtanh.f32 %v1749_v24  ;;  %v1747_v30 = vmul.f32 0.7978846, %v1619_v29  ;;  %v2120_v47 = vmul.f32 %v1992_v2, %v1096_v26  ;;  %v5807_v3 = vpop.f32.mrf.mxu1 }
 0x266   : > { %v3925_v37 = vpop.eup %3924  ;;  %v2124_v35 = vmul.f32 %v1996_v16, %v1100_v0  ;;  %v1751_v1 = vmul.f32 0.7978846, %v1623_v11  ;;  %v1616_v23 = vadd.f32 %v6571_v50, %v6570_v52  ;;  %v1271_v55 = vmul.f32 0.044715, %v5788_v22  ;;  %6573 = vst [vmem:[#allocation41_spill] sm:$0xff] %v5807_v3  ;;  %v6574_v16 = vld [vmem:[#allocation24_spill] sm:$0xff]  ;;  %v5812_v50 = vpop.f32.mrf.mxu0 }
 0x267   : > { %v1998_v41 = vadd.f32 1.0, %v3925_v37  ;;  %3938 = vtanh.f32 %v1747_v30  ;;  %v1620_v9 = vadd.f32 %v6572_v31, %v5363_v62  ;;  %v5805_v39 = vpop.eup %3926  ;;  %v1782_v59 = vmul.f32 0.7978846, %v1654_v58  ;;  %v6575_v11 = vld [vmem:[#allocation18_spill] sm:$0xff]  ;;  %v6576_v58 = vld [vmem:[#allocation31_spill] sm:$0xff]  ;;  %v6594_v3 = vld [vmem:[#allocation32_spill] sm:$0xff] }
 0x268   : > { %v2464_v24 = vpack.c.bf16 %v2124_v35, %v2120_v47  ;;  %3940 = vtanh.f32 %v1751_v1  ;;  %v1744_v29 = vmul.f32 0.7978846, %v1616_v23  ;;  %v2122_v26 = vmul.f32 %v1994_v20, %v5759_v33  ;;  %v6577_v35 = vld [vmem:[#allocation47_spill] sm:$0xff] }
 0x269   : > { %v2126_v0 = vmul.f32 %v1998_v41, %v1102_v46  ;;  %v1748_v2 = vmul.f32 0.7978846, %v1620_v9  ;;  %v1618_v37 = vadd.f32 %v6575_v11, %v6574_v16  ;;  %v5815_v30 = vmul.f32 %v1395_v45, %v5750_v34  ;;  %v6578_v46 = vld [vmem:[#allocation19_spill] sm:$0xff]  ;;  %v6582_v11 = vld [vmem:[#allocation22_spill] sm:$0xff] }
 0x26a   : > { %2864 = vmatmul.mubr.bf16.gmra.mxu0 %v2464_v24  ;;  %v1397_v47 = vmul.f32 %v1269_v38, %v5780_v32  ;;  %3942 = vtanh.f32 %v1744_v29  ;;  %v1622_v1 = vadd.f32 %v6577_v35, %v6576_v58  ;;  %v6579_v20 = vld [vmem:[#allocation27_spill] sm:$0xff]  ;;  %v1399_v31 = vmul.f32 %v1271_v55, %v5788_v22  ;;  %v5825_v24 = vpop.f32.mrf.mxu1  ;;  %v6581_v29 = vld [vmem:[#allocation29_spill] sm:$0xff] }
 0x26b   : > { %v2466_v23 = vpack.c.bf16 %v2126_v0, %v2122_v26  ;;  %3944 = vtanh.f32 %v1748_v2  ;;  %v1746_v33 = vmul.f32 0.7978846, %v1618_v37  ;;  %v1625_v41 = vadd.f32 %v6579_v20, %v6578_v46  ;;  %6580 = vst [vmem:[#allocation48_spill] sm:$0xff] %v5825_v24  ;;  %v5831_v2 = vpop.f32.mrf.mxu0 }
 0x26c   : > { %3946 = vtanh.f32 %v1782_v59  ;;  %v1750_v9 = vmul.f32 0.7978846, %v1622_v1  ;;  %v1629_v45 = vadd.f32 %v5557_v42, %v5488_v17  ;;  %v1627_v26 = vadd.f32 %v6582_v11, %v6581_v29  ;;  %6583 = vst [vmem:[#allocation23_spill] sm:$0xff] %v5831_v2 }
 0x26d   : > { %3025 = vmatmul.mubr.bf16.gmra.mxu1 %v2466_v23  ;;  %3948 = vtanh.f32 %v1746_v33  ;;  %v1753_v38 = vmul.f32 0.7978846, %v1625_v41  ;;  %v1631_v0 = vadd.f32 %v5562_v27, %v5492_v6  ;;  %v5833_v59 = vpop.eup %3928  ;;  %v1105_v55 = vmul.f32 0.5, %v5347_v15  ;;  %v5853_v11 = vpop.f32.mrf.mxu0 }
 0x26e   : > { %6584 = vst [vmem:[#allocation54_spill] sm:$0xff] %v5833_v59  ;;  %v1109_v37 = vmul.f32 0.5, %v5380_v28  ;;  %3950 = vtanh.f32 %v1750_v9  ;;  %v1757_v42 = vmul.f32 0.7978846, %v1629_v45  ;;  %v5837_v35 = vpop.eup %3930  ;;  %v5840_v1 = vmul.f32 %v1397_v47, %v5780_v32  ;;  %v5847_v28 = vpop.f32.mrf.mxu1  ;;  %6588 = vst [vmem:[#allocation16_spill] sm:$0xff] %v5853_v11  ;;  %v6592_v59 = vld [vmem:[#allocation38_spill] sm:$0xff] }
 0x26f   : > { %6585 = vst [vmem:[#allocation65_spill] sm:$0xff] %v5837_v35  ;;  %3952 = vtanh.f32 %v1753_v38  ;;  %v1755_v23 = vmul.f32 0.7978846, %v1627_v26  ;;  %v1759_v33 = vmul.f32 0.7978846, %v1631_v0  ;;  %v5843_v27 = vmul.f32 %v1399_v31, %v5788_v22  ;;  %6586 = vst [vmem:[#allocation34_spill] sm:$0xff] %v5847_v28  ;;  %v5882_v28 = vpop.f32.mrf.mxu0 }
 0x270   : > { %v3933_v20 = vpop.eup %3932  ;;  %v1107_v41 = vmul.f32 0.5, %v5355_v18  ;;  %v1111_v15 = vmul.f32 0.5, %v5393_v51  ;;  %3954 = vtanh.f32 %v1757_v42  ;;  %v1104_v47 = vmul.f32 0.5, %v6570_v52  ;;  %v6590_v35 = vld [vmem:[#allocation25_spill] sm:$0xff]  ;;  %6593 = vst [vmem:[#allocation66_spill] sm:$0xff] %v5882_v28 }
 0x271   : > { %v5849_v9 = vpop.eup %3934  ;;  %v2001_v45 = vadd.f32 1.0, %v3933_v20  ;;  %v1108_v38 = vmul.f32 0.5, %v5363_v62  ;;  %3956 = vtanh.f32 %v1755_v23  ;;  %v5856_v31 = vmul.f32 0.5, %v6574_v16  ;;  %v6589_v16 = vld [vmem:[#allocation20_spill] sm:$0xff] }
 0x272   : > { %6587 = vst [vmem:[#allocation49_spill] sm:$0xff] %v5849_v9  ;;  %v3937_v26 = vpop.eup %3936  ;;  %v5859_v18 = vmul.f32 0.5, %v6576_v58  ;;  %v5862_v51 = vmul.f32 0.5, %v6578_v46  ;;  %3958 = vtanh.f32 %v1759_v33  ;;  %v5865_v42 = vmul.f32 0.5, %v5488_v17 }
 0x273   : > { %v2005_v0 = vadd.f32 1.0, %v3937_v26  ;;  %v5868_v62 = vmul.f32 0.5, %v6581_v29  ;;  %v5871_v52 = vmul.f32 0.5, %v5492_v6  ;;  %v1112_v20 = vmul.f32 0.5, %v6589_v16  ;;  %v5879_v26 = vpop.f32.mrf.mxu1 }
 0x274   : > { %v3939_v23 = vpop.eup %3938  ;;  %v1116_v58 = vmul.f32 0.5, %v6590_v35  ;;  %v1633_v46 = vadd.f32 %v5584_v43, %v5540_v56  ;;  %v1637_v33 = vadd.f32 %v5643_v7, %v5573_v13  ;;  %6591 = vst [vmem:[#allocation58_spill] sm:$0xff] %v5879_v26  ;;  %v2129_v54 = vmul.f32 %v2001_v45, %v1105_v55  ;;  %v6595_v26 = vld [vmem:[#allocation46_spill] sm:$0xff]  ;;  %v6596_v55 = vld [vmem:[#allocation39_spill] sm:$0xff] }
 0x275   : > { %v3941_v17 = vpop.eup %3940  ;;  %v2133_v29 = vmul.f32 %v2005_v0, %v1109_v37  ;;  %v2003_v9 = vadd.f32 1.0, %v3939_v23  ;;  %v2008_v6 = vadd.f32 1.0, %v6592_v59  ;;  %v2012_v16 = vadd.f32 1.0, %v5604_v14 }
 0x276   : > { %v2007_v11 = vadd.f32 1.0, %v3941_v17  ;;  %v1761_v35 = vmul.f32 0.7978846, %v1633_v46  ;;  %v1765_v2 = vmul.f32 0.7978846, %v1637_v33  ;;  %v2010_v36 = vadd.f32 1.0, %v6594_v3  ;;  %v5890_v17 = vpop.f32.mrf.mxu1  ;;  %v5894_v33 = vpop.f32.mrf.mxu0 }
 0x277   : > { %v3943_v24 = vpop.eup %3942  ;;  %v2469_v43 = vpack.c.bf16 %v2133_v29, %v2129_v54  ;;  %v1635_v7 = vadd.f32 %v5593_v49, %v5546_v57  ;;  %v1639_v37 = vadd.f32 %v6596_v55, %v6595_v26  ;;  %v2131_v0 = vmul.f32 %v2003_v9, %v1107_v41  ;;  %6597 = vst [vmem:[#allocation60_spill] sm:$0xff] %v5890_v17  ;;  %v6599_v55 = vld [vmem:[#allocation17_spill] sm:$0xff] }
 0x278   : > { %v3945_v45 = vpop.eup %3944  ;;  %v2135_v59 = vmul.f32 %v2007_v11, %v1111_v15  ;;  %v2000_v23 = vadd.f32 1.0, %v3943_v24  ;;  %3960 = vtanh.f32 %v1761_v35  ;;  %v5896_v28 = vmul.f32 %v2012_v16, %v1116_v58  ;;  %v6600_v15 = vld [vmem:[#allocation36_spill] sm:$0xff] }
 0x279   : > { %v5892_v14 = vpop.eup %3946  ;;  %2871 = vmatprep.mubr.bf16.mxu0 %v2469_v43  ;;  %v2004_v46 = vadd.f32 1.0, %v3945_v45  ;;  %3962 = vtanh.f32 %v1765_v2  ;;  %v1763_v54 = vmul.f32 0.7978846, %v1635_v7  ;;  %v1767_v3 = vmul.f32 0.7978846, %v1639_v37  ;;  %v6601_v37 = vld [vmem:[#allocation28_spill] sm:$0xff] }
 0x27a   : > { %6598 = vst [vmem:[#allocation53_spill] sm:$0xff] %v5892_v14  ;;  %v3949_v49 = vpop.eup %3948  ;;  %v2471_v29 = vpack.c.bf16 %v2135_v59, %v2131_v0  ;;  %v1114_v41 = vmul.f32 0.5, %v6599_v55  ;;  %v2014_v24 = vadd.f32 1.0, %v6600_v15  ;;  %v2128_v11 = vmul.f32 %v2000_v23, %v1104_v47  ;;  %v5901_v14 = vpop.f32.mrf.mxu1 }
 0x27b   : > { %v3951_v9 = vpop.eup %3950  ;;  %v2132_v35 = vmul.f32 %v2004_v46, %v1108_v38  ;;  %v2002_v17 = vadd.f32 1.0, %v3949_v49  ;;  %3964 = vtanh.f32 %v1763_v54  ;;  %v2136_v7 = vmul.f32 %v2008_v6, %v1112_v20  ;;  %v5906_v47 = vpop.f32.mrf.mxu0 }
 0x27c   : > { %v3953_v43 = vpop.eup %3952  ;;  %3032 = vmatprep.mubr.bf16.mxu1 %v2471_v29  ;;  %v2006_v2 = vadd.f32 1.0, %v3951_v9  ;;  %v1118_v45 = vmul.f32 0.5, %v6601_v37  ;;  %3966 = vtanh.f32 %v1767_v3  ;;  %v5903_v59 = vmul.f32 %v2010_v36, %v1114_v41 }
 0x27d   : > { %v3955_v58 = vpop.eup %3954  ;;  %v2468_v16 = vpack.c.bf16 %v2132_v35, %v2128_v11  ;;  %v2009_v0 = vadd.f32 1.0, %v3953_v43  ;;  %v1121_v55 = vmul.f32 0.5, %v5540_v56  ;;  %v2130_v23 = vmul.f32 %v2002_v17, %v5856_v31  ;;  %v5915_v31 = vpop.f32.mrf.mxu1  ;;  %v6602_v17 = vld [vmem:[#allocation37_spill] sm:$0xff]  ;;  %v6603_v11 = vld [vmem:[#allocation44_spill] sm:$0xff]  ;;  %v6604_v43 = vld [vmem:[#allocation67_spill] sm:$0xff] }
 0x27e   : > { %v3957_v38 = vpop.eup %3956  ;;  %v2134_v46 = vmul.f32 %v2006_v2, %v5859_v18  ;;  %v2013_v20 = vadd.f32 1.0, %v3955_v58  ;;  %v1125_v6 = vmul.f32 0.5, %v5573_v13  ;;  %v2472_v49 = vpack.c.bf16 %v5896_v28, %v2136_v7  ;;  %v5921_v28 = vpop.f32.mrf.mxu0  ;;  %v6606_v7 = vld [vmem:[#allocation51_spill] sm:$0xff] }
 0x27f   : > { %v3959_v54 = vpop.eup %3958  ;;  %2872 = vmatmul.mubr.bf16.gmra.mxu0 %v2468_v16  ;;  %v2011_v3 = vadd.f32 1.0, %v3957_v38  ;;  %v2142_v29 = vmul.f32 %v2014_v24, %v1118_v45  ;;  %v2020_v36 = vadd.f32 1.0, %v5697_v19  ;;  %v2137_v56 = vmul.f32 %v2009_v0, %v5862_v51  ;;  %v6605_v51 = vld [vmem:[#allocation57_spill] sm:$0xff]  ;;  %v6608_v0 = vld [vmem:[#allocation55_spill] sm:$0xff] }
 0x280   : > { %v2470_v41 = vpack.c.bf16 %v2134_v46, %v2130_v23  ;;  %v2141_v15 = vmul.f32 %v2013_v20, %v5865_v42  ;;  %v2015_v9 = vadd.f32 1.0, %v3959_v54  ;;  %v1120_v13 = vmul.f32 0.5, %v6602_v17  ;;  %v5936_v54 = vpop.f32.mrf.mxu1 }
 0x281   : > { %v2139_v18 = vmul.f32 %v2011_v3, %v5868_v62  ;;  %v1124_v35 = vmul.f32 0.5, %v6603_v11  ;;  %v2016_v2 = vadd.f32 1.0, %v6604_v43  ;;  %v1641_v42 = vadd.f32 %v6606_v7, %v6605_v51  ;;  %v6607_v62 = vld [vmem:[#allocation45_spill] sm:$0xff] }
 0x282   : > { %3033 = vmatmul.mubr.bf16.gmra.mxu1 %v2470_v41  ;;  %v2473_v19 = vpack.c.bf16 %v2141_v15, %v2137_v56  ;;  %v2143_v24 = vmul.f32 %v2015_v9, %v5871_v52  ;;  %v1645_v37 = vadd.f32 %v5737_v61, %v5670_v12  ;;  %v2018_v58 = vadd.f32 1.0, %v6607_v62  ;;  %v6609_v41 = vld [vmem:[#allocation21_spill] sm:$0xff]  ;;  %v5946_v7 = vpop.f32.mrf.mxu1 }
 0x283   : > { %v5928_v45 = vmul.f32 %v2020_v36, %v1124_v35  ;;  %v2022_v16 = vadd.f32 1.0, %v5703_v10  ;;  %v1643_v38 = vadd.f32 %v6608_v0, %v5650_v60  ;;  %v1769_v46 = vmul.f32 0.7978846, %v1641_v42  ;;  %v5940_v10 = vpop.f32.mrf.mxu0 }
 0x284   : > { %2879 = vmatprep.mubr.bf16.mxu0 %v2473_v19  ;;  %v2475_v23 = vpack.c.bf16 %v2143_v24, %v2139_v18  ;;  %v1773_v20 = vmul.f32 0.7978846, %v1645_v37  ;;  %v1647_v52 = vadd.f32 %v5741_v63, %v5679_v8  ;;  %v1123_v61 = vmul.f32 0.5, %v5546_v57  ;;  %v6610_v18 = vld [vmem:[#allocation35_spill] sm:$0xff] }
 0x285   : > { %v3961_v3 = vpop.eup %3960  ;;  %v2144_v36 = vmul.f32 %v2016_v2, %v1120_v13  ;;  %v1122_v56 = vmul.f32 0.5, %v6609_v41  ;;  %v1771_v15 = vmul.f32 0.7978846, %v1643_v38  ;;  %v1126_v11 = vmul.f32 0.5, %v6610_v18  ;;  %v6614_v41 = vld [vmem:[#allocation68_spill] sm:$0xff] }
 0x286   : > { %v3963_v9 = vpop.eup %3962  ;;  %3040 = vmatprep.mubr.bf16.mxu1 %v2475_v23  ;;  %v2017_v17 = vadd.f32 1.0, %v3961_v3  ;;  %3968 = vtanh.f32 %v1769_v46  ;;  %v1775_v35 = vmul.f32 0.7978846, %v1647_v52  ;;  %v2474_v63 = vpack.c.bf16 %v2142_v29, %v5903_v59  ;;  %v6611_v29 = vld [vmem:[#allocation42_spill] sm:$0xff]  ;;  %v6613_v46 = vld [vmem:[#allocation59_spill] sm:$0xff] }
 0x287   : > { %2880 = vmatmul.mubr.bf16.gmra.mxu0 %v2472_v49  ;;  %v2021_v43 = vadd.f32 1.0, %v3963_v9  ;;  %v1127_v19 = vmul.f32 0.5, %v6595_v26  ;;  %3970 = vtanh.f32 %v1773_v20  ;;  %v2476_v13 = vpack.c.bf16 %v5928_v45, %v2144_v36  ;;  %v5948_v49 = vpop.f32.mrf.mxu0  ;;  %v5962_v36 = vpop.f32.mrf.mxu1 }
 0x288   : > { %v3965_v57 = vpop.eup %3964  ;;  %v2146_v2 = vmul.f32 %v2018_v58, %v1122_v56  ;;  %v2150_v24 = vmul.f32 %v2022_v16, %v1126_v11  ;;  %3972 = vtanh.f32 %v1771_v15  ;;  %v2145_v37 = vmul.f32 %v2017_v17, %v1121_v55  ;;  %v6612_v16 = vld [vmem:[#allocation43_spill] sm:$0xff]  ;;  %v6615_v56 = vld [vmem:[#allocation50_spill] sm:$0xff]  ;;  %v6616_v11 = vld [vmem:[#allocation40_spill] sm:$0xff] }
 0x289   : > { %v3967_v42 = vpop.eup %3966  ;;  %v2149_v62 = vmul.f32 %v2021_v43, %v1125_v6  ;;  %v2019_v0 = vadd.f32 1.0, %v3965_v57  ;;  %3974 = vtanh.f32 %v1775_v35  ;;  %v5951_v26 = vmul.f32 0.5, %v6605_v51 }
 0x28a   : > { %3041 = vmatmul.mubr.bf16.gmra.mxu1 %v2474_v63  ;;  %v2023_v59 = vadd.f32 1.0, %v3967_v42  ;;  %v1128_v38 = vmul.f32 0.5, %v6611_v29  ;;  %v2028_v45 = vadd.f32 1.0, %v5776_v4  ;;  %v1132_v23 = vmul.f32 0.5, %v6612_v16 }
 0x28b   : > { %v2477_v58 = vpack.c.bf16 %v2149_v62, %v2145_v37  ;;  %v2024_v20 = vadd.f32 1.0, %v6613_v46  ;;  %v2030_v55 = vadd.f32 1.0, %v5805_v39  ;;  %v2147_v6 = vmul.f32 %v2019_v0, %v1123_v61  ;;  %v5989_v0 = vld [vmem:[%s6167_s4] ss:$0 sm:$0xff] }
 0x28c   : > { %v2151_v52 = vmul.f32 %v2023_v59, %v1127_v19  ;;  %v1649_v3 = vadd.f32 %v5785_v25, %v5734_v53  ;;  %v1653_v51 = vadd.f32 %v5840_v1, %v5780_v32  ;;  %v1134_v4 = vmul.f32 0.5, %v6614_v41  ;;  %v5970_v61 = vpop.f32.mrf.mxu0 }
 0x28d   : > { %2887 = vmatprep.mubr.bf16.mxu0 %v2477_v58  ;;  %v2026_v15 = vadd.f32 1.0, %v6615_v56  ;;  %v1651_v9 = vadd.f32 %v5815_v30, %v5750_v34  ;;  %v1655_v39 = vadd.f32 %v5843_v27, %v5788_v22  ;;  %v5972_v25 = vmul.f32 %v2028_v45, %v1132_v23 }
 0x28e   : > { %v2479_v17 = vpack.c.bf16 %v2151_v52, %v2147_v6  ;;  %v1777_v18 = vmul.f32 0.7978846, %v1649_v3  ;;  %v1781_v1 = vmul.f32 0.7978846, %v1653_v51  ;;  %v1130_v35 = vmul.f32 0.5, %v6616_v11  ;;  %v6620_v52 = vld [vmem:[#allocation23_spill] sm:$0xff] }
 0x28f   : > { %2888 = vmatmul.mubr.bf16.gmra.mxu0 %v2476_v13  ;;  %v5975_v63 = vmul.f32 %v2030_v55, %v1134_v4  ;;  %v1779_v43 = vmul.f32 0.7978846, %v1651_v9  ;;  %v1783_v19 = vmul.f32 0.7978846, %v1655_v39  ;;  %v2478_v57 = vpack.c.bf16 %v2150_v24, %v2146_v2  ;;  %v3359_v2 = vpop.f32.mrf.mxu0  ;;  %v6618_v55 = vld [vmem:[#allocation41_spill] sm:$0xff]  ;;  %v6621_v3 = vld [vmem:[#allocation16_spill] sm:$0xff] }
 0x290   : > { %3048 = vmatprep.mubr.bf16.mxu1 %v2479_v17  ;;  %v1133_v30 = vmul.f32 0.5, %v5670_v12  ;;  %v5978_v27 = vmul.f32 %v2024_v20, %v1128_v38  ;;  %3976 = vtanh.f32 %v1777_v18  ;;  %v5980_v42 = vpop.f32.mrf.mxu1  ;;  %v1131_v37 = vmul.f32 0.5, %v5650_v60  ;;  %v6617_v20 = vld [vmem:[#allocation56_spill] sm:$0xff]  ;;  %v6622_v39 = vld [vmem:[#allocation34_spill] sm:$0xff] }
 0x291   : > { %v1135_v13 = vmul.f32 0.5, %v5679_v8  ;;  %v5984_v62 = vmul.f32 %v2026_v15, %v1130_v35  ;;  %3978 = vtanh.f32 %v1781_v1  ;;  %v5994_v24 = vmul.f32 0.5, %v5734_v53  ;;  %v3361_v41 = vpop.f32.mrf.mxu0  ;;  %v6623_v17 = vld [vmem:[#allocation58_spill] sm:$0xff] }
 0x292   : > { %3049 = vmatmul.mubr.bf16.gmra.mxu1 %v2478_v57  ;;  %v2480_v12 = vpack.c.bf16 %v5972_v25, %v5978_v27  ;;  %3980 = vtanh.f32 %v1779_v43  ;;  %v3342_v60 = vadd.f32 %v5782_v44, %v5764_v5  ;;  %v6002_v29 = vmul.f32 0.5, %v5780_v32  ;;  %v3471_v45 = vpop.f32.mrf.mxu1  ;;  %v6624_v11 = vld [vmem:[#allocation54_spill] sm:$0xff] }
 0x293   : > { %v3969_v8 = vpop.eup %3968  ;;  %v2482_v59 = vpack.c.bf16 %v5975_v63, %v5984_v62  ;;  %v6005_v38 = vmul.f32 0.5, %v5750_v34  ;;  %3982 = vtanh.f32 %v1783_v19  ;;  %v3454_v5 = vadd.f32 %v5795_v40, %v5774_v48  ;;  %v6619_v34 = vld [vmem:[#allocation48_spill] sm:$0xff]  ;;  %v6625_v63 = vld [vmem:[#allocation66_spill] sm:$0xff]  ;;  %v3362_v62 = vpop.f32.mrf.mxu0 }
 0x294   : > { %v3971_v58 = vpop.eup %3970  ;;  %v2025_v53 = vadd.f32 1.0, %v3969_v8  ;;  %v2786_v16 = vadd.f32 %v3342_v60, %v5989_v0  ;;  %v3345_v44 = vadd.f32 %v5812_v50, %v5798_v21  ;;  %v6013_v32 = vmul.f32 0.5, %v6617_v20  ;;  %v3473_v18 = vpop.f32.mrf.mxu1 }
 0x295   : > { %v3973_v23 = vpop.eup %3972  ;;  %v2029_v46 = vadd.f32 1.0, %v3971_v58  ;;  %v3457_v6 = vadd.f32 %v6619_v34, %v6618_v55  ;;  %v3348_v51 = vadd.f32 %v6621_v3, %v6620_v52  ;;  %v3460_v25 = vadd.f32 %v6623_v17, %v6622_v39  ;;  %v6627_v58 = vld [vmem:[#allocation60_spill] sm:$0xff] }
 0x296   : > { %v3975_v4 = vpop.eup %3974  ;;  %v2153_v56 = vmul.f32 %v2025_v53, %v5951_v26  ;;  %v2027_v15 = vadd.f32 1.0, %v3973_v23  ;;  %v2947_v48 = vadd.f32 %v3454_v5, %v2786_v16  ;;  %v2789_v40 = vadd.f32 %v3345_v44, %v5989_v0  ;;  %v3474_v5 = vpop.f32.mrf.mxu1  ;;  %v6629_v52 = vld [vmem:[#allocation64_spill] sm:$0xff] }
 0x297   : > { %v2157_v21 = vmul.f32 %v2029_v46, %v1133_v30  ;;  %v2031_v50 = vadd.f32 1.0, %v3975_v4  ;;  %v2794_v9 = vadd.f32 %v3348_v51, %v5989_v0  ;;  %v2032_v35 = vadd.f32 1.0, %v6624_v11  ;;  %v6628_v46 = vld [vmem:[#allocation53_spill] sm:$0xff]  ;;  %v6630_v51 = vld [vmem:[#allocation62_spill] sm:$0xff]  ;;  %v6632_v17 = vld [vmem:[#allocation52_spill] sm:$0xff] }
 0x298   : > { %v2155_v1 = vmul.f32 %v2027_v15, %v1131_v37  ;;  %3073 = vst [vmem:[%s6025_s15] sm:$0xff] %v2947_v48  ;;  %v2950_v26 = vadd.f32 %v3457_v6, %v2789_v40  ;;  %v3351_v43 = vadd.f32 %v5894_v33, %v6625_v63  ;;  %v3354_v27 = vadd.f32 %v5921_v28, %v5906_v47  ;;  %v6626_v37 = vld [vmem:[#allocation49_spill] sm:$0xff] }
 0x299   : > { %v2481_v19 = vpack.c.bf16 %v2157_v21, %v2153_v56  ;;  %v2159_v57 = vmul.f32 %v2031_v50, %v1135_v13  ;;  %v2955_v30 = vadd.f32 %v3460_v25, %v2794_v9  ;;  %v2036_v60 = vadd.f32 1.0, %v6626_v37  ;;  %v6631_v56 = vld [vmem:[#allocation65_spill] sm:$0xff] }
 0x29a   : > { %3074 = vst [vmem:[%s6025_s15 + $0x8] sm:$0xff] %v2950_v26  ;;  %v2797_v8 = vadd.f32 %v3351_v43, %v5989_v0  ;;  %v3463_v53 = vadd.f32 %v5901_v14, %v6627_v58  ;;  %v3357_v16 = vadd.f32 %v5948_v49, %v5940_v10  ;;  %v2802_v13 = vadd.f32 %v3354_v27, %v5989_v0 }
 0x29b   : > { %2895 = vmatprep.mubr.bf16.mxu0 %v2481_v19  ;;  %v2483_v33 = vpack.c.bf16 %v2159_v57, %v2155_v1  ;;  %3075 = vst [vmem:[%s6025_s15 + $0x10] sm:$0xff] %v2955_v30  ;;  %v3466_v47 = vadd.f32 %v5936_v54, %v5915_v31  ;;  %v3360_v28 = vadd.f32 %v3359_v2, %v5970_v61  ;;  %v2038_v20 = vadd.f32 1.0, %v6628_v46 }
 0x29c   : > { %2896 = vmatmul.mubr.bf16.gmra.mxu0 %v2480_v12  ;;  %v2958_v44 = vadd.f32 %v3463_v53, %v2797_v8  ;;  %v2805_v23 = vadd.f32 %v3357_v16, %v5989_v0  ;;  %v3469_v14 = vadd.f32 %v5962_v36, %v5946_v7  ;;  %v3363_v10 = vadd.f32 %v3362_v62, %v3361_v41 }
 0x29d   : > { %v3977_v49 = vpop.eup %3976  ;;  %3056 = vmatprep.mubr.bf16.mxu1 %v2483_v33  ;;  %v2963_v55 = vadd.f32 %v3466_v47, %v2802_v13  ;;  %v2810_v31 = vadd.f32 %v3360_v28, %v5989_v0  ;;  %v3472_v54 = vadd.f32 %v3471_v45, %v5980_v42  ;;  %v3475_v7 = vadd.f32 %v3474_v5, %v3473_v18 }
 0x29e   : > { %v3979_v61 = vpop.eup %3978  ;;  %3057 = vmatmul.mubr.bf16.gmra.mxu1 %v2482_v59  ;;  %v2033_v2 = vadd.f32 1.0, %v3977_v49  ;;  %3076 = vst [vmem:[%s6025_s15 + $0x18] sm:$0xff] %v2958_v44  ;;  %v2966_v12 = vadd.f32 %v3469_v14, %v2805_v23  ;;  %v2813_v34 = vadd.f32 %v3363_v10, %v5989_v0  ;;  %v1136_v3 = vmul.f32 0.5, %v6629_v52 }
 0x29f   : > { %v3981_v36 = vpop.eup %3980  ;;  %v2037_v6 = vadd.f32 1.0, %v3979_v61  ;;  %v1142_v41 = vmul.f32 0.5, %v6630_v51  ;;  %3077 = vst [vmem:[%s6025_s15 + $0x20] sm:$0xff] %v2963_v55  ;;  %v2971_v4 = vadd.f32 %v3472_v54, %v2810_v31  ;;  %v2164_v59 = vmul.f32 %v2036_v60, %v6013_v32 }
 0x2a0   : > { %v3983_v42 = vpop.eup %3982  ;;  %v2035_v45 = vadd.f32 1.0, %v3981_v36  ;;  %v2034_v15 = vadd.f32 1.0, %v6631_v56  ;;  %3078 = vst [vmem:[%s6025_s15 + $0x28] sm:$0xff] %v2966_v12  ;;  %v2974_v48 = vadd.f32 %v3475_v7, %v2813_v34  ;;  %v2161_v40 = vmul.f32 %v2033_v2, %v5994_v24 }
 0x2a1   : > { %v2165_v21 = vmul.f32 %v2037_v6, %v6002_v29  ;;  %v1143_v50 = vmul.f32 0.5, %v5788_v22  ;;  %v2039_v9 = vadd.f32 1.0, %v3983_v42  ;;  %3079 = vst [vmem:[%s6025_s15 + $0x30] sm:$0xff] %v2971_v4  ;;  %v2160_v39 = vmul.f32 %v2032_v35, %v1136_v3 }
 0x2a2   : > { %v1138_v25 = vmul.f32 0.5, %v6632_v17  ;;  %v2166_v18 = vmul.f32 %v2038_v20, %v1142_v41  ;;  %3080 = vst [vmem:[%s6025_s15 + $0x38] sm:$0xff] %v2974_v48  ;;  %v3364_v1 = vpop.f32.mrf.mxu0  ;;  %v2163_v32 = vmul.f32 %v2035_v45, %v6005_v38 }
 0x2a3   : > { %v2485_v11 = vpack.c.bf16 %v2165_v21, %v2161_v40  ;;  %v2167_v26 = vmul.f32 %v2039_v9, %v1143_v50  ;;  %v2484_v63 = vpack.c.bf16 %v2164_v59, %v2160_v39 }
 0x2a4   : > { %v2162_v43 = vmul.f32 %v2034_v15, %v1138_v25  ;;  %v3365_v19 = vpop.f32.mrf.mxu0 }
 0x2a5   : > { %2903 = vmatprep.mubr.bf16.mxu0 %v2485_v11  ;;  %v2487_v24 = vpack.c.bf16 %v2167_v26, %v2163_v32  ;;  %v3366_v29 = vadd.f32 %v3365_v19, %v3364_v1 }
 0x2a6   : > { %2904 = vmatmul.mubr.bf16.gmra.mxu0 %v2484_v63  ;;  %v2486_v22 = vpack.c.bf16 %v2166_v18, %v2162_v43  ;;  %v3476_v57 = vpop.f32.mrf.mxu1  ;;  %v3367_v35 = vpop.f32.mrf.mxu0 }
 0x2a7   : > { %3064 = vmatprep.mubr.bf16.mxu1 %v2487_v24  ;;  %v2818_v30 = vadd.f32 %v3366_v29, %v5989_v0 }
 0x2a8   : > { %3065 = vmatmul.mubr.bf16.gmra.mxu1 %v2486_v22  ;;  %v3477_v27 = vpop.f32.mrf.mxu1  ;;  %v3368_v62 = vpop.f32.mrf.mxu0 }
 0x2a9   : > { %v3478_v38 = vadd.f32 %v3477_v27, %v3476_v57  ;;  %v3369_v37 = vadd.f32 %v3368_v62, %v3367_v35 }
 0x2aa   : > { %v3479_v60 = vpop.f32.mrf.mxu1 }
 0x2ab   : > { %v2979_v8 = vadd.f32 %v3478_v38, %v2818_v30  ;;  %v2821_v58 = vadd.f32 %v3369_v37, %v5989_v0 }
 0x2ac   : > { %v3480_v53 = vpop.f32.mrf.mxu1 }
 0x2ad   : > { %3081 = vst [vmem:[%s6025_s15 + $0x40] sm:$0xff] %v2979_v8  ;;  %v3481_v16 = vadd.f32 %v3480_v53, %v3479_v60 }
 0x2af   : > { %v2982_v33 = vadd.f32 %v3481_v16, %v2821_v58 }
 0x2b1   : > { %3082 = vst [vmem:[%s6025_s15 + $0x48] sm:$0xff] %v2982_v33 }
 0x2b6   : > { %v3370_v13 = vpop.f32.mrf.mxu0 }
 0x2b8   : > { %v3371_v47 = vpop.f32.mrf.mxu0 }
 0x2b9   : > { %v3372_v28 = vadd.f32 %v3371_v47, %v3370_v13 }
 0x2ba   : > { %v3482_v5 = vpop.f32.mrf.mxu1  ;;  %v3373_v44 = vpop.f32.mrf.mxu0 }
 0x2bb   : > { %v2826_v23 = vadd.f32 %v3372_v28, %v5989_v0 }
 0x2bc   : > { %v3483_v14 = vpop.f32.mrf.mxu1  ;;  %v3374_v10 = vpop.f32.mrf.mxu0 }
 0x2bd   : > { %v3484_v49 = vadd.f32 %v3483_v14, %v3482_v5  ;;  %v3375_v46 = vadd.f32 %v3374_v10, %v3373_v44 }
 0x2be   : > { %v3485_v20 = vpop.f32.mrf.mxu1 }
 0x2bf   : > { %v2987_v55 = vadd.f32 %v3484_v49, %v2826_v23  ;;  %v2829_v31 = vadd.f32 %v3375_v46, %v5989_v0 }
 0x2c0   : > { %v3486_v54 = vpop.f32.mrf.mxu1 }
 0x2c1   : > { %3083 = vst [vmem:[%s6025_s15 + $0x50] sm:$0xff] %v2987_v55  ;;  %v3487_v61 = vadd.f32 %v3486_v54, %v3485_v20 }
 0x2c3   : > { %v2990_v2 = vadd.f32 %v3487_v61, %v2829_v31 }
 0x2c5   : > { %3084 = vst [vmem:[%s6025_s15 + $0x58] sm:$0xff] %v2990_v2 }
 0x2cc   : > { %v3376_v12 = vpop.f32.mrf.mxu0 }
 0x2ce   : > { %v3377_v34 = vpop.f32.mrf.mxu0 }
 0x2cf   : > { %v3378_v7 = vadd.f32 %v3377_v34, %v3376_v12 }
 0x2d0   : > { %v3488_v36 = vpop.f32.mrf.mxu1  ;;  %v3379_v6 = vpop.f32.mrf.mxu0 }
 0x2d1   : > { %v2834_v52 = vadd.f32 %v3378_v7, %v5989_v0 }
 0x2d2   : > { %v3489_v3 = vpop.f32.mrf.mxu1  ;;  %v3380_v51 = vpop.f32.mrf.mxu0 }
 0x2d3   : > { %v3490_v41 = vadd.f32 %v3489_v3, %v3488_v36  ;;  %v3381_v4 = vadd.f32 %v3380_v51, %v3379_v6 }
 0x2d4   : > { %v3491_v42 = vpop.f32.mrf.mxu1 }
 0x2d5   : > { %v2995_v45 = vadd.f32 %v3490_v41, %v2834_v52  ;;  %v2837_v59 = vadd.f32 %v3381_v4, %v5989_v0 }
 0x2d6   : > { %v3492_v56 = vpop.f32.mrf.mxu1 }
 0x2d7   : > { %3085 = vst [vmem:[%s6025_s15 + $0x60] sm:$0xff] %v2995_v45  ;;  %v3493_v15 = vadd.f32 %v3492_v56, %v3491_v42 }
 0x2d9   : > { %v2998_v48 = vadd.f32 %v3493_v15, %v2837_v59 }
 0x2db   : > { %3086 = vst [vmem:[%s6025_s15 + $0x68] sm:$0xff] %v2998_v48 }
 0x2e0   : > { %v3382_v40 = vpop.f32.mrf.mxu0 }
 0x2e2   : > { %v3383_v21 = vpop.f32.mrf.mxu0 }
 0x2e3   : > { %v3384_v50 = vadd.f32 %v3383_v21, %v3382_v40 }
 0x2e4   : > { %v3385_v9 = vpop.f32.mrf.mxu0 }
 0x2e5   : > { %v2842_v25 = vadd.f32 %v3384_v50, %v5989_v0 }
 0x2e6   : > { %v3494_v39 = vpop.f32.mrf.mxu1  ;;  %v3386_v17 = vpop.f32.mrf.mxu0 }
 0x2e7   : > { %v3387_v18 = vadd.f32 %v3386_v17, %v3385_v9 }
 0x2e8   : > { %v3495_v1 = vpop.f32.mrf.mxu1 }
 0x2e9   : > { %v3496_v11 = vadd.f32 %v3495_v1, %v3494_v39  ;;  %v2845_v63 = vadd.f32 %v3387_v18, %v5989_v0 }
 0x2ea   : > { %v3497_v32 = vpop.f32.mrf.mxu1 }
 0x2eb   : > { %v3003_v26 = vadd.f32 %v3496_v11, %v2842_v25 }
 0x2ec   : > { %v3498_v43 = vpop.f32.mrf.mxu1 }
 0x2ed   : > { %3087 = vst [vmem:[%s6025_s15 + $0x70] sm:$0xff] %v3003_v26  ;;  %v3499_v19 = vadd.f32 %v3498_v43, %v3497_v32 }
 0x2ef   : > { %v3006_v24 = vadd.f32 %v3499_v19, %v2845_v63 }
 0x2f1   : > { %3088 = vst [vmem:[%s6025_s15 + $0x78] sm:$0xff] %v3006_v24 }
 0x2f9   : > { %v3388_v29 = vpop.f32.mrf.mxu0 }
 0x2fb   : > { %v3389_v22 = vpop.f32.mrf.mxu0 }
 0x2fc   : > { %v3500_v57 = vpop.f32.mrf.mxu1  ;;  %v3390_v35 = vadd.f32 %v3389_v22, %v3388_v29 }
 0x2fd   : > { %v3391_v30 = vpop.f32.mrf.mxu0 }
 0x2fe   : > { %v2850_v27 = vadd.f32 %v3390_v35, %v5989_v0  ;;  %v3501_v62 = vpop.f32.mrf.mxu1 }
 0x2ff   : > { %v3502_v38 = vadd.f32 %v3501_v62, %v3500_v57  ;;  %v3392_v37 = vpop.f32.mrf.mxu0 }
 0x300   : > { %v3503_v60 = vpop.f32.mrf.mxu1  ;;  %v3393_v8 = vadd.f32 %v3392_v37, %v3391_v30 }
 0x301   : > { %v3011_v58 = vadd.f32 %v3502_v38, %v2850_v27 }
 0x302   : > { %v2853_v53 = vadd.f32 %v3393_v8, %v5989_v0  ;;  %v3504_v16 = vpop.f32.mrf.mxu1 }
 0x303   : > { %3089 = vst [vmem:[%s6025_s15 + $0x80] sm:$0xff] %v3011_v58  ;;  %v3505_v33 = vadd.f32 %v3504_v16, %v3503_v60 }
 0x305   : > { %v3014_v13 = vadd.f32 %v3505_v33, %v2853_v53 }
 0x307   : > { %3090 = vst [vmem:[%s6025_s15 + $0x88] sm:$0xff] %v3014_v13 }
 0x312   : > { %v3394_v47 = vpop.f32.mrf.mxu0 }
 0x314   : > { %v3506_v28 = vpop.f32.mrf.mxu1  ;;  %v3395_v5 = vpop.f32.mrf.mxu0 }
 0x315   : > { %v3396_v44 = vadd.f32 %v3395_v5, %v3394_v47 }
 0x316   : > { %v3507_v23 = vpop.f32.mrf.mxu1  ;;  %v3397_v14 = vpop.f32.mrf.mxu0 }
 0x317   : > { %v2858_v10 = vadd.f32 %v3396_v44, %v5989_v0  ;;  %v3508_v49 = vadd.f32 %v3507_v23, %v3506_v28 }
 0x318   : > { %v3509_v46 = vpop.f32.mrf.mxu1  ;;  %v3398_v20 = vpop.f32.mrf.mxu0 }
 0x319   : > { %v3019_v55 = vadd.f32 %v3508_v49, %v2858_v10  ;;  %v3399_v31 = vadd.f32 %v3398_v20, %v3397_v14 }
 0x31a   : > { %v3510_v54 = vpop.f32.mrf.mxu1 }
 0x31b   : > { %3091 = vst [vmem:[%s6025_s15 + $0x90] sm:$0xff] %v3019_v55  ;;  %v2861_v61 = vadd.f32 %v3399_v31, %v5989_v0  ;;  %v3511_v2 = vadd.f32 %v3510_v54, %v3509_v46 }
 0x31d   : > { %v3022_v12 = vadd.f32 %v3511_v2, %v2861_v61 }
 0x31f   : > { %3092 = vst [vmem:[%s6025_s15 + $0x98] sm:$0xff] %v3022_v12 }
 0x32a   : > { %v3400_v34 = vpop.f32.mrf.mxu0 }
 0x32c   : > { %v3401_v7 = vpop.f32.mrf.mxu0 }
 0x32d   : > { %v3512_v36 = vpop.f32.mrf.mxu1  ;;  %v3402_v6 = vadd.f32 %v3401_v7, %v3400_v34 }
 0x32e   : > { %v3403_v52 = vpop.f32.mrf.mxu0 }
 0x32f   : > { %v2866_v3 = vadd.f32 %v3402_v6, %v5989_v0  ;;  %v3513_v51 = vpop.f32.mrf.mxu1 }
 0x330   : > { %v3514_v41 = vadd.f32 %v3513_v51, %v3512_v36  ;;  %v3404_v4 = vpop.f32.mrf.mxu0 }
 0x331   : > { %v3515_v42 = vpop.f32.mrf.mxu1  ;;  %v3405_v45 = vadd.f32 %v3404_v4, %v3403_v52 }
 0x332   : > { %v3027_v59 = vadd.f32 %v3514_v41, %v2866_v3 }
 0x333   : > { %v2869_v56 = vadd.f32 %v3405_v45, %v5989_v0  ;;  %v3516_v15 = vpop.f32.mrf.mxu1 }
 0x334   : > { %3093 = vst [vmem:[%s6025_s15 + $0xa0] sm:$0xff] %v3027_v59  ;;  %v3517_v48 = vadd.f32 %v3516_v15, %v3515_v42 }
 0x336   : > { %v3030_v40 = vadd.f32 %v3517_v48, %v2869_v56 }
 0x338   : > { %3094 = vst [vmem:[%s6025_s15 + $0xa8] sm:$0xff] %v3030_v40 }
 0x33f   : > { %v3406_v21 = vpop.f32.mrf.mxu0 }
 0x341   : > { %v3407_v50 = vpop.f32.mrf.mxu0 }
 0x342   : > { %v3518_v9 = vpop.f32.mrf.mxu1  ;;  %v3408_v39 = vadd.f32 %v3407_v50, %v3406_v21 }
 0x343   : > { %v3409_v17 = vpop.f32.mrf.mxu0 }
 0x344   : > { %v2874_v25 = vadd.f32 %v3408_v39, %v5989_v0  ;;  %v3519_v18 = vpop.f32.mrf.mxu1 }
 0x345   : > { %v3520_v1 = vadd.f32 %v3519_v18, %v3518_v9  ;;  %v3410_v11 = vpop.f32.mrf.mxu0 }
 0x346   : > { %v3521_v32 = vpop.f32.mrf.mxu1  ;;  %v3411_v26 = vadd.f32 %v3410_v11, %v3409_v17 }
 0x347   : > { %v3035_v63 = vadd.f32 %v3520_v1, %v2874_v25  ;;  %v3412_v43 = vpop.f32.mrf.mxu0 }
 0x348   : > { %v2877_v19 = vadd.f32 %v3411_v26, %v5989_v0  ;;  %v3522_v24 = vpop.f32.mrf.mxu1 }
 0x349   : > { %3095 = vst [vmem:[%s6025_s15 + $0xb0] sm:$0xff] %v3035_v63  ;;  %v3523_v29 = vadd.f32 %v3522_v24, %v3521_v32  ;;  %v3413_v22 = vpop.f32.mrf.mxu0 }
 0x34a   : > { %v3524_v57 = vpop.f32.mrf.mxu1  ;;  %v3414_v35 = vadd.f32 %v3413_v22, %v3412_v43 }
 0x34b   : > { %v3038_v30 = vadd.f32 %v3523_v29, %v2877_v19  ;;  %v3415_v27 = vpop.f32.mrf.mxu0 }
 0x34c   : > { %v2882_v62 = vadd.f32 %v3414_v35, %v5989_v0  ;;  %v3525_v38 = vpop.f32.mrf.mxu1 }
 0x34d   : > { %3096 = vst [vmem:[%s6025_s15 + $0xb8] sm:$0xff] %v3038_v30  ;;  %v3526_v37 = vadd.f32 %v3525_v38, %v3524_v57  ;;  %v3416_v60 = vpop.f32.mrf.mxu0 }
 0x34e   : > { %v3527_v8 = vpop.f32.mrf.mxu1  ;;  %v3417_v58 = vadd.f32 %v3416_v60, %v3415_v27 }
 0x34f   : > { %v3043_v53 = vadd.f32 %v3526_v37, %v2882_v62  ;;  %v3418_v16 = vpop.f32.mrf.mxu0 }
 0x350   : > { %v2885_v33 = vadd.f32 %v3417_v58, %v5989_v0  ;;  %v3528_v13 = vpop.f32.mrf.mxu1 }
 0x351   : > { %3097 = vst [vmem:[%s6025_s15 + $0xc0] sm:$0xff] %v3043_v53  ;;  %v3529_v47 = vadd.f32 %v3528_v13, %v3527_v8  ;;  %v3419_v28 = vpop.f32.mrf.mxu0 }
 0x352   : > { %v3530_v5 = vpop.f32.mrf.mxu1  ;;  %v3420_v44 = vadd.f32 %v3419_v28, %v3418_v16 }
 0x353   : > { %v3046_v23 = vadd.f32 %v3529_v47, %v2885_v33  ;;  %v3421_v14 = vpop.f32.mrf.mxu0 }
 0x354   : > { %v2890_v10 = vadd.f32 %v3420_v44, %v5989_v0  ;;  %v3531_v49 = vpop.f32.mrf.mxu1 }
 0x355   : > { %3098 = vst [vmem:[%s6025_s15 + $0xc8] sm:$0xff] %v3046_v23  ;;  %v3532_v46 = vadd.f32 %v3531_v49, %v3530_v5  ;;  %v3422_v20 = vpop.f32.mrf.mxu0 }
 0x356   : > { %v3533_v55 = vpop.f32.mrf.mxu1  ;;  %v3423_v31 = vadd.f32 %v3422_v20, %v3421_v14 }
 0x357   : > { %v3051_v54 = vadd.f32 %v3532_v46, %v2890_v10 }
 0x358   : > { %v2893_v61 = vadd.f32 %v3423_v31, %v5989_v0  ;;  %v3534_v2 = vpop.f32.mrf.mxu1 }
 0x359   : > { %3099 = vst [vmem:[%s6025_s15 + $0xd0] sm:$0xff] %v3051_v54  ;;  %v3535_v12 = vadd.f32 %v3534_v2, %v3533_v55 }
 0x35b   : > { %v3054_v34 = vadd.f32 %v3535_v12, %v2893_v61 }
 0x35c   : > { %v3424_v7 = vpop.f32.mrf.mxu0 }
 0x35d   : > { %3100 = vst [vmem:[%s6025_s15 + $0xd8] sm:$0xff] %v3054_v34 }
 0x35e   : > { %v3536_v36 = vpop.f32.mrf.mxu1  ;;  %v3425_v6 = vpop.f32.mrf.mxu0 }
 0x35f   : > { %v3426_v52 = vadd.f32 %v3425_v6, %v3424_v7 }
 0x360   : > { %v3537_v3 = vpop.f32.mrf.mxu1  ;;  %v3427_v51 = vpop.f32.mrf.mxu0 }
 0x361   : > { %v2898_v41 = vadd.f32 %v3426_v52, %v5989_v0  ;;  %v3538_v4 = vadd.f32 %v3537_v3, %v3536_v36 }
 0x362   : > { %v3539_v42 = vpop.f32.mrf.mxu1  ;;  %v3428_v45 = vpop.f32.mrf.mxu0 }
 0x363   : > { %v3059_v59 = vadd.f32 %v3538_v4, %v2898_v41  ;;  %v3429_v56 = vadd.f32 %v3428_v45, %v3427_v51 }
 0x364   : > { %v3540_v15 = vpop.f32.mrf.mxu1 }
 0x365   : > { %3101 = vst [vmem:[%s6025_s15 + $0xe0] sm:$0xff] %v3059_v59  ;;  %v2901_v48 = vadd.f32 %v3429_v56, %v5989_v0  ;;  %v3541_v40 = vadd.f32 %v3540_v15, %v3539_v42 }
 0x366   : > { %v3430_v21 = vpop.f32.mrf.mxu0 }
 0x367   : > { %v3062_v50 = vadd.f32 %v3541_v40, %v2901_v48 }
 0x368   : > { %v3542_v9 = vpop.f32.mrf.mxu1  ;;  %v3431_v39 = vpop.f32.mrf.mxu0 }
 0x369   : > { %3102 = vst [vmem:[%s6025_s15 + $0xe8] sm:$0xff] %v3062_v50  ;;  %v3432_v17 = vadd.f32 %v3431_v39, %v3430_v21 }
 0x36a   : > { %v3543_v25 = vpop.f32.mrf.mxu1  ;;  %v3433_v18 = vpop.f32.mrf.mxu0 }
 0x36b   : > { %v2906_v1 = vadd.f32 %v3432_v17, %v5989_v0  ;;  %v3544_v11 = vadd.f32 %v3543_v25, %v3542_v9 }
 0x36c   : > { %v3545_v32 = vpop.f32.mrf.mxu1  ;;  %v3434_v26 = vpop.f32.mrf.mxu0 }
 0x36d   : > { %v3067_v63 = vadd.f32 %v3544_v11, %v2906_v1  ;;  %v3435_v43 = vadd.f32 %v3434_v26, %v3433_v18 }
 0x36e   : > { %v3546_v19 = vpop.f32.mrf.mxu1 }
 0x36f   : > { %3103 = vst [vmem:[%s6025_s15 + $0xf0] sm:$0xff] %v3067_v63  ;;  %v2909_v24 = vadd.f32 %v3435_v43, %v5989_v0  ;;  %v3547_v29 = vadd.f32 %v3546_v19, %v3545_v32 }
 0x371   : > { %v3070_v22 = vadd.f32 %v3547_v29, %v2909_v24 }
 0x373   : > { %3104 = vst [vmem:[%s6025_s15 + $0xf8] sm:$0xff] %v3070_v22 }
 0x374   : > { %4103 = shalt.err (!%p4100_p9)
}
 0x375   : > { %s4104_s8 = scalar_lea.hbm %s6117_s11, 4096  ;;  %s4108_s26 = scalar_lea.hbm %s6168_s5, 8192 }
 0x376   : > { %p4105_p1 = scmp.ne.s32.totalorder %s6117_s11, %s4104_s8  ;;  %p4109_p11 = scmp.lt.s32.totalorder %s6117_s11, %s6168_s5 }
 0x377   : > { %p4110_p13 = scmp.lt.s32.totalorder %s4108_s26, %s4104_s8 }
 0x378   : > { %p4106_p8 = pnand %p4105_p1, %p6633_p6 }
 0x379   : > { %p4111_p2 = por %p4110_p13, %p4109_p11 }
 0x37a   : > { %p4107_p10 = pneg %p4106_p8 }
 0x37c   : > { %p4112_p4 = pnand %p4111_p2, %p4107_p10 }
 0x37e   : > { %4115 = shalt.err (!%p4112_p4)
}
 0x37f   : > { %s4174_s17 = smov 128   ;;  %s4175_s30 = smov 8  }
 0x380   : > { %3562 = dma.vmem_to_hbm [thread:$0]  (%p6633_p6), %s6119_s28, 4096, %s6117_s11, %s3106_s16, %s4174_s17, %s4174_s17, %s4175_s30  }
 0x381 PF: > { %s3134_s14 = sand.u32 1, %s4150_s18   ;;  %p6634_p12 = scmp.ne.s32.totalorder %s6303_s25, 0 }
 0x382   : > { %p6635_p0 = scmp.ge.s32.totalorder %s4162_s21, 2  ;;  %s3135_s22 = scalar_lea.sflag [#allocation5], %s3134_s14 }
 0x384   : > { %p3579_p5 = pnand %p6635_p0, %p6634_p12 }
 0x386   : > { %p3580_p3 = pneg %p3579_p5 }
 0x388   : > { %4145 = dma.done.wait (%p3580_p3), %s3135_s22, 4096  }
 0x389   : > { %4147 = vsyncadd (%p3580_p3), %s3135_s22, 4294963200  ;;  %p20_p7 = scmp.ge.s32.totalorder %s4289_s6, 4   ;;  %s6636_s18 = smov %s4154_s19 }
 0x38a   : > { %s6637_s19 = smov %s4158_s20  ;;  %s6638_s20 = smov %s4299_s10 }
 0x38b   : > { %s6639_s21 = smov %s4289_s6  ;;  %22 = sbr.rel (!%p20_p7) target bundleno = 7 (0x7), region = 97 }
 0x390   :  { %3140 = vsyncpa [#allocation4], 1 }
 0x391   :  { %3142 = vsyncpa [#allocation4 + $0x1], 1 }
 0x392   :  { %3143 = vsyncpa [#allocation7], 1 }
 0x393   :  { %3144 = vsyncpa [#allocation10], 1 }
 0x394   :  { %3145 = vsyncpa [#allocation5], 1 }
 0x395   :  { %3147 = vsyncpa [#allocation5 + $0x1], 1 }

</bundles_post_ra>
